<compile_context>
chip_gen: v6e
topology: v6e:2x2x1
jax: 0.10.0
libtpu: 0.0.40
codegen_flags: <defaults>
</compile_context>

<pallas_src>
import functools

import jax
import jax.numpy as jnp
import numpy as np
from jax import lax
from jax.experimental import pallas as pl
from jax.experimental.pallas import tpu as pltpu


def _gprgnn_kernel(temp_ref, x_ref, adj_ref, w1_ref, b1_ref, w2_ref, b2_ref,
                   out_ref, zb_ref, hid_ref,
                   *, K, C, tm, tc, n_chunks, adj_full):
    k = pl.program_id(0)   # 0 = MLP pass, 1..K = GPR propagation hops
    i = pl.program_id(1)   # node row-tile index
    row0 = pl.multiple_of(i * tm, tm)

    @pl.when(k == 0)
    def _mlp():
        # F.dropout is the identity in eval mode.
        h = jnp.dot(x_ref[...], w1_ref[...], preferred_element_type=jnp.float32)
        h = jnp.maximum(h + b1_ref[...], 0.0)
        z0 = jnp.dot(h, w2_ref[...], preferred_element_type=jnp.float32) + b2_ref[...]
        hid_ref[pl.ds(row0, tm), :] = temp_ref[0] * z0
        zb_ref[0, pl.ds(row0, tm), :] = z0

    @pl.when(k > 0)
    def _propagate():
        cur = (k - 1) % 2          # buffer holding z_{k-1}
        nxt = k % 2                # buffer receiving z_k

        def chunk_dot(c):
            col = pl.multiple_of(c * tc, tc)
            if adj_full:
                a_blk = adj_ref[pl.ds(row0, tm), pl.ds(col, tc)]
            else:
                a_blk = adj_ref[:, pl.ds(col, tc)]
            z_blk = zb_ref[cur, pl.ds(col, tc), :]
            return jnp.dot(a_blk.astype(jnp.float32), z_blk,
                           preferred_element_type=jnp.float32)

        # Register-resident accumulation: no VMEM acc scratch, no zero-fill, no per-chunk
        # accumulator load/store traffic.
        acc = chunk_dot(0)
        if n_chunks > 1:
            if n_chunks <= 8:
                for c in range(1, n_chunks):          # static unroll (aligned slices)
                    acc = acc + chunk_dot(c)
            else:
                acc = lax.fori_loop(1, n_chunks,
                                    lambda c, a: a + chunk_dot(c), acc)

        z_new = acc                                                  # f32
        hid = hid_ref[pl.ds(row0, tm), :] + temp_ref[k] * z_new

        @pl.when(k < K)
        def _store_partial():
            hid_ref[pl.ds(row0, tm), :] = hid
            zb_ref[nxt, pl.ds(row0, tm), :] = z_new

        @pl.when(k == K)
        def _finalize():
            # log_softmax over the true class columns only (the rest is lane padding).
            col_ids = lax.broadcasted_iota(jnp.int32, hid.shape, 1)
            hm = jnp.where(col_ids < C, hid, jnp.float32(-1e30))
            m = jnp.max(hm, axis=1, keepdims=True)
            s = hm - m
            lse = jnp.log(jnp.sum(jnp.exp(s), axis=1, keepdims=True))
            out_ref[...] = s - lse


def _ceil_to(a, m):
    return ((a + m - 1) // m) * m


def _vmem_need(tm, Npad, F, H, Cpad, adj_bytes, adj_full):
    adj_vmem = (2 * Npad * Npad * adj_bytes) if adj_full else (2 * tm * Npad * adj_bytes)
    return int(
        adj_vmem                               # adj (double-buffered by the pipeline)
        + 2 * tm * F * 4                       # x tiles (double buffered)
        + 2 * tm * Cpad * 4                    # out tiles (double buffered)
        + 2 * Npad * Cpad * 4                  # z ping-pong scratch (f32)
        + Npad * Cpad * 4                      # hidden accumulator scratch
        + 2 * tm * Cpad * 4                    # register-accumulator spill headroom
        + 2 * (F * H + H + H * Cpad + Cpad) * 4)   # resident weights / biases


def _vmem_capacity_bytes():
    try:
        cap = getattr(pltpu.get_tpu_info(), "vmem_capacity_bytes", None)
        if cap:
            return int(cap)
    except Exception:
        pass
    return 128 << 20   # v5e / v6e default


def _pick_config(N, F, H, Cpad, adj_bytes, budget, tm, adj_resident):
    Npad = _ceil_to(max(N, 1), 512)
    cands = [t for t in (512, 256, 128) if Npad % t == 0] if tm is None else [tm]
    # 1) prefer a fully VMEM-resident adjacency with the largest tile that fits.
    if adj_resident in (None, True):
        for t in cands:
            need = _vmem_need(t, Npad, F, H, Cpad, adj_bytes, True)
            if need <= budget or adj_resident is True:
                return t, Npad, True, need
    # 2) fall back to streamed (tm, Npad) row slabs.
    for t in cands:
        need = _vmem_need(t, Npad, F, H, Cpad, adj_bytes, False)
        if need <= budget:
            return t, Npad, False, need
    # TODO(synk): for graphs where even the smallest slab exceeds VMEM, also tile the
    # adjacency columns with a third grid axis and move z/hidden to HBM.
    t = cands[-1]
    return t, Npad, False, _vmem_need(t, Npad, F, H, Cpad, adj_bytes, False)


def gprgnn_forward(x, adj, w1, b1, w2, b2, temp, K, *,
                   tm=None, adj_dtype=jnp.bfloat16, adj_resident=None,
                   vmem_budget_bytes=None):
    """GPRGNN_base forward (eval mode) with a dense gcn-normalized adjacency."""
    N, F = x.shape
    H = w1.shape[1]
    C = w2.shape[1]
    assert adj.shape == (N, N)
    assert temp.shape == (K + 1,)
    assert K >= 1
    if tm is not None:
        assert tm in (128, 256, 512)

    adj_bytes = jnp.dtype(adj_dtype).itemsize
    Cpad = _ceil_to(C, 128)

    vmem_cap = _vmem_capacity_bytes()
    if vmem_budget_bytes is None:
        # ~40 MiB on 128 MiB chips (v5e/v6e), ~37 MiB on 64 MiB v7x.
        vmem_budget_bytes = min(40 << 20, int(0.58 * vmem_cap))

    tm, Npad, adj_full, need = _pick_config(N, F, H, Cpad, adj_bytes,
                                            vmem_budget_bytes, tm, adj_resident)
    T = Npad // tm
    tc = 512
    n_chunks = Npad // tc
    vmem_limit = int(min(max(need + (8 << 20), 32 << 20), int(0.80 * vmem_cap)))

    f32 = jnp.float32
    xp = jnp.pad(x.astype(f32), ((0, Npad - N), (0, 0)))
    # cast-then-pad: never materialize a padded f32 (Npad, Npad) adjacency in HBM.
    adjp = jnp.pad(adj.astype(adj_dtype), ((0, Npad - N), (0, Npad - N)))
    w1f = w1.astype(f32)
    b1f = jnp.reshape(b1, (1, H)).astype(f32)
    w2p = jnp.pad(w2.astype(f32), ((0, 0), (0, Cpad - C)))
    b2p = jnp.pad(jnp.reshape(b2, (1, C)).astype(f32), ((0, 0), (0, Cpad - C)))
    tempf = temp.astype(f32)

    kernel = functools.partial(_gprgnn_kernel, K=K, C=C, tm=tm, tc=tc,
                               n_chunks=n_chunks, adj_full=adj_full)

    if adj_full:
        # Whole adjacency pinned at block (0,0): DMA'd from HBM exactly once and kept
        # VMEM-resident across all K hops and all row tiles.
        adj_spec = pl.BlockSpec((Npad, Npad), lambda k, i, _: (0, 0))
    else:
        # (tm, Npad) row slab per node tile; pinned during k == 0 so the adjacency is
        # streamed from HBM exactly K times.
        adj_spec = pl.BlockSpec((tm, Npad),
                                lambda k, i, _: (jnp.where(k == 0, 0, i), 0))

    grid_spec = pltpu.PrefetchScalarGridSpec(
        num_scalar_prefetch=1,                    # gamma coefficients -> SMEM
        grid=(K + 1, T),
        in_specs=[
            # x: only needed on the k == 0 (MLP) pass; pinned afterwards.
            pl.BlockSpec((tm, F), lambda k, i, _: (jnp.where(k == 0, i, 0), 0)),
            adj_spec,
            pl.BlockSpec((F, H), lambda k, i, _: (0, 0)),
            pl.BlockSpec((1, H), lambda k, i, _: (0, 0)),
            pl.BlockSpec((H, Cpad), lambda k, i, _: (0, 0)),
            pl.BlockSpec((1, Cpad), lambda k, i, _: (0, 0)),
        ],
        # Each output row tile is written exactly once, at k == K (lane-dense (tm, 128)
        # stores); before that the block index is pinned at (0,0) so the still-unwritten
        # buffer is never flushed to HBM (revisit assumption documented in the header).
        out_specs=pl.BlockSpec((tm, Cpad),
                               lambda k, i, _: (jnp.where(k == K, i, 0), 0)),
        scratch_shapes=[
            pltpu.VMEM((2, Npad, Cpad), jnp.float32),   # z ping-pong (kept in f32)
            pltpu.VMEM((Npad, Cpad), jnp.float32),      # hidden = sum_k gamma_k z_k
        ],
    )

    adj_reads = 1 if adj_full else K
    flops = 2 * Npad * F * H + 2 * Npad * H * Cpad + 2 * K * Npad * Npad * Cpad
    bytes_accessed = (adj_reads * Npad * Npad * adj_bytes + Npad * F * 4
                      + Npad * Cpad * 4 + (F * H + H * Cpad + H + Cpad) * 4)

    out = pl.pallas_call(
        kernel,
        out_shape=jax.ShapeDtypeStruct((Npad, Cpad), jnp.float32),
        grid_spec=grid_spec,
        compiler_params=pltpu.CompilerParams(
            dimension_semantics=("arbitrary", "arbitrary"),
            vmem_limit_bytes=vmem_limit,
        ),
        cost_estimate=pl.CostEstimate(
            flops=int(flops),
            transcendentals=int(Npad * Cpad),
            bytes_accessed=int(bytes_accessed),
        ),
    )(tempf, xp, adjp, w1f, b1f, w2p, b2p)

    return out[:N, :C]


if __name__ == "__main__":
    key = jax.random.PRNGKey(0)
    N, F_in, H, C = 512, 16, 32, 8       # nodes, num_features, hidden, num_class
    K, alpha = 10, 0.1                   # GPR_prop hyperparameters (Init='PPR')

    k0, k1, k2, k3, k4, k5 = jax.random.split(key, 6)

    # Node features.
    x = jax.random.normal(k0, (N, F_in), jnp.float32)

    # Random undirected graph -> dense gcn_norm adjacency (self-loops + D^-1/2 (A+I) D^-1/2);
    # host-side equivalent of edge_index + gcn_norm + aggr='add'.
    upper = jnp.triu(jax.random.bernoulli(k1, 0.02, (N, N)).astype(jnp.float32), k=1)
    A = upper + upper.T
    A_hat = A + jnp.eye(N, dtype=jnp.float32)
    deg = A_hat.sum(axis=1)
    dinv = jnp.where(deg > 0, 1.0 / jnp.sqrt(deg), 0.0)
    adj = dinv[:, None] * A_hat * dinv[None, :]

    # Deterministic parameter init (shapes of nn.Linear(F_in, H), nn.Linear(H, C)).
    w1 = jax.random.normal(k2, (F_in, H), jnp.float32) * (1.0 / np.sqrt(F_in))
    b1 = jax.random.normal(k3, (1, H), jnp.float32) * 0.01
    w2 = jax.random.normal(k4, (H, C), jnp.float32) * (1.0 / np.sqrt(H))
    b2 = jax.random.normal(k5, (1, C), jnp.float32) * 0.01

    # GPR_prop 'PPR' initialization of the gamma coefficients.
    temp_np = alpha * (1.0 - alpha) ** np.arange(K + 1)
    temp_np[-1] = (1.0 - alpha) ** K
    temp = jnp.asarray(temp_np, jnp.float32)

    # ---- reference (numpy float64); adj is bf16-rounded to match the kernel's storage ----
    def bf16_round(a):
        return np.asarray(
            jnp.asarray(a, jnp.float32).astype(jnp.bfloat16).astype(jnp.float32),
            dtype=np.float64)

    xn = np.asarray(x, np.float64)
    w1n, b1n = np.asarray(w1, np.float64), np.asarray(b1, np.float64)
    w2n, b2n = np.asarray(w2, np.float64), np.asarray(b2, np.float64)
    tn = np.asarray(temp, np.float64)
    adj_q = bf16_round(np.asarray(adj, np.float32))

    h_ref = np.maximum(xn @ w1n + b1n, 0.0)
    z_ref = h_ref @ w2n + b2n
    hidden_ref = tn[0] * z_ref
    for kk in range(1, K + 1):
        z_ref = adj_q @ z_ref
        hidden_ref = hidden_ref + tn[kk] * z_ref
    m_ref = hidden_ref.max(axis=1, keepdims=True)
    s_ref = hidden_ref - m_ref
    ref = s_ref - np.log(np.exp(s_ref).sum(axis=1, keepdims=True))

    # Run the kernel in three configurations:
    #   (a) auto tiling (tm=512, T=1, adjacency VMEM-resident) -- the fast path,
    #   (b) tm=128 with resident adjacency (exercises row-tiled slicing of cached adj),
    #   (c) tm=128 with streamed (tm, Npad) adj row slabs (the large-graph fallback).
    configs = [dict(), dict(tm=128), dict(tm=128, adj_resident=False)]
    for cfg in configs:
        out = gprgnn_forward(x, adj, w1, b1, w2, b2, temp, K, **cfg)
        out = jax.block_until_ready(out)
        out_np = np.asarray(out, dtype=np.float64)

        assert out.shape == (N, C)
        assert np.all(np.isfinite(out_np))
        # log_softmax rows must normalize to 1 over the true class axis.
        assert np.allclose(np.exp(out_np).sum(axis=1), 1.0, atol=1e-3)
        assert np.allclose(out_np, ref, atol=5e-3, rtol=5e-3), cfg

    print("KERNEL_OK")
</pallas_src>

<mosaic_0001>
module attributes {stable_mosaic.version = 11 : i64} {
  func.func @_gprgnn_kernel(%arg0: i32, %arg1: i32, %arg2: memref<11xf32, #tpu.memory_space<smem>>, %arg3: memref<512x16xf32, #tpu.memory_space<vmem>>, %arg4: memref<512x512xbf16, #tpu.memory_space<vmem>>, %arg5: memref<16x32xf32, #tpu.memory_space<vmem>>, %arg6: memref<1x32xf32, #tpu.memory_space<vmem>>, %arg7: memref<32x128xf32, #tpu.memory_space<vmem>>, %arg8: memref<1x128xf32, #tpu.memory_space<vmem>>, %arg9: memref<512x128xf32, #tpu.memory_space<vmem>>, %arg10: memref<2x512x128xf32, #tpu.memory_space<vmem>>, %arg11: memref<512x128xf32, #tpu.memory_space<vmem>>) attributes {dimension_semantics = [#tpu.dimension_semantics<arbitrary>, #tpu.dimension_semantics<arbitrary>], iteration_bounds = array<i64: 11, 1>, scalar_prefetch = 1 : i64, scratch_operands = 2 : i64, tpu.core_type = #tpu.core_type<tc>, window_params = [{transform_indices = @transform_0, window_bounds = array<i64: 512, 16>}, {pipeline_mode = #tpu.pipeline_mode<synchronous>, transform_indices = @transform_1, window_bounds = array<i64: 512, 512>}, {pipeline_mode = #tpu.pipeline_mode<synchronous>, transform_indices = @transform_2, window_bounds = array<i64: 16, 32>}, {pipeline_mode = #tpu.pipeline_mode<synchronous>, transform_indices = @transform_3, window_bounds = array<i64: 1, 32>}, {pipeline_mode = #tpu.pipeline_mode<synchronous>, transform_indices = @transform_4, window_bounds = array<i64: 32, 128>}, {pipeline_mode = #tpu.pipeline_mode<synchronous>, transform_indices = @transform_5, window_bounds = array<i64: 1, 128>}, {transform_indices = @transform_6, window_bounds = array<i64: 512, 128>}]} {
    %c512_i32 = arith.constant 512 : i32
    %0 = arith.muli %arg1, %c512_i32 : i32
    %1 = tpu.assume_multiple %0, 512 : i32
    %c0_i32 = arith.constant 0 : i32
    %2 = arith.cmpi eq, %arg0, %c0_i32 : i32
    %3 = arith.extui %2 : i1 to i32
    %c0_i32_0 = arith.constant 0 : i32
    %4 = arith.cmpi ne, %3, %c0_i32_0 : i32
    scf.if %4 {
      %c0 = arith.constant 0 : index
      %c0_3 = arith.constant 0 : index
      %8 = vector.load %arg3[%c0, %c0_3] : memref<512x16xf32, #tpu.memory_space<vmem>>, vector<512x16xf32>
      %c0_4 = arith.constant 0 : index
      %c0_5 = arith.constant 0 : index
      %9 = vector.load %arg5[%c0_4, %c0_5] : memref<16x32xf32, #tpu.memory_space<vmem>>, vector<16x32xf32>
      %cst = arith.constant dense<0.000000e+00> : vector<512x32xf32>
      %10 = tpu.matmul %8, %9, %cst {dimension_numbers = #tpu.dot_dimension_numbers<[1], [0], [0], [1], [0, 0, 1, 1], [], []>} : vector<512x16xf32>, vector<16x32xf32>, vector<512x32xf32> -> vector<512x32xf32>
      %c0_6 = arith.constant 0 : index
      %c0_7 = arith.constant 0 : index
      %11 = vector.load %arg6[%c0_6, %c0_7] : memref<1x32xf32, #tpu.memory_space<vmem>>, vector<1x32xf32>
      %12 = vector.broadcast %11 : vector<1x32xf32> to vector<512x32xf32>
      %13 = arith.addf %10, %12 : vector<512x32xf32>
      %cst_8 = arith.constant 0.000000e+00 : f32
      %14 = vector.broadcast %cst_8 : f32 to vector<512x32xf32>
      %15 = arith.maximumf %13, %14 : vector<512x32xf32>
      %c0_9 = arith.constant 0 : index
      %c0_10 = arith.constant 0 : index
      %16 = vector.load %arg7[%c0_9, %c0_10] : memref<32x128xf32, #tpu.memory_space<vmem>>, vector<32x128xf32>
      %cst_11 = arith.constant dense<0.000000e+00> : vector<512x128xf32>
      %17 = tpu.matmul %15, %16, %cst_11 {dimension_numbers = #tpu.dot_dimension_numbers<[1], [0], [0], [1], [0, 0, 1, 1], [], []>} : vector<512x32xf32>, vector<32x128xf32>, vector<512x128xf32> -> vector<512x128xf32>
      %c0_12 = arith.constant 0 : index
      %c0_13 = arith.constant 0 : index
      %18 = vector.load %arg8[%c0_12, %c0_13] : memref<1x128xf32, #tpu.memory_space<vmem>>, vector<1x128xf32>
      %19 = vector.broadcast %18 : vector<1x128xf32> to vector<512x128xf32>
      %20 = arith.addf %17, %19 : vector<512x128xf32>
      %c0_14 = arith.constant 0 : index
      %21 = memref.load %arg2[%c0_14] : memref<11xf32, #tpu.memory_space<smem>>
      %22 = vector.broadcast %21 : f32 to vector<512x128xf32>
      %23 = arith.mulf %22, %20 : vector<512x128xf32>
      %24 = arith.index_cast %1 : i32 to index
      %c0_15 = arith.constant 0 : index
      %25 = vector.load %arg11[%24, %c0_15] : memref<512x128xf32, #tpu.memory_space<vmem>>, vector<512x128xf32>
      tpu.vector_store %arg11[%24, %c0_15], %23 {strides = array<i32>} : memref<512x128xf32, #tpu.memory_space<vmem>>, vector<512x128xf32>,
      %c0_16 = arith.constant 0 : index
      %26 = arith.index_cast %1 : i32 to index
      %c0_17 = arith.constant 0 : index
      %27 = vector.load %arg10[%c0_16, %26, %c0_17] : memref<2x512x128xf32, #tpu.memory_space<vmem>>, vector<1x512x128xf32>
      %28 = vector.shape_cast %27 : vector<1x512x128xf32> to vector<512x128xf32>
      %29 = vector.shape_cast %20 : vector<512x128xf32> to vector<1x512x128xf32>
      tpu.vector_store %arg10[%c0_16, %26, %c0_17], %29 {strides = array<i32>} : memref<2x512x128xf32, #tpu.memory_space<vmem>>, vector<1x512x128xf32>,
    } else {
    }
    %c0_i32_1 = arith.constant 0 : i32
    %5 = arith.cmpi sgt, %arg0, %c0_i32_1 : i32
    %6 = arith.extui %5 : i1 to i32
    %c0_i32_2 = arith.constant 0 : i32
    %7 = arith.cmpi ne, %6, %c0_i32_2 : i32
    scf.if %7 {
      %c1_i32 = arith.constant 1 : i32
      %8 = arith.subi %arg0, %c1_i32 : i32
      %c2_i32 = arith.constant 2 : i32
      %c0_i32_3 = arith.constant 0 : i32
      %9 = arith.cmpi eq, %c2_i32, %c0_i32_3 : i32
      %c1_i32_4 = arith.constant 1 : i32
      %10 = arith.select %9, %c1_i32_4, %c2_i32 : i32
      %11 = arith.remsi %8, %10 : i32
      %c0_i32_5 = arith.constant 0 : i32
      %12 = arith.cmpi ne, %11, %c0_i32_5 : i32
      %c0_i32_6 = arith.constant 0 : i32
      %13 = arith.cmpi slt, %11, %c0_i32_6 : i32
      %c0_i32_7 = arith.constant 0 : i32
      %14 = arith.cmpi slt, %10, %c0_i32_7 : i32
      %15 = arith.xori %13, %14 : i1
      %16 = arith.andi %15, %12 : i1
      %17 = arith.addi %11, %10 : i32
      %18 = arith.select %16, %17, %11 : i32
      %c2_i32_8 = arith.constant 2 : i32
      %c0_i32_9 = arith.constant 0 : i32
      %19 = arith.cmpi eq, %c2_i32_8, %c0_i32_9 : i32
      %c1_i32_10 = arith.constant 1 : i32
      %20 = arith.select %19, %c1_i32_10, %c2_i32_8 : i32
      %21 = arith.remsi %arg0, %20 : i32
      %c0_i32_11 = arith.constant 0 : i32
      %22 = arith.cmpi ne, %21, %c0_i32_11 : i32
      %c0_i32_12 = arith.constant 0 : i32
      %23 = arith.cmpi slt, %21, %c0_i32_12 : i32
      %c0_i32_13 = arith.constant 0 : i32
      %24 = arith.cmpi slt, %20, %c0_i32_13 : i32
      %25 = arith.xori %23, %24 : i1
      %26 = arith.andi %25, %22 : i1
      %27 = arith.addi %21, %20 : i32
      %28 = arith.select %26, %27, %21 : i32
      %c0_i32_14 = arith.constant 0 : i32
      %29 = tpu.assume_multiple %c0_i32_14, 512 : i32
      %30 = arith.index_cast %1 : i32 to index
      %31 = arith.index_cast %29 : i32 to index
      %32 = vector.load %arg4[%30, %31] : memref<512x512xbf16, #tpu.memory_space<vmem>>, vector<512x512xbf16>
      %33 = arith.index_cast %18 : i32 to index
      %34 = arith.index_cast %29 : i32 to index
      %c0 = arith.constant 0 : index
      %35 = vector.load %arg10[%33, %34, %c0] : memref<2x512x128xf32, #tpu.memory_space<vmem>>, vector<1x512x128xf32>
      %36 = vector.shape_cast %35 : vector<1x512x128xf32> to vector<512x128xf32>
      %37 = arith.extf %32 : vector<512x512xbf16> to vector<512x512xf32>
      %cst = arith.constant dense<0.000000e+00> : vector<512x128xf32>
      %38 = tpu.matmul %37, %36, %cst {dimension_numbers = #tpu.dot_dimension_numbers<[1], [0], [0], [1], [0, 0, 1, 1], [], []>} : vector<512x512xf32>, vector<512x128xf32>, vector<512x128xf32> -> vector<512x128xf32>
      %39 = arith.index_cast %1 : i32 to index
      %c0_15 = arith.constant 0 : index
      %40 = vector.load %arg11[%39, %c0_15] : memref<512x128xf32, #tpu.memory_space<vmem>>, vector<512x128xf32>
      %41 = arith.index_cast %arg0 : i32 to index
      %42 = memref.load %arg2[%41] : memref<11xf32, #tpu.memory_space<smem>>
      %43 = vector.broadcast %42 : f32 to vector<512x128xf32>
      %44 = arith.mulf %43, %38 : vector<512x128xf32>
      %45 = arith.addf %40, %44 : vector<512x128xf32>
      %c10_i32 = arith.constant 10 : i32
      %46 = arith.cmpi slt, %arg0, %c10_i32 : i32
      %47 = arith.extui %46 : i1 to i32
      %c0_i32_16 = arith.constant 0 : i32
      %48 = arith.cmpi ne, %47, %c0_i32_16 : i32
      scf.if %48 {
        %52 = arith.index_cast %1 : i32 to index
        %c0_19 = arith.constant 0 : index
        %53 = vector.load %arg11[%52, %c0_19] : memref<512x128xf32, #tpu.memory_space<vmem>>, vector<512x128xf32>
        tpu.vector_store %arg11[%52, %c0_19], %45 {strides = array<i32>} : memref<512x128xf32, #tpu.memory_space<vmem>>, vector<512x128xf32>,
        %54 = arith.index_cast %28 : i32 to index
        %55 = arith.index_cast %1 : i32 to index
        %c0_20 = arith.constant 0 : index
        %56 = vector.load %arg10[%54, %55, %c0_20] : memref<2x512x128xf32, #tpu.memory_space<vmem>>, vector<1x512x128xf32>
        %57 = vector.shape_cast %56 : vector<1x512x128xf32> to vector<512x128xf32>
        %58 = vector.shape_cast %38 : vector<512x128xf32> to vector<1x512x128xf32>
        tpu.vector_store %arg10[%54, %55, %c0_20], %58 {strides = array<i32>} : memref<2x512x128xf32, #tpu.memory_space<vmem>>, vector<1x512x128xf32>,
      } else {
      }
      %c10_i32_17 = arith.constant 10 : i32
      %49 = arith.cmpi eq, %arg0, %c10_i32_17 : i32
      %50 = arith.extui %49 : i1 to i32
      %c0_i32_18 = arith.constant 0 : i32
      %51 = arith.cmpi ne, %50, %c0_i32_18 : i32
      scf.if %51 {
        %52 = tpu.iota {dimensions = array<i32: 1>} : vector<512x128xi32>
        %c8_i32 = arith.constant 8 : i32
        %53 = vector.broadcast %c8_i32 : i32 to vector<512x128xi32>
        %54 = arith.cmpi slt, %52, %53 : vector<512x128xi32>
        %cst_19 = arith.constant -1.000000e+30 : f32
        %55 = vector.broadcast %cst_19 : f32 to vector<512x128xf32>
        %56 = arith.select %54, %45, %55 : vector<512x128xi1>, vector<512x128xf32>
        %cst_20 = arith.constant dense<0xFF800000> : vector<512xf32>
        %57 = vector.multi_reduction <maximumf>, %56, %cst_20 [1] : vector<512x128xf32> to vector<512xf32>
        %58 = vector.shape_cast %57 : vector<512xf32> to vector<512x1xf32>
        %59 = vector.broadcast %58 : vector<512x1xf32> to vector<512x128xf32>
        %60 = arith.subf %56, %59 : vector<512x128xf32>
        %61 = math.exp %60 : vector<512x128xf32>
        %cst_21 = arith.constant dense<0.000000e+00> : vector<512xf32>
        %62 = vector.multi_reduction <add>, %61, %cst_21 [1] : vector<512x128xf32> to vector<512xf32>
        %63 = vector.shape_cast %62 : vector<512xf32> to vector<512x1xf32>
        %64 = math.log %63 : vector<512x1xf32>
        %65 = vector.broadcast %64 : vector<512x1xf32> to vector<512x128xf32>
        %66 = arith.subf %60, %65 : vector<512x128xf32>
        %c0_22 = arith.constant 0 : index
        %c0_23 = arith.constant 0 : index
        %67 = vector.load %arg9[%c0_22, %c0_23] : memref<512x128xf32, #tpu.memory_space<vmem>>, vector<512x128xf32>
        tpu.vector_store %arg9[%c0_22, %c0_23], %66 {strides = array<i32>} : memref<512x128xf32, #tpu.memory_space<vmem>>, vector<512x128xf32>,
      } else {
      }
    } else {
    }
    return
  }
  func.func @transform_0(%arg0: i32, %arg1: i32, %arg2: memref<11xf32, #tpu.memory_space<smem>>) -> (i32, i32) {
    %c0_i32 = arith.constant 0 : i32
    %0 = arith.cmpi eq, %arg0, %c0_i32 : i32
    %c0_i32_0 = arith.constant 0 : i32
    %1 = arith.select %0, %arg1, %c0_i32_0 : i32
    %c0_i32_1 = arith.constant 0 : i32
    %c0_i32_2 = arith.constant 0 : i32
    return %1, %c0_i32_1 : i32, i32
  }
  func.func @transform_1(%arg0: i32, %arg1: i32, %arg2: memref<11xf32, #tpu.memory_space<smem>>) -> (i32, i32) {
    %c0_i32 = arith.constant 0 : i32
    %c0_i32_0 = arith.constant 0 : i32
    %c0_i32_1 = arith.constant 0 : i32
    return %c0_i32, %c0_i32_0 : i32, i32
  }
  func.func @transform_2(%arg0: i32, %arg1: i32, %arg2: memref<11xf32, #tpu.memory_space<smem>>) -> (i32, i32) {
    %c0_i32 = arith.constant 0 : i32
    %c0_i32_0 = arith.constant 0 : i32
    %c0_i32_1 = arith.constant 0 : i32
    return %c0_i32, %c0_i32_0 : i32, i32
  }
  func.func @transform_3(%arg0: i32, %arg1: i32, %arg2: memref<11xf32, #tpu.memory_space<smem>>) -> (i32, i32) {
    %c0_i32 = arith.constant 0 : i32
    %c0_i32_0 = arith.constant 0 : i32
    %c0_i32_1 = arith.constant 0 : i32
    return %c0_i32, %c0_i32_0 : i32, i32
  }
  func.func @transform_4(%arg0: i32, %arg1: i32, %arg2: memref<11xf32, #tpu.memory_space<smem>>) -> (i32, i32) {
    %c0_i32 = arith.constant 0 : i32
    %c0_i32_0 = arith.constant 0 : i32
    %c0_i32_1 = arith.constant 0 : i32
    return %c0_i32, %c0_i32_0 : i32, i32
  }
  func.func @transform_5(%arg0: i32, %arg1: i32, %arg2: memref<11xf32, #tpu.memory_space<smem>>) -> (i32, i32) {
    %c0_i32 = arith.constant 0 : i32
    %c0_i32_0 = arith.constant 0 : i32
    %c0_i32_1 = arith.constant 0 : i32
    return %c0_i32, %c0_i32_0 : i32, i32
  }
  func.func @transform_6(%arg0: i32, %arg1: i32, %arg2: memref<11xf32, #tpu.memory_space<smem>>) -> (i32, i32) {
    %c10_i32 = arith.constant 10 : i32
    %0 = arith.cmpi eq, %arg0, %c10_i32 : i32
    %c0_i32 = arith.constant 0 : i32
    %1 = arith.select %0, %arg1, %c0_i32 : i32
    %c0_i32_0 = arith.constant 0 : i32
    %c0_i32_1 = arith.constant 0 : i32
    return %1, %c0_i32_0 : i32, i32
  }
}

</mosaic_0001>

<bundles_post_ra>
// kernel: tpu_custom_call.1
= control target key start
LH: loop header
LB: loop body
LE: loop exit
PB: predicated region body
PF: predicated region fallthrough
CT: control target
= control target key end

     0   :  { %s7286_s0 = inlined_call_operand.vmem [shape: f32[11], index: 0, kind: input, shape index: {}]   ;;  %s7287_s1 = inlined_call_operand.vmem [shape: f32[512,16], index: 1, kind: input, shape index: {}]   ;;  %s7288_s2 = inlined_call_operand.hbm [shape: bf16[512,512], index: 2, kind: input, shape index: {}]   ;;  %s7289_s3 = inlined_call_operand.vmem [shape: f32[16,32], index: 3, kind: input, shape index: {}]   ;;  %s7290_s4 = inlined_call_operand.vmem [shape: f32[1,32], index: 4, kind: input, shape index: {}]   ;;  %s7291_s5 = inlined_call_operand.vmem [shape: f32[32,128], index: 5, kind: input, shape index: {}]   ;;  %s7292_s6 = inlined_call_operand.vmem [shape: f32[1,128], index: 6, kind: input, shape index: {}]   ;;  %s7293_s7 = inlined_call_operand.hbm [shape: f32[512,128], index: 7, kind: output, shape index: {}]  }
   0x1   :  { %s12_s26 = sshll.u32 %s7286_s0, 4  ;;  %s13_s26 = int_to_ptr.vmem [resolvable:$true] %s12_s26 }
   0x2   :  { %s5088_s27 = scalar_lea.vmem %s13_s26, 16  ;;  %p5093_p1 = scmp.lt.s32.totalorder %s13_s26, %s13_s26 }
   0x3   :  { %p5089_p0 = scmp.ne.s32.totalorder %s13_s26, %s5088_s27  ;;  %p5094_p2 = scmp.lt.s32.totalorder %s5088_s27, %s5088_s27 }
   0x5   :  { %p5095_p3 = por %p5094_p2, %p5093_p1 }
   0x7   :  { %p5096_p4 = pnand %p5095_p3, %p5089_p0 }
   0x9   :  { %5099 = shalt.err (!%p5096_p4)  }
   0xa   :  { %s5184_s28 = smov [#allocation5]  }
   0xb   :  { %15 = dma.vmem_to_smem %s13_s26, 16, %s5184_s28, [#allocation4] }
   0xc   :  { %5162 = dma.done.wait [#allocation4], 16 }
   0xd   :  { %5163 = vsyncadd [#allocation4], 4294967280 }
   0xe   :  { %17 = sfence }
   0xf   :  { %18 = vsyncpa [#allocation7], 0 }
  0x10   :  { %19 = vsyncpa [#allocation8], 0 }
  0x11   :  { %21 = vsyncpa [#allocation8 + $0x1], 0  ;;  %s5235_s29 = smov 0   ;;  %s5237_s30 = smov 0  }
  0x12   :  { %s5239_s0 = smov 0  }
  0x13 LB: > { %s4286_s8 = sadd.s32 4294967295, %s5182_s0   ;;  %s4287_s9 = sadd.s32 4294967294, %s5182_s0   ;;  %s5182_s0 = sphi %s5239_s0, %s27_s0   ;;  %s5178_s30 = sphi %s5237_s30, %s7610_s30   ;;  %s5174_s29 = sphi %s5235_s29, %s7609_s29  }
  0x14   : > { %s39_s10 = sadd.s32 1, %s5178_s30  ;;  %p4288_p5 = scmp.ge.s32.totalorder %s5182_s0, 1 }
  0x15   : > { %p41_p6 = scmp.ge.s32.totalorder %s39_s10, 11  ;;  %p209_p7 = scmp.lt.s32.totalorder %s5182_s0, 12 }
  0x16   : > { %p5257_p8 = scmp.eq.s32.totalorder %s4286_s8, 0  ;;  %s5185_s13 = smov [#allocation6]  }
  0x17   : > { %s7612_s10 = smov (%p41_p6, %s39_s10), 0  ;;  %p5263_p9 = pnand %p4288_p5, %p209_p7 }
  0x18   : > { %s221_s14 = sshll.u32 %s5185_s13, 4  ;;  %s222_s14 = int_to_ptr.vmem [resolvable:$true] %s221_s14 }
  0x19   : > { %p4787_p10 = pneg %p5263_p9  ;;  %s5111_s15 = scalar_lea.vmem %s222_s14, 16384 }
  0x1a   : > { %p5112_p13 = scmp.ne.s32.totalorder %s222_s14, %s5111_s15  ;;  %p5119_p2 = scmp.lt.s32.totalorder %s222_s14, %s222_s14 }
  0x1b   : > { %p4788_p11 = pnand %p5257_p8, %p4787_p10  ;;  %p5120_p3 = scmp.lt.s32.totalorder %s5111_s15, %s5111_s15 }
  0x1d   : > { %p5102_p12 = pneg %p4788_p11  ;;  %p5121_p4 = por %p5120_p3, %p5119_p2 }
  0x1f   : > { %p5114_p0 = pnand %p5112_p13, %p5102_p12 }
  0x21   : > { %p5115_p1 = pneg %p5114_p0 }
  0x23   : > { %p5122_p5 = pnand %p5121_p4, %p5115_p1 }
  0x25   : > { %5125 = shalt.err (!%p5122_p5)
}
  0x26   : > { %s5186_s16 = smov 256   ;;  %s5187_s17 = smov 16  }
  0x27   : > { %4790 = dma.hbm_to_vmem [thread:$0]  (!%p4788_p11), %s7288_s2, 16384, %s222_s14, [#allocation7], %s5186_s16, %s5186_s16, %s5187_s17  }
  0x28   : > { %262 = sbr.rel (%p5263_p9) target bundleno = 1650 (0x672), region = 44 }
  0x2d   : > { %5165 = dma.done.wait (%p5257_p8), [#allocation7], 16384  }
  0x2e   : > { %5167 = vsyncadd (%p5257_p8), [#allocation7], 4294950912  ;;  %p4294_p6 = scmp.ne.s32.totalorder %s5174_s29, 0 }
  0x2f   : > { %s1616_s18 = sld [smem:[#allocation5]] (!%p4294_p6) }
  0x30   : > { %311 = sbr.rel (%p4294_p6) target bundleno = 582 (0x246), region = 52 }
  0x35   : > { %v377_v0 = vld [vmem:[%s7289_s3 + $0x8] sm:$0xff]  ;;  %v376_v1 = vld [vmem:[%s7289_s3] sm:$0xff]  ;;  %vm385_vm0 = vcmask 130048   ;;  %v314_v4 = vld [vmem:[%s7287_s1 + $0x10] sm:$0xff]  ;;  %vm1038_vm1 = vcmask 261120  }
  0x36   : > { %v312_v2 = vld [vmem:[%s7287_s1] sm:$0xff]  ;;  %4575 = vmatprep.subr.mxu0 %v377_v0  ;;  %v313_v3 = vld [vmem:[%s7287_s1 + $0x8] sm:$0xff]  ;;  %v315_v5 = vld [vmem:[%s7287_s1 + $0x18] sm:$0xff] }
  0x37   : > { %4579 = vmatprep.mubr.msk.f32.mxu0 %vm385_vm0, %v312_v2  ;;  %4576 = vmatpush3.msra.mxu0 %v377_v0  ;;  %v316_v6 = vld [vmem:[%s7287_s1 + $0x20] sm:$0xff]  ;;  %v317_v7 = vld [vmem:[%s7287_s1 + $0x28] sm:$0xff]  ;;  %v318_v8 = vld [vmem:[%s7287_s1 + $0x30] sm:$0xff] }
  0x38   : > { %4577 = vmatprep.subr.mxu0 %v376_v1  ;;  %v319_v9 = vld [vmem:[%s7287_s1 + $0x38] sm:$0xff]  ;;  %v320_v10 = vld [vmem:[%s7287_s1 + $0x40] sm:$0xff]  ;;  %v321_v11 = vld [vmem:[%s7287_s1 + $0x48] sm:$0xff] }
  0x39   : > { %4578 = vmatpush3.msra.mxu0 %v376_v1  ;;  %v322_v12 = vld [vmem:[%s7287_s1 + $0x50] sm:$0xff]  ;;  %v323_v13 = vld [vmem:[%s7287_s1 + $0x58] sm:$0xff]  ;;  %v324_v14 = vld [vmem:[%s7287_s1 + $0x60] sm:$0xff] }
  0x3a   : > { %4580 = vmatmul.mubr.msk.f32.vlgmr.msra.gmra.mxu0 %vm385_vm0, %v313_v3  ;;  %v325_v15 = vld [vmem:[%s7287_s1 + $0x68] sm:$0xff]  ;;  %v326_v16 = vld [vmem:[%s7287_s1 + $0x70] sm:$0xff]  ;;  %v327_v17 = vld [vmem:[%s7287_s1 + $0x78] sm:$0xff] }
  0x3b   : > { %4582 = vmatprep.mubr.msk.f32.mxu0 %vm385_vm0, %v314_v4  ;;  %v328_v18 = vld [vmem:[%s7287_s1 + $0x80] sm:$0xff]  ;;  %v329_v19 = vld [vmem:[%s7287_s1 + $0x88] sm:$0xff]  ;;  %v330_v20 = vld [vmem:[%s7287_s1 + $0x90] sm:$0xff] }
  0x3c   : > { %v331_v21 = vld [vmem:[%s7287_s1 + $0x98] sm:$0xff]  ;;  %v332_v22 = vld [vmem:[%s7287_s1 + $0xa0] sm:$0xff]  ;;  %v333_v23 = vld [vmem:[%s7287_s1 + $0xa8] sm:$0xff] }
  0x3d   : > { %v334_v24 = vld [vmem:[%s7287_s1 + $0xb0] sm:$0xff]  ;;  %v335_v25 = vld [vmem:[%s7287_s1 + $0xb8] sm:$0xff]  ;;  %v336_v26 = vld [vmem:[%s7287_s1 + $0xc0] sm:$0xff] }
  0x3e   : > { %4583 = vmatmul.mubr.msk.f32.gmra.mxu0 %vm385_vm0, %v315_v5  ;;  %v337_v27 = vld [vmem:[%s7287_s1 + $0xc8] sm:$0xff]  ;;  %v338_v28 = vld [vmem:[%s7287_s1 + $0xd0] sm:$0xff]  ;;  %v339_v29 = vld [vmem:[%s7287_s1 + $0xd8] sm:$0xff] }
  0x3f   : > { %4585 = vmatprep.mubr.msk.f32.mxu0 %vm385_vm0, %v316_v6  ;;  %v340_v30 = vld [vmem:[%s7287_s1 + $0xe0] sm:$0xff]  ;;  %v341_v31 = vld [vmem:[%s7287_s1 + $0xe8] sm:$0xff]  ;;  %v342_v32 = vld [vmem:[%s7287_s1 + $0xf0] sm:$0xff] }
  0x40   : > { %v343_v33 = vld [vmem:[%s7287_s1 + $0xf8] sm:$0xff]  ;;  %v344_v34 = vld [vmem:[%s7287_s1 + $0x100] sm:$0xff]  ;;  %v345_v35 = vld [vmem:[%s7287_s1 + $0x108] sm:$0xff] }
  0x41   : > { %v346_v36 = vld [vmem:[%s7287_s1 + $0x110] sm:$0xff]  ;;  %v1030_v37 = vld [vmem:[%s7291_s5 + $0x18] sm:$0xff]  ;;  %v348_v40 = vld [vmem:[%s7287_s1 + $0x120] sm:$0xff] }
  0x42   : > { %4586 = vmatmul.mubr.msk.f32.gmra.mxu0 %vm385_vm0, %v317_v7  ;;  %4675 = vmatprep.subr.mxu1 %v1030_v37  ;;  %v347_v38 = vld [vmem:[%s7287_s1 + $0x118] sm:$0xff]  ;;  %v1029_v39 = vld [vmem:[%s7291_s5 + $0x10] sm:$0xff]  ;;  %v1028_v41 = vld [vmem:[%s7291_s5 + $0x8] sm:$0xff] }
  0x43   : > { %4588 = vmatprep.mubr.msk.f32.mxu0 %vm385_vm0, %v318_v8  ;;  %4676 = vmatpush3.msra.mxu1 %v1030_v37  ;;  %v349_v42 = vld [vmem:[%s7287_s1 + $0x128] sm:$0xff]  ;;  %v1027_v43 = vld [vmem:[%s7291_s5] sm:$0xff]  ;;  %v350_v44 = vld [vmem:[%s7287_s1 + $0x130] sm:$0xff] }
  0x44   : > { %4677 = vmatprep.subr.mxu1 %v1029_v39  ;;  %v351_v45 = vld [vmem:[%s7287_s1 + $0x138] sm:$0xff]  ;;  %v352_v46 = vld [vmem:[%s7287_s1 + $0x140] sm:$0xff]  ;;  %v353_v47 = vld [vmem:[%s7287_s1 + $0x148] sm:$0xff] }
  0x45   : > { %4678 = vmatpush3.msra.mxu1 %v1029_v39  ;;  %v354_v48 = vld [vmem:[%s7287_s1 + $0x150] sm:$0xff]  ;;  %v355_v49 = vld [vmem:[%s7287_s1 + $0x158] sm:$0xff]  ;;  %v356_v50 = vld [vmem:[%s7287_s1 + $0x160] sm:$0xff] }
  0x46   : > { %4589 = vmatmul.mubr.msk.f32.gmra.mxu0 %vm385_vm0, %v319_v9  ;;  %4679 = vmatprep.subr.mxu1 %v1028_v41  ;;  %v357_v51 = vld [vmem:[%s7287_s1 + $0x168] sm:$0xff]  ;;  %v358_v52 = vld [vmem:[%s7287_s1 + $0x170] sm:$0xff]  ;;  %v359_v53 = vld [vmem:[%s7287_s1 + $0x178] sm:$0xff] }
  0x47   : > { %4591 = vmatprep.mubr.msk.f32.mxu0 %vm385_vm0, %v320_v10  ;;  %4680 = vmatpush3.msra.mxu1 %v1028_v41  ;;  %v360_v54 = vld [vmem:[%s7287_s1 + $0x180] sm:$0xff]  ;;  %v361_v55 = vld [vmem:[%s7287_s1 + $0x188] sm:$0xff]  ;;  %v362_v56 = vld [vmem:[%s7287_s1 + $0x190] sm:$0xff] }
  0x48   : > { %4681 = vmatprep.subr.mxu1 %v1027_v43  ;;  %v363_v57 = vld [vmem:[%s7287_s1 + $0x198] sm:$0xff]  ;;  %v364_v58 = vld [vmem:[%s7287_s1 + $0x1a0] sm:$0xff]  ;;  %v365_v59 = vld [vmem:[%s7287_s1 + $0x1a8] sm:$0xff] }
  0x49   : > { %4682 = vmatpush3.msra.mxu1 %v1027_v43  ;;  %v366_v60 = vld [vmem:[%s7287_s1 + $0x1b0] sm:$0xff]  ;;  %v367_v61 = vld [vmem:[%s7287_s1 + $0x1b8] sm:$0xff]  ;;  %v368_v62 = vld [vmem:[%s7287_s1 + $0x1c0] sm:$0xff] }
  0x4a   : > { %4592 = vmatmul.mubr.msk.f32.gmra.mxu0 %vm385_vm0, %v321_v11  ;;  %v369_v63 = vld [vmem:[%s7287_s1 + $0x1c8] sm:$0xff]  ;;  %v370_v0 = vld [vmem:[%s7287_s1 + $0x1d0] sm:$0xff]  ;;  %v371_v1 = vld [vmem:[%s7287_s1 + $0x1d8] sm:$0xff] }
  0x4b   : > { %4594 = vmatprep.mubr.msk.f32.mxu0 %vm385_vm0, %v322_v12  ;;  %v372_v2 = vld [vmem:[%s7287_s1 + $0x1e0] sm:$0xff]  ;;  %v373_v3 = vld [vmem:[%s7287_s1 + $0x1e8] sm:$0xff]  ;;  %v374_v4 = vld [vmem:[%s7287_s1 + $0x1f0] sm:$0xff] }
  0x4c   : > { %v375_v5 = vld [vmem:[%s7287_s1 + $0x1f8] sm:$0xff]  ;;  %v5558_v6 = vld [vmem:[%s7290_s4] ss:$0 sm:$0xff] }
  0x4e   : > { %4595 = vmatmul.mubr.msk.f32.gmra.mxu0 %vm385_vm0, %v323_v13 }
  0x4f   : > { %4597 = vmatprep.mubr.msk.f32.mxu0 %vm385_vm0, %v324_v14 }
  0x52   : > { %4598 = vmatmul.mubr.msk.f32.gmra.mxu0 %vm385_vm0, %v325_v15 }
  0x53   : > { %4600 = vmatprep.mubr.msk.f32.mxu0 %vm385_vm0, %v326_v16 }
  0x56   : > { %4601 = vmatmul.mubr.msk.f32.gmra.mxu0 %vm385_vm0, %v327_v17 }
  0x57   : > { %4603 = vmatprep.mubr.msk.f32.mxu0 %vm385_vm0, %v328_v18 }
  0x5a   : > { %4604 = vmatmul.mubr.msk.f32.gmra.mxu0 %vm385_vm0, %v329_v19 }
  0x5b   : > { %4606 = vmatprep.mubr.msk.f32.mxu0 %vm385_vm0, %v330_v20 }
  0x5e   : > { %4607 = vmatmul.mubr.msk.f32.gmra.mxu0 %vm385_vm0, %v331_v21 }
  0x5f   : > { %4609 = vmatprep.mubr.msk.f32.mxu0 %vm385_vm0, %v332_v22 }
  0x62   : > { %4610 = vmatmul.mubr.msk.f32.gmra.mxu0 %vm385_vm0, %v333_v23 }
  0x63   : > { %4612 = vmatprep.mubr.msk.f32.mxu0 %vm385_vm0, %v334_v24 }
  0x66   : > { %4613 = vmatmul.mubr.msk.f32.gmra.mxu0 %vm385_vm0, %v335_v25 }
  0x67   : > { %4615 = vmatprep.mubr.msk.f32.mxu0 %vm385_vm0, %v336_v26 }
  0x6a   : > { %4616 = vmatmul.mubr.msk.f32.gmra.mxu0 %vm385_vm0, %v337_v27 }
  0x6b   : > { %4618 = vmatprep.mubr.msk.f32.mxu0 %vm385_vm0, %v338_v28 }
  0x6e   : > { %4619 = vmatmul.mubr.msk.f32.gmra.mxu0 %vm385_vm0, %v339_v29 }
  0x6f   : > { %4621 = vmatprep.mubr.msk.f32.mxu0 %vm385_vm0, %v340_v30 }
  0x72   : > { %4622 = vmatmul.mubr.msk.f32.gmra.mxu0 %vm385_vm0, %v341_v31 }
  0x73   : > { %4624 = vmatprep.mubr.msk.f32.mxu0 %vm385_vm0, %v342_v32 }
  0x76   : > { %4625 = vmatmul.mubr.msk.f32.gmra.mxu0 %vm385_vm0, %v343_v33 }
  0x77   : > { %4627 = vmatprep.mubr.msk.f32.mxu0 %vm385_vm0, %v344_v34 }
  0x7a   : > { %4628 = vmatmul.mubr.msk.f32.gmra.mxu0 %vm385_vm0, %v345_v35 }
  0x7b   : > { %4630 = vmatprep.mubr.msk.f32.mxu0 %vm385_vm0, %v346_v36 }
  0x7e   : > { %4631 = vmatmul.mubr.msk.f32.gmra.mxu0 %vm385_vm0, %v347_v38 }
  0x7f   : > { %4633 = vmatprep.mubr.msk.f32.mxu0 %vm385_vm0, %v348_v40 }
  0x82   : > { %4634 = vmatmul.mubr.msk.f32.gmra.mxu0 %vm385_vm0, %v349_v42 }
  0x83   : > { %4636 = vmatprep.mubr.msk.f32.mxu0 %vm385_vm0, %v350_v44 }
  0x86   : > { %4637 = vmatmul.mubr.msk.f32.gmra.mxu0 %vm385_vm0, %v351_v45 }
  0x87   : > { %4639 = vmatprep.mubr.msk.f32.mxu0 %vm385_vm0, %v352_v46 }
  0x8a   : > { %4640 = vmatmul.mubr.msk.f32.gmra.mxu0 %vm385_vm0, %v353_v47 }
  0x8b   : > { %4642 = vmatprep.mubr.msk.f32.mxu0 %vm385_vm0, %v354_v48 }
  0x8e   : > { %4643 = vmatmul.mubr.msk.f32.gmra.mxu0 %vm385_vm0, %v355_v49 }
  0x8f   : > { %4645 = vmatprep.mubr.msk.f32.mxu0 %vm385_vm0, %v356_v50 }
  0x92   : > { %4646 = vmatmul.mubr.msk.f32.gmra.mxu0 %vm385_vm0, %v357_v51 }
  0x93   : > { %4648 = vmatprep.mubr.msk.f32.mxu0 %vm385_vm0, %v358_v52 }
  0x96   : > { %4649 = vmatmul.mubr.msk.f32.gmra.mxu0 %vm385_vm0, %v359_v53 }
  0x97   : > { %4651 = vmatprep.mubr.msk.f32.mxu0 %vm385_vm0, %v360_v54 }
  0x9a   : > { %4652 = vmatmul.mubr.msk.f32.gmra.mxu0 %vm385_vm0, %v361_v55 }
  0x9b   : > { %4654 = vmatprep.mubr.msk.f32.mxu0 %vm385_vm0, %v362_v56 }
  0x9e   : > { %4655 = vmatmul.mubr.msk.f32.gmra.mxu0 %vm385_vm0, %v363_v57 }
  0x9f   : > { %4657 = vmatprep.mubr.msk.f32.mxu0 %vm385_vm0, %v364_v58 }
  0xa2   : > { %4658 = vmatmul.mubr.msk.f32.gmra.mxu0 %vm385_vm0, %v365_v59 }
  0xa3   : > { %4660 = vmatprep.mubr.msk.f32.mxu0 %vm385_vm0, %v366_v60 }
  0xa6   : > { %4661 = vmatmul.mubr.msk.f32.gmra.mxu0 %vm385_vm0, %v367_v61 }
  0xa7   : > { %4663 = vmatprep.mubr.msk.f32.mxu0 %vm385_vm0, %v368_v62 }
  0xaa   : > { %4664 = vmatmul.mubr.msk.f32.gmra.mxu0 %vm385_vm0, %v369_v63 }
  0xab   : > { %4666 = vmatprep.mubr.msk.f32.mxu0 %vm385_vm0, %v370_v0 }
  0xae   : > { %4667 = vmatmul.mubr.msk.f32.gmra.mxu0 %vm385_vm0, %v371_v1 }
  0xaf   : > { %4669 = vmatprep.mubr.msk.f32.mxu0 %vm385_vm0, %v372_v2 }
  0xb2   : > { %4670 = vmatmul.mubr.msk.f32.gmra.mxu0 %vm385_vm0, %v373_v3 }
  0xb3   : > { %4672 = vmatprep.mubr.msk.f32.mxu0 %vm385_vm0, %v374_v4 }
  0xb6   : > { %4673 = vmatmul.mubr.msk.f32.gmra.mxu0 %vm385_vm0, %v375_v5 }
  0xfa   : > { %v4581_v7 = vpop.f32.mrf.mxu0 }
  0xfb   : > { %v650_v8 = vadd.f32 %v4581_v7, %v5558_v6 }
  0xfc   : > { %v644_v9 = vpop.f32.mrf.mxu0 }
  0xfd   : > { %v645_v10 = vadd.f32 %v5558_v6, %v644_v9  ;;  %v964_v13 = vmax.f32 %v650_v8, 0.0 }
  0xfe   : > { %v4584_v11 = vpop.f32.mrf.mxu0 }
  0xff   : > { %v963_v12 = vmax.f32 %v645_v10, 0.0  ;;  %v660_v14 = vadd.f32 %v4584_v11, %v5558_v6 }
 0x100   : > { %v654_v15 = vpop.f32.mrf.mxu0 }
 0x101   : > { %v655_v16 = vadd.f32 %v5558_v6, %v654_v15  ;;  %4683 = vmatprep.mubr.msk.f32.mxu1 %vm1038_vm1, %v963_v12  ;;  %v966_v19 = vmax.f32 %v660_v14, 0.0 }
 0x102   : > { %v4587_v17 = vpop.f32.mrf.mxu0  ;;  %4684 = vmatmul.mubr.msk.f32.vlgmr.msra.gmra.mxu1 %vm1038_vm1, %v964_v13 }
 0x103   : > { %v965_v18 = vmax.f32 %v655_v16, 0.0  ;;  %v670_v20 = vadd.f32 %v4587_v17, %v5558_v6 }
 0x104   : > { %v664_v21 = vpop.f32.mrf.mxu0 }
 0x105   : > { %v665_v22 = vadd.f32 %v5558_v6, %v664_v21  ;;  %4686 = vmatprep.mubr.msk.f32.mxu1 %vm1038_vm1, %v965_v18  ;;  %v968_v25 = vmax.f32 %v670_v20, 0.0 }
 0x106   : > { %v4590_v23 = vpop.f32.mrf.mxu0  ;;  %4687 = vmatmul.mubr.msk.f32.gmra.mxu1 %vm1038_vm1, %v966_v19 }
 0x107   : > { %v967_v24 = vmax.f32 %v665_v22, 0.0  ;;  %v680_v26 = vadd.f32 %v4590_v23, %v5558_v6 }
 0x108   : > { %v674_v27 = vpop.f32.mrf.mxu0 }
 0x109   : > { %v675_v28 = vadd.f32 %v5558_v6, %v674_v27  ;;  %4689 = vmatprep.mubr.msk.f32.mxu1 %vm1038_vm1, %v967_v24  ;;  %v970_v31 = vmax.f32 %v680_v26, 0.0 }
 0x10a   : > { %v4593_v29 = vpop.f32.mrf.mxu0  ;;  %4690 = vmatmul.mubr.msk.f32.gmra.mxu1 %vm1038_vm1, %v968_v25 }
 0x10b   : > { %v969_v30 = vmax.f32 %v675_v28, 0.0  ;;  %v690_v32 = vadd.f32 %v4593_v29, %v5558_v6 }
 0x10c   : > { %v684_v33 = vpop.f32.mrf.mxu0 }
 0x10d   : > { %v685_v34 = vadd.f32 %v5558_v6, %v684_v33  ;;  %4692 = vmatprep.mubr.msk.f32.mxu1 %vm1038_vm1, %v969_v30  ;;  %v972_v37 = vmax.f32 %v690_v32, 0.0 }
 0x10e   : > { %v4596_v35 = vpop.f32.mrf.mxu0  ;;  %4693 = vmatmul.mubr.msk.f32.gmra.mxu1 %vm1038_vm1, %v970_v31 }
 0x10f   : > { %v971_v36 = vmax.f32 %v685_v34, 0.0  ;;  %v700_v38 = vadd.f32 %v4596_v35, %v5558_v6 }
 0x110   : > { %v694_v39 = vpop.f32.mrf.mxu0 }
 0x111   : > { %v695_v40 = vadd.f32 %v5558_v6, %v694_v39  ;;  %4695 = vmatprep.mubr.msk.f32.mxu1 %vm1038_vm1, %v971_v36  ;;  %v974_v43 = vmax.f32 %v700_v38, 0.0 }
 0x112   : > { %v4599_v41 = vpop.f32.mrf.mxu0  ;;  %4696 = vmatmul.mubr.msk.f32.gmra.mxu1 %vm1038_vm1, %v972_v37 }
 0x113   : > { %v973_v42 = vmax.f32 %v695_v40, 0.0  ;;  %v710_v44 = vadd.f32 %v4599_v41, %v5558_v6 }
 0x114   : > { %v704_v45 = vpop.f32.mrf.mxu0 }
 0x115   : > { %v705_v46 = vadd.f32 %v5558_v6, %v704_v45  ;;  %4698 = vmatprep.mubr.msk.f32.mxu1 %vm1038_vm1, %v973_v42  ;;  %v976_v49 = vmax.f32 %v710_v44, 0.0 }
 0x116   : > { %v4602_v47 = vpop.f32.mrf.mxu0  ;;  %4699 = vmatmul.mubr.msk.f32.gmra.mxu1 %vm1038_vm1, %v974_v43 }
 0x117   : > { %v975_v48 = vmax.f32 %v705_v46, 0.0  ;;  %v720_v50 = vadd.f32 %v4602_v47, %v5558_v6 }
 0x118   : > { %v714_v51 = vpop.f32.mrf.mxu0 }
 0x119   : > { %v715_v52 = vadd.f32 %v5558_v6, %v714_v51  ;;  %4701 = vmatprep.mubr.msk.f32.mxu1 %vm1038_vm1, %v975_v48  ;;  %v978_v55 = vmax.f32 %v720_v50, 0.0 }
 0x11a   : > { %v4605_v53 = vpop.f32.mrf.mxu0  ;;  %4702 = vmatmul.mubr.msk.f32.gmra.mxu1 %vm1038_vm1, %v976_v49 }
 0x11b   : > { %v977_v54 = vmax.f32 %v715_v52, 0.0  ;;  %v730_v56 = vadd.f32 %v4605_v53, %v5558_v6 }
 0x11c   : > { %v724_v57 = vpop.f32.mrf.mxu0 }
 0x11d   : > { %v725_v58 = vadd.f32 %v5558_v6, %v724_v57  ;;  %4704 = vmatprep.mubr.msk.f32.mxu1 %vm1038_vm1, %v977_v54  ;;  %v980_v61 = vmax.f32 %v730_v56, 0.0 }
 0x11e   : > { %v4608_v59 = vpop.f32.mrf.mxu0  ;;  %4705 = vmatmul.mubr.msk.f32.gmra.mxu1 %vm1038_vm1, %v978_v55 }
 0x11f   : > { %v979_v60 = vmax.f32 %v725_v58, 0.0  ;;  %v740_v62 = vadd.f32 %v4608_v59, %v5558_v6 }
 0x120   : > { %v734_v63 = vpop.f32.mrf.mxu0 }
 0x121   : > { %v735_v0 = vadd.f32 %v5558_v6, %v734_v63  ;;  %4707 = vmatprep.mubr.msk.f32.mxu1 %vm1038_vm1, %v979_v60  ;;  %v982_v3 = vmax.f32 %v740_v62, 0.0 }
 0x122   : > { %v4611_v1 = vpop.f32.mrf.mxu0  ;;  %4708 = vmatmul.mubr.msk.f32.gmra.mxu1 %vm1038_vm1, %v980_v61 }
 0x123   : > { %v981_v2 = vmax.f32 %v735_v0, 0.0  ;;  %v750_v4 = vadd.f32 %v4611_v1, %v5558_v6 }
 0x124   : > { %v744_v5 = vpop.f32.mrf.mxu0 }
 0x125   : > { %v745_v7 = vadd.f32 %v5558_v6, %v744_v5  ;;  %4710 = vmatprep.mubr.msk.f32.mxu1 %vm1038_vm1, %v981_v2  ;;  %v984_v10 = vmax.f32 %v750_v4, 0.0 }
 0x126   : > { %v4614_v8 = vpop.f32.mrf.mxu0  ;;  %4711 = vmatmul.mubr.msk.f32.gmra.mxu1 %vm1038_vm1, %v982_v3 }
 0x127   : > { %v983_v9 = vmax.f32 %v745_v7, 0.0  ;;  %v760_v11 = vadd.f32 %v4614_v8, %v5558_v6 }
 0x128   : > { %v754_v12 = vpop.f32.mrf.mxu0 }
 0x129   : > { %v755_v13 = vadd.f32 %v5558_v6, %v754_v12  ;;  %4713 = vmatprep.mubr.msk.f32.mxu1 %vm1038_vm1, %v983_v9  ;;  %v986_v16 = vmax.f32 %v760_v11, 0.0 }
 0x12a   : > { %v4617_v14 = vpop.f32.mrf.mxu0  ;;  %4714 = vmatmul.mubr.msk.f32.gmra.mxu1 %vm1038_vm1, %v984_v10 }
 0x12b   : > { %v985_v15 = vmax.f32 %v755_v13, 0.0  ;;  %v770_v17 = vadd.f32 %v4617_v14, %v5558_v6 }
 0x12c   : > { %v764_v18 = vpop.f32.mrf.mxu0 }
 0x12d   : > { %v765_v19 = vadd.f32 %v5558_v6, %v764_v18  ;;  %4716 = vmatprep.mubr.msk.f32.mxu1 %vm1038_vm1, %v985_v15  ;;  %v988_v22 = vmax.f32 %v770_v17, 0.0 }
 0x12e   : > { %v4620_v20 = vpop.f32.mrf.mxu0  ;;  %4717 = vmatmul.mubr.msk.f32.gmra.mxu1 %vm1038_vm1, %v986_v16 }
 0x12f   : > { %v987_v21 = vmax.f32 %v765_v19, 0.0  ;;  %v780_v23 = vadd.f32 %v4620_v20, %v5558_v6 }
 0x130   : > { %v774_v24 = vpop.f32.mrf.mxu0 }
 0x131   : > { %v775_v25 = vadd.f32 %v5558_v6, %v774_v24  ;;  %4719 = vmatprep.mubr.msk.f32.mxu1 %vm1038_vm1, %v987_v21  ;;  %v990_v28 = vmax.f32 %v780_v23, 0.0 }
 0x132   : > { %v4623_v26 = vpop.f32.mrf.mxu0  ;;  %4720 = vmatmul.mubr.msk.f32.gmra.mxu1 %vm1038_vm1, %v988_v22 }
 0x133   : > { %v989_v27 = vmax.f32 %v775_v25, 0.0  ;;  %v790_v29 = vadd.f32 %v4623_v26, %v5558_v6 }
 0x134   : > { %v784_v30 = vpop.f32.mrf.mxu0 }
 0x135   : > { %v785_v31 = vadd.f32 %v5558_v6, %v784_v30  ;;  %4722 = vmatprep.mubr.msk.f32.mxu1 %vm1038_vm1, %v989_v27  ;;  %v992_v34 = vmax.f32 %v790_v29, 0.0 }
 0x136   : > { %v4626_v32 = vpop.f32.mrf.mxu0  ;;  %4723 = vmatmul.mubr.msk.f32.gmra.mxu1 %vm1038_vm1, %v990_v28 }
 0x137   : > { %v991_v33 = vmax.f32 %v785_v31, 0.0  ;;  %v800_v35 = vadd.f32 %v4626_v32, %v5558_v6 }
 0x138   : > { %v794_v36 = vpop.f32.mrf.mxu0 }
 0x139   : > { %v795_v37 = vadd.f32 %v5558_v6, %v794_v36  ;;  %4725 = vmatprep.mubr.msk.f32.mxu1 %vm1038_vm1, %v991_v33  ;;  %v994_v40 = vmax.f32 %v800_v35, 0.0 }
 0x13a   : > { %v4629_v38 = vpop.f32.mrf.mxu0  ;;  %4726 = vmatmul.mubr.msk.f32.gmra.mxu1 %vm1038_vm1, %v992_v34 }
 0x13b   : > { %v993_v39 = vmax.f32 %v795_v37, 0.0  ;;  %v810_v41 = vadd.f32 %v4629_v38, %v5558_v6 }
 0x13c   : > { %v804_v42 = vpop.f32.mrf.mxu0 }
 0x13d   : > { %v805_v43 = vadd.f32 %v5558_v6, %v804_v42  ;;  %4728 = vmatprep.mubr.msk.f32.mxu1 %vm1038_vm1, %v993_v39  ;;  %v996_v46 = vmax.f32 %v810_v41, 0.0 }
 0x13e   : > { %v4632_v44 = vpop.f32.mrf.mxu0  ;;  %4729 = vmatmul.mubr.msk.f32.gmra.mxu1 %vm1038_vm1, %v994_v40 }
 0x13f   : > { %v995_v45 = vmax.f32 %v805_v43, 0.0  ;;  %v820_v47 = vadd.f32 %v4632_v44, %v5558_v6 }
 0x140   : > { %v814_v48 = vpop.f32.mrf.mxu0 }
 0x141   : > { %v815_v49 = vadd.f32 %v5558_v6, %v814_v48  ;;  %4731 = vmatprep.mubr.msk.f32.mxu1 %vm1038_vm1, %v995_v45  ;;  %v998_v52 = vmax.f32 %v820_v47, 0.0 }
 0x142   : > { %v4635_v50 = vpop.f32.mrf.mxu0  ;;  %4732 = vmatmul.mubr.msk.f32.gmra.mxu1 %vm1038_vm1, %v996_v46 }
 0x143   : > { %v997_v51 = vmax.f32 %v815_v49, 0.0  ;;  %v830_v53 = vadd.f32 %v4635_v50, %v5558_v6 }
 0x144   : > { %v824_v54 = vpop.f32.mrf.mxu0 }
 0x145   : > { %v825_v55 = vadd.f32 %v5558_v6, %v824_v54  ;;  %4734 = vmatprep.mubr.msk.f32.mxu1 %vm1038_vm1, %v997_v51  ;;  %v1000_v58 = vmax.f32 %v830_v53, 0.0 }
 0x146   : > { %v4638_v56 = vpop.f32.mrf.mxu0  ;;  %4735 = vmatmul.mubr.msk.f32.gmra.mxu1 %vm1038_vm1, %v998_v52 }
 0x147   : > { %v999_v57 = vmax.f32 %v825_v55, 0.0  ;;  %v840_v59 = vadd.f32 %v4638_v56, %v5558_v6 }
 0x148   : > { %v834_v60 = vpop.f32.mrf.mxu0 }
 0x149   : > { %v835_v61 = vadd.f32 %v5558_v6, %v834_v60  ;;  %4737 = vmatprep.mubr.msk.f32.mxu1 %vm1038_vm1, %v999_v57  ;;  %v1002_v0 = vmax.f32 %v840_v59, 0.0 }
 0x14a   : > { %v4641_v62 = vpop.f32.mrf.mxu0  ;;  %4738 = vmatmul.mubr.msk.f32.gmra.mxu1 %vm1038_vm1, %v1000_v58 }
 0x14b   : > { %v1001_v63 = vmax.f32 %v835_v61, 0.0  ;;  %v850_v1 = vadd.f32 %v4641_v62, %v5558_v6 }
 0x14c   : > { %v844_v2 = vpop.f32.mrf.mxu0 }
 0x14d   : > { %v845_v3 = vadd.f32 %v5558_v6, %v844_v2  ;;  %4740 = vmatprep.mubr.msk.f32.mxu1 %vm1038_vm1, %v1001_v63  ;;  %v1004_v7 = vmax.f32 %v850_v1, 0.0 }
 0x14e   : > { %v4644_v4 = vpop.f32.mrf.mxu0  ;;  %4741 = vmatmul.mubr.msk.f32.gmra.mxu1 %vm1038_vm1, %v1002_v0 }
 0x14f   : > { %v1003_v5 = vmax.f32 %v845_v3, 0.0  ;;  %v860_v8 = vadd.f32 %v4644_v4, %v5558_v6 }
 0x150   : > { %v854_v9 = vpop.f32.mrf.mxu0 }
 0x151   : > { %v855_v10 = vadd.f32 %v5558_v6, %v854_v9  ;;  %4743 = vmatprep.mubr.msk.f32.mxu1 %vm1038_vm1, %v1003_v5  ;;  %v1006_v13 = vmax.f32 %v860_v8, 0.0 }
 0x152   : > { %v4647_v11 = vpop.f32.mrf.mxu0  ;;  %4744 = vmatmul.mubr.msk.f32.gmra.mxu1 %vm1038_vm1, %v1004_v7 }
 0x153   : > { %v1005_v12 = vmax.f32 %v855_v10, 0.0  ;;  %v870_v14 = vadd.f32 %v4647_v11, %v5558_v6  ;;  %v5691_v10 = vld [vmem:[%s7292_s6] ss:$0 sm:$0xff] }
 0x154   : > { %v864_v15 = vpop.f32.mrf.mxu0 }
 0x155   : > { %v865_v16 = vadd.f32 %v5558_v6, %v864_v15  ;;  %4746 = vmatprep.mubr.msk.f32.mxu1 %vm1038_vm1, %v1005_v12  ;;  %v1008_v19 = vmax.f32 %v870_v14, 0.0  ;;  %v5693_v12 = vstv %s1616_s18 }
 0x156   : > { %v4650_v17 = vpop.f32.mrf.mxu0  ;;  %4747 = vmatmul.mubr.msk.f32.gmra.mxu1 %vm1038_vm1, %v1006_v13 }
 0x157   : > { %v1007_v18 = vmax.f32 %v865_v16, 0.0  ;;  %v880_v20 = vadd.f32 %v4650_v17, %v5558_v6 }
 0x158   : > { %v874_v21 = vpop.f32.mrf.mxu0 }
 0x159   : > { %v875_v22 = vadd.f32 %v5558_v6, %v874_v21  ;;  %4749 = vmatprep.mubr.msk.f32.mxu1 %vm1038_vm1, %v1007_v18  ;;  %v1010_v25 = vmax.f32 %v880_v20, 0.0 }
 0x15a   : > { %v4653_v23 = vpop.f32.mrf.mxu0  ;;  %4750 = vmatmul.mubr.msk.f32.gmra.mxu1 %vm1038_vm1, %v1008_v19 }
 0x15b   : > { %v1009_v24 = vmax.f32 %v875_v22, 0.0  ;;  %v890_v26 = vadd.f32 %v4653_v23, %v5558_v6 }
 0x15c   : > { %v884_v27 = vpop.f32.mrf.mxu0 }
 0x15d   : > { %v885_v28 = vadd.f32 %v5558_v6, %v884_v27  ;;  %4752 = vmatprep.mubr.msk.f32.mxu1 %vm1038_vm1, %v1009_v24  ;;  %v1012_v31 = vmax.f32 %v890_v26, 0.0 }
 0x15e   : > { %v4656_v29 = vpop.f32.mrf.mxu0  ;;  %4753 = vmatmul.mubr.msk.f32.gmra.mxu1 %vm1038_vm1, %v1010_v25 }
 0x15f   : > { %v1011_v30 = vmax.f32 %v885_v28, 0.0  ;;  %v900_v32 = vadd.f32 %v4656_v29, %v5558_v6 }
 0x160   : > { %v894_v33 = vpop.f32.mrf.mxu0 }
 0x161   : > { %v895_v34 = vadd.f32 %v5558_v6, %v894_v33  ;;  %4755 = vmatprep.mubr.msk.f32.mxu1 %vm1038_vm1, %v1011_v30  ;;  %v1014_v37 = vmax.f32 %v900_v32, 0.0 }
 0x162   : > { %v4659_v35 = vpop.f32.mrf.mxu0  ;;  %4756 = vmatmul.mubr.msk.f32.gmra.mxu1 %vm1038_vm1, %v1012_v31 }
 0x163   : > { %v1013_v36 = vmax.f32 %v895_v34, 0.0  ;;  %v910_v38 = vadd.f32 %v4659_v35, %v5558_v6 }
 0x164   : > { %v904_v39 = vpop.f32.mrf.mxu0 }
 0x165   : > { %v905_v40 = vadd.f32 %v5558_v6, %v904_v39  ;;  %4758 = vmatprep.mubr.msk.f32.mxu1 %vm1038_vm1, %v1013_v36  ;;  %v1016_v43 = vmax.f32 %v910_v38, 0.0 }
 0x166   : > { %v4662_v41 = vpop.f32.mrf.mxu0  ;;  %4759 = vmatmul.mubr.msk.f32.gmra.mxu1 %vm1038_vm1, %v1014_v37 }
 0x167   : > { %v1015_v42 = vmax.f32 %v905_v40, 0.0  ;;  %v920_v44 = vadd.f32 %v4662_v41, %v5558_v6 }
 0x168   : > { %v914_v45 = vpop.f32.mrf.mxu0 }
 0x169   : > { %v915_v46 = vadd.f32 %v5558_v6, %v914_v45  ;;  %4761 = vmatprep.mubr.msk.f32.mxu1 %vm1038_vm1, %v1015_v42  ;;  %v1018_v49 = vmax.f32 %v920_v44, 0.0 }
 0x16a   : > { %v4665_v47 = vpop.f32.mrf.mxu0  ;;  %4762 = vmatmul.mubr.msk.f32.gmra.mxu1 %vm1038_vm1, %v1016_v43 }
 0x16b   : > { %v1017_v48 = vmax.f32 %v915_v46, 0.0  ;;  %v930_v50 = vadd.f32 %v4665_v47, %v5558_v6 }
 0x16c   : > { %v924_v51 = vpop.f32.mrf.mxu0 }
 0x16d   : > { %v925_v52 = vadd.f32 %v5558_v6, %v924_v51  ;;  %4764 = vmatprep.mubr.msk.f32.mxu1 %vm1038_vm1, %v1017_v48  ;;  %v1020_v55 = vmax.f32 %v930_v50, 0.0 }
 0x16e   : > { %v4668_v53 = vpop.f32.mrf.mxu0  ;;  %4765 = vmatmul.mubr.msk.f32.gmra.mxu1 %vm1038_vm1, %v1018_v49 }
 0x16f   : > { %v1019_v54 = vmax.f32 %v925_v52, 0.0  ;;  %v940_v56 = vadd.f32 %v4668_v53, %v5558_v6 }
 0x170   : > { %v934_v57 = vpop.f32.mrf.mxu0 }
 0x171   : > { %v935_v58 = vadd.f32 %v5558_v6, %v934_v57  ;;  %4767 = vmatprep.mubr.msk.f32.mxu1 %vm1038_vm1, %v1019_v54  ;;  %v1022_v61 = vmax.f32 %v940_v56, 0.0 }
 0x172   : > { %v4671_v59 = vpop.f32.mrf.mxu0  ;;  %4768 = vmatmul.mubr.msk.f32.gmra.mxu1 %vm1038_vm1, %v1020_v55 }
 0x173   : > { %v1021_v60 = vmax.f32 %v935_v58, 0.0  ;;  %v950_v62 = vadd.f32 %v4671_v59, %v5558_v6 }
 0x174   : > { %v944_v63 = vpop.f32.mrf.mxu0 }
 0x175   : > { %v945_v0 = vadd.f32 %v5558_v6, %v944_v63  ;;  %4770 = vmatprep.mubr.msk.f32.mxu1 %vm1038_vm1, %v1021_v60  ;;  %v1024_v3 = vmax.f32 %v950_v62, 0.0 }
 0x176   : > { %v4674_v1 = vpop.f32.mrf.mxu0  ;;  %4771 = vmatmul.mubr.msk.f32.gmra.mxu1 %vm1038_vm1, %v1022_v61 }
 0x177   : > { %v1023_v2 = vmax.f32 %v945_v0, 0.0  ;;  %v960_v4 = vadd.f32 %v4674_v1, %v5558_v6 }
 0x178   : > { %v954_v5 = vpop.f32.mrf.mxu0 }
 0x179   : > { %v955_v7 = vadd.f32 %v5558_v6, %v954_v5  ;;  %4773 = vmatprep.mubr.msk.f32.mxu1 %vm1038_vm1, %v1023_v2  ;;  %v1026_v9 = vmax.f32 %v960_v4, 0.0 }
 0x17a   : > { %4774 = vmatmul.mubr.msk.f32.gmra.mxu1 %vm1038_vm1, %v1024_v3 }
 0x17b   : > { %v1025_v8 = vmax.f32 %v955_v7, 0.0 }
 0x17d   : > { %4776 = vmatprep.mubr.msk.f32.mxu1 %vm1038_vm1, %v1025_v8 }
 0x17e   : > { %4777 = vmatmul.mubr.msk.f32.gmra.mxu1 %vm1038_vm1, %v1026_v9 }
 0x1c2   : > { %v4685_v11 = vpop.f32.mrf.mxu1 }
 0x1c3   : > { %v1303_v6 = vadd.f32 %v4685_v11, %v5691_v10 }
 0x1c4   : > { %v1297_v13 = vpop.f32.mrf.mxu1 }
 0x1c5   : > { %v1619_v14 = vmul.f32 %v5693_v12, %v1303_v6  ;;  %1749 = vst [vmem:[#allocation2 + $0x8] sm:$0xff] %v1303_v6  ;;  %v1298_v15 = vadd.f32 %v5691_v10, %v1297_v13 }
 0x1c6   : > { %v4688_v16 = vpop.f32.mrf.mxu1 }
 0x1c7   : > { %1684 = vst [vmem:[#allocation3 + $0x1b0] sm:$0xff] %v1619_v14  ;;  %v1618_v17 = vmul.f32 %v5693_v12, %v1298_v15  ;;  %1748 = vst [vmem:[#allocation2] sm:$0xff] %v1298_v15  ;;  %v1313_v18 = vadd.f32 %v4688_v16, %v5691_v10 }
 0x1c8   : > { %v1307_v19 = vpop.f32.mrf.mxu1 }
 0x1c9   : > { %1683 = vst [vmem:[#allocation3 + $0xb0] sm:$0xff] %v1618_v17  ;;  %v1621_v20 = vmul.f32 %v5693_v12, %v1313_v18  ;;  %1751 = vst [vmem:[#allocation2 + $0x18] sm:$0xff] %v1313_v18  ;;  %v1308_v21 = vadd.f32 %v5691_v10, %v1307_v19 }
 0x1ca   : > { %v4691_v22 = vpop.f32.mrf.mxu1 }
 0x1cb   : > { %1686 = vst [vmem:[#allocation3 + $0x18] sm:$0xff] %v1621_v20  ;;  %v1620_v23 = vmul.f32 %v5693_v12, %v1308_v21  ;;  %1750 = vst [vmem:[#allocation2 + $0x10] sm:$0xff] %v1308_v21  ;;  %v1323_v24 = vadd.f32 %v4691_v22, %v5691_v10 }
 0x1cc   : > { %v1317_v25 = vpop.f32.mrf.mxu1 }
 0x1cd   : > { %1685 = vst [vmem:[#allocation3 + $0xd8] sm:$0xff] %v1620_v23  ;;  %v1623_v26 = vmul.f32 %v5693_v12, %v1323_v24  ;;  %1753 = vst [vmem:[#allocation2 + $0x28] sm:$0xff] %v1323_v24  ;;  %v1318_v27 = vadd.f32 %v5691_v10, %v1317_v25 }
 0x1ce   : > { %v4694_v28 = vpop.f32.mrf.mxu1 }
 0x1cf   : > { %1688 = vst [vmem:[#allocation3 + $0x168] sm:$0xff] %v1623_v26  ;;  %v1622_v29 = vmul.f32 %v5693_v12, %v1318_v27  ;;  %1752 = vst [vmem:[#allocation2 + $0x20] sm:$0xff] %v1318_v27  ;;  %v1333_v30 = vadd.f32 %v4694_v28, %v5691_v10 }
 0x1d0   : > { %v1327_v31 = vpop.f32.mrf.mxu1 }
 0x1d1   : > { %1687 = vst [vmem:[#allocation3 + $0x50] sm:$0xff] %v1622_v29  ;;  %v1625_v32 = vmul.f32 %v5693_v12, %v1333_v30  ;;  %1755 = vst [vmem:[#allocation2 + $0x38] sm:$0xff] %v1333_v30  ;;  %v1328_v33 = vadd.f32 %v5691_v10, %v1327_v31 }
 0x1d2   : > { %v4697_v34 = vpop.f32.mrf.mxu1 }
 0x1d3   : > { %1690 = vst [vmem:[#allocation3 + $0x48] sm:$0xff] %v1625_v32  ;;  %v1624_v35 = vmul.f32 %v5693_v12, %v1328_v33  ;;  %1754 = vst [vmem:[#allocation2 + $0x30] sm:$0xff] %v1328_v33  ;;  %v1343_v36 = vadd.f32 %v4697_v34, %v5691_v10 }
 0x1d4   : > { %v1337_v37 = vpop.f32.mrf.mxu1 }
 0x1d5   : > { %1689 = vst [vmem:[#allocation3 + $0x130] sm:$0xff] %v1624_v35  ;;  %v1627_v38 = vmul.f32 %v5693_v12, %v1343_v36  ;;  %1757 = vst [vmem:[#allocation2 + $0x48] sm:$0xff] %v1343_v36  ;;  %v1338_v39 = vadd.f32 %v5691_v10, %v1337_v37 }
 0x1d6   : > { %v4700_v40 = vpop.f32.mrf.mxu1 }
 0x1d7   : > { %1692 = vst [vmem:[#allocation3 + $0x110] sm:$0xff] %v1627_v38  ;;  %v1626_v41 = vmul.f32 %v5693_v12, %v1338_v39  ;;  %1756 = vst [vmem:[#allocation2 + $0x40] sm:$0xff] %v1338_v39  ;;  %v1353_v42 = vadd.f32 %v4700_v40, %v5691_v10 }
 0x1d8   : > { %v1347_v43 = vpop.f32.mrf.mxu1 }
 0x1d9   : > { %1691 = vst [vmem:[#allocation3 + $0x180] sm:$0xff] %v1626_v41  ;;  %v1629_v44 = vmul.f32 %v5693_v12, %v1353_v42  ;;  %1759 = vst [vmem:[#allocation2 + $0x58] sm:$0xff] %v1353_v42  ;;  %v1348_v45 = vadd.f32 %v5691_v10, %v1347_v43 }
 0x1da   : > { %v4703_v46 = vpop.f32.mrf.mxu1 }
 0x1db   : > { %1694 = vst [vmem:[#allocation3 + $0x98] sm:$0xff] %v1629_v44  ;;  %v1628_v47 = vmul.f32 %v5693_v12, %v1348_v45  ;;  %1758 = vst [vmem:[#allocation2 + $0x50] sm:$0xff] %v1348_v45  ;;  %v1363_v48 = vadd.f32 %v4703_v46, %v5691_v10 }
 0x1dc   : > { %v1357_v49 = vpop.f32.mrf.mxu1 }
 0x1dd   : > { %1693 = vst [vmem:[#allocation3 + $0x118] sm:$0xff] %v1628_v47  ;;  %v1631_v50 = vmul.f32 %v5693_v12, %v1363_v48  ;;  %1761 = vst [vmem:[#allocation2 + $0x68] sm:$0xff] %v1363_v48  ;;  %v1358_v51 = vadd.f32 %v5691_v10, %v1357_v49 }
 0x1de   : > { %v4706_v52 = vpop.f32.mrf.mxu1 }
 0x1df   : > { %1696 = vst [vmem:[#allocation3 + $0x150] sm:$0xff] %v1631_v50  ;;  %v1630_v53 = vmul.f32 %v5693_v12, %v1358_v51  ;;  %1760 = vst [vmem:[#allocation2 + $0x60] sm:$0xff] %v1358_v51  ;;  %v1373_v54 = vadd.f32 %v4706_v52, %v5691_v10 }
 0x1e0   : > { %v1367_v55 = vpop.f32.mrf.mxu1 }
 0x1e1   : > { %1695 = vst [vmem:[#allocation3 + $0x120] sm:$0xff] %v1630_v53  ;;  %v1633_v56 = vmul.f32 %v5693_v12, %v1373_v54  ;;  %1763 = vst [vmem:[#allocation2 + $0x78] sm:$0xff] %v1373_v54  ;;  %v1368_v57 = vadd.f32 %v5691_v10, %v1367_v55 }
 0x1e2   : > { %v4709_v58 = vpop.f32.mrf.mxu1 }
 0x1e3   : > { %1698 = vst [vmem:[#allocation3 + $0x60] sm:$0xff] %v1633_v56  ;;  %v1632_v59 = vmul.f32 %v5693_v12, %v1368_v57  ;;  %1762 = vst [vmem:[#allocation2 + $0x70] sm:$0xff] %v1368_v57  ;;  %v1383_v60 = vadd.f32 %v4709_v58, %v5691_v10 }
 0x1e4   : > { %v1377_v61 = vpop.f32.mrf.mxu1 }
 0x1e5   : > { %1697 = vst [vmem:[#allocation3 + $0x108] sm:$0xff] %v1632_v59  ;;  %v1635_v62 = vmul.f32 %v5693_v12, %v1383_v60  ;;  %1765 = vst [vmem:[#allocation2 + $0x88] sm:$0xff] %v1383_v60  ;;  %v1378_v63 = vadd.f32 %v5691_v10, %v1377_v61 }
 0x1e6   : > { %v4712_v0 = vpop.f32.mrf.mxu1 }
 0x1e7   : > { %1700 = vst [vmem:[#allocation3 + $0x188] sm:$0xff] %v1635_v62  ;;  %v1634_v1 = vmul.f32 %v5693_v12, %v1378_v63  ;;  %1764 = vst [vmem:[#allocation2 + $0x80] sm:$0xff] %v1378_v63  ;;  %v1393_v2 = vadd.f32 %v4712_v0, %v5691_v10 }
 0x1e8   : > { %v1387_v3 = vpop.f32.mrf.mxu1 }
 0x1e9   : > { %1699 = vst [vmem:[#allocation3 + $0xe0] sm:$0xff] %v1634_v1  ;;  %v1637_v4 = vmul.f32 %v5693_v12, %v1393_v2  ;;  %1767 = vst [vmem:[#allocation2 + $0x98] sm:$0xff] %v1393_v2  ;;  %v1388_v5 = vadd.f32 %v5691_v10, %v1387_v3 }
 0x1ea   : > { %v4715_v7 = vpop.f32.mrf.mxu1 }
 0x1eb   : > { %1702 = vst [vmem:[#allocation3 + $0x140] sm:$0xff] %v1637_v4  ;;  %v1636_v8 = vmul.f32 %v5693_v12, %v1388_v5  ;;  %1766 = vst [vmem:[#allocation2 + $0x90] sm:$0xff] %v1388_v5  ;;  %v1403_v9 = vadd.f32 %v4715_v7, %v5691_v10 }
 0x1ec   : > { %v1397_v11 = vpop.f32.mrf.mxu1 }
 0x1ed   : > { %1701 = vst [vmem:[#allocation3 + $0x138] sm:$0xff] %v1636_v8  ;;  %v1639_v6 = vmul.f32 %v5693_v12, %v1403_v9  ;;  %1769 = vst [vmem:[#allocation2 + $0xa8] sm:$0xff] %v1403_v9  ;;  %v1398_v13 = vadd.f32 %v5691_v10, %v1397_v11 }
 0x1ee   : > { %v4718_v14 = vpop.f32.mrf.mxu1 }
 0x1ef   : > { %1704 = vst [vmem:[#allocation3 + $0x1a8] sm:$0xff] %v1639_v6  ;;  %v1638_v15 = vmul.f32 %v5693_v12, %v1398_v13  ;;  %1768 = vst [vmem:[#allocation2 + $0xa0] sm:$0xff] %v1398_v13  ;;  %v1413_v16 = vadd.f32 %v4718_v14, %v5691_v10 }
 0x1f0   : > { %v1407_v17 = vpop.f32.mrf.mxu1 }
 0x1f1   : > { %1703 = vst [vmem:[#allocation3 + $0x80] sm:$0xff] %v1638_v15  ;;  %v1641_v18 = vmul.f32 %v5693_v12, %v1413_v16  ;;  %1771 = vst [vmem:[#allocation2 + $0xb8] sm:$0xff] %v1413_v16  ;;  %v1408_v19 = vadd.f32 %v5691_v10, %v1407_v17 }
 0x1f2   : > { %v4721_v20 = vpop.f32.mrf.mxu1 }
 0x1f3   : > { %1706 = vst [vmem:[#allocation3 + $0x28] sm:$0xff] %v1641_v18  ;;  %v1640_v21 = vmul.f32 %v5693_v12, %v1408_v19  ;;  %1770 = vst [vmem:[#allocation2 + $0xb0] sm:$0xff] %v1408_v19  ;;  %v1423_v22 = vadd.f32 %v4721_v20, %v5691_v10 }
 0x1f4   : > { %v1417_v23 = vpop.f32.mrf.mxu1 }
 0x1f5   : > { %1705 = vst [vmem:[#allocation3 + $0x1b8] sm:$0xff] %v1640_v21  ;;  %v1643_v24 = vmul.f32 %v5693_v12, %v1423_v22  ;;  %1773 = vst [vmem:[#allocation2 + $0xc8] sm:$0xff] %v1423_v22  ;;  %v1418_v25 = vadd.f32 %v5691_v10, %v1417_v23 }
 0x1f6   : > { %v4724_v26 = vpop.f32.mrf.mxu1 }
 0x1f7   : > { %1708 = vst [vmem:[#allocation3 + $0xf8] sm:$0xff] %v1643_v24  ;;  %v1642_v27 = vmul.f32 %v5693_v12, %v1418_v25  ;;  %1772 = vst [vmem:[#allocation2 + $0xc0] sm:$0xff] %v1418_v25  ;;  %v1433_v28 = vadd.f32 %v4724_v26, %v5691_v10 }
 0x1f8   : > { %v1427_v29 = vpop.f32.mrf.mxu1 }
 0x1f9   : > { %1707 = vst [vmem:[#allocation3 + $0x1e8] sm:$0xff] %v1642_v27  ;;  %v1645_v30 = vmul.f32 %v5693_v12, %v1433_v28  ;;  %1775 = vst [vmem:[#allocation2 + $0xd8] sm:$0xff] %v1433_v28  ;;  %v1428_v31 = vadd.f32 %v5691_v10, %v1427_v29 }
 0x1fa   : > { %v4727_v32 = vpop.f32.mrf.mxu1 }
 0x1fb   : > { %1710 = vst [vmem:[#allocation3 + $0x30] sm:$0xff] %v1645_v30  ;;  %v1644_v33 = vmul.f32 %v5693_v12, %v1428_v31  ;;  %1774 = vst [vmem:[#allocation2 + $0xd0] sm:$0xff] %v1428_v31  ;;  %v1443_v34 = vadd.f32 %v4727_v32, %v5691_v10 }
 0x1fc   : > { %v1437_v35 = vpop.f32.mrf.mxu1 }
 0x1fd   : > { %1709 = vst [vmem:[#allocation3 + $0x160] sm:$0xff] %v1644_v33  ;;  %v1647_v36 = vmul.f32 %v5693_v12, %v1443_v34  ;;  %1777 = vst [vmem:[#allocation2 + $0xe8] sm:$0xff] %v1443_v34  ;;  %v1438_v37 = vadd.f32 %v5691_v10, %v1437_v35 }
 0x1fe   : > { %v4730_v38 = vpop.f32.mrf.mxu1 }
 0x1ff   : > { %1712 = vst [vmem:[#allocation3] sm:$0xff] %v1647_v36  ;;  %v1646_v39 = vmul.f32 %v5693_v12, %v1438_v37  ;;  %1776 = vst [vmem:[#allocation2 + $0xe0] sm:$0xff] %v1438_v37  ;;  %v1453_v40 = vadd.f32 %v4730_v38, %v5691_v10 }
 0x200   : > { %v1447_v41 = vpop.f32.mrf.mxu1 }
 0x201   : > { %1711 = vst [vmem:[#allocation3 + $0x1e0] sm:$0xff] %v1646_v39  ;;  %v1649_v42 = vmul.f32 %v5693_v12, %v1453_v40  ;;  %1779 = vst [vmem:[#allocation2 + $0xf8] sm:$0xff] %v1453_v40  ;;  %v1448_v43 = vadd.f32 %v5691_v10, %v1447_v41 }
 0x202   : > { %v4733_v44 = vpop.f32.mrf.mxu1 }
 0x203   : > { %1714 = vst [vmem:[#allocation3 + $0x8] sm:$0xff] %v1649_v42  ;;  %v1648_v45 = vmul.f32 %v5693_v12, %v1448_v43  ;;  %1778 = vst [vmem:[#allocation2 + $0xf0] sm:$0xff] %v1448_v43  ;;  %v1463_v46 = vadd.f32 %v4733_v44, %v5691_v10 }
 0x204   : > { %v1457_v47 = vpop.f32.mrf.mxu1 }
 0x205   : > { %1713 = vst [vmem:[#allocation3 + $0xf0] sm:$0xff] %v1648_v45  ;;  %v1651_v48 = vmul.f32 %v5693_v12, %v1463_v46  ;;  %1781 = vst [vmem:[#allocation2 + $0x108] sm:$0xff] %v1463_v46  ;;  %v1458_v49 = vadd.f32 %v5691_v10, %v1457_v47 }
 0x206   : > { %v4736_v50 = vpop.f32.mrf.mxu1 }
 0x207   : > { %1716 = vst [vmem:[#allocation3 + $0x1d0] sm:$0xff] %v1651_v48  ;;  %v1650_v51 = vmul.f32 %v5693_v12, %v1458_v49  ;;  %1780 = vst [vmem:[#allocation2 + $0x100] sm:$0xff] %v1458_v49  ;;  %v1473_v52 = vadd.f32 %v4736_v50, %v5691_v10 }
 0x208   : > { %v1467_v53 = vpop.f32.mrf.mxu1 }
 0x209   : > { %1715 = vst [vmem:[#allocation3 + $0x148] sm:$0xff] %v1650_v51  ;;  %v1653_v54 = vmul.f32 %v5693_v12, %v1473_v52  ;;  %1783 = vst [vmem:[#allocation2 + $0x118] sm:$0xff] %v1473_v52  ;;  %v1468_v55 = vadd.f32 %v5691_v10, %v1467_v53 }
 0x20a   : > { %v4739_v56 = vpop.f32.mrf.mxu1 }
 0x20b   : > { %1718 = vst [vmem:[#allocation3 + $0xc8] sm:$0xff] %v1653_v54  ;;  %v1652_v57 = vmul.f32 %v5693_v12, %v1468_v55  ;;  %1782 = vst [vmem:[#allocation2 + $0x110] sm:$0xff] %v1468_v55  ;;  %v1483_v58 = vadd.f32 %v4739_v56, %v5691_v10 }
 0x20c   : > { %v1477_v59 = vpop.f32.mrf.mxu1 }
 0x20d   : > { %1717 = vst [vmem:[#allocation3 + $0x100] sm:$0xff] %v1652_v57  ;;  %v1655_v60 = vmul.f32 %v5693_v12, %v1483_v58  ;;  %1785 = vst [vmem:[#allocation2 + $0x128] sm:$0xff] %v1483_v58  ;;  %v1478_v61 = vadd.f32 %v5691_v10, %v1477_v59 }
 0x20e   : > { %v4742_v62 = vpop.f32.mrf.mxu1 }
 0x20f   : > { %1720 = vst [vmem:[#allocation3 + $0x1f8] sm:$0xff] %v1655_v60  ;;  %v1654_v63 = vmul.f32 %v5693_v12, %v1478_v61  ;;  %1784 = vst [vmem:[#allocation2 + $0x120] sm:$0xff] %v1478_v61  ;;  %v1493_v0 = vadd.f32 %v4742_v62, %v5691_v10 }
 0x210   : > { %v1487_v1 = vpop.f32.mrf.mxu1 }
 0x211   : > { %1719 = vst [vmem:[#allocation3 + $0x40] sm:$0xff] %v1654_v63  ;;  %v1657_v2 = vmul.f32 %v5693_v12, %v1493_v0  ;;  %1787 = vst [vmem:[#allocation2 + $0x138] sm:$0xff] %v1493_v0  ;;  %v1488_v3 = vadd.f32 %v5691_v10, %v1487_v1 }
 0x212   : > { %v4745_v4 = vpop.f32.mrf.mxu1 }
 0x213   : > { %1722 = vst [vmem:[#allocation3 + $0x128] sm:$0xff] %v1657_v2  ;;  %v1656_v5 = vmul.f32 %v5693_v12, %v1488_v3  ;;  %1786 = vst [vmem:[#allocation2 + $0x130] sm:$0xff] %v1488_v3  ;;  %v1503_v7 = vadd.f32 %v4745_v4, %v5691_v10 }
 0x214   : > { %v1497_v8 = vpop.f32.mrf.mxu1 }
 0x215   : > { %1721 = vst [vmem:[#allocation3 + $0x20] sm:$0xff] %v1656_v5  ;;  %v1659_v9 = vmul.f32 %v5693_v12, %v1503_v7  ;;  %1789 = vst [vmem:[#allocation2 + $0x148] sm:$0xff] %v1503_v7  ;;  %v1498_v11 = vadd.f32 %v5691_v10, %v1497_v8 }
 0x216   : > { %v4748_v6 = vpop.f32.mrf.mxu1 }
 0x217   : > { %1724 = vst [vmem:[#allocation3 + $0x1f0] sm:$0xff] %v1659_v9  ;;  %v1658_v13 = vmul.f32 %v5693_v12, %v1498_v11  ;;  %1788 = vst [vmem:[#allocation2 + $0x140] sm:$0xff] %v1498_v11  ;;  %v1513_v14 = vadd.f32 %v4748_v6, %v5691_v10 }
 0x218   : > { %v1507_v15 = vpop.f32.mrf.mxu1 }
 0x219   : > { %1723 = vst [vmem:[#allocation3 + $0x1a0] sm:$0xff] %v1658_v13  ;;  %v1661_v16 = vmul.f32 %v5693_v12, %v1513_v14  ;;  %1791 = vst [vmem:[#allocation2 + $0x158] sm:$0xff] %v1513_v14  ;;  %v1508_v17 = vadd.f32 %v5691_v10, %v1507_v15 }
 0x21a   : > { %v4751_v18 = vpop.f32.mrf.mxu1 }
 0x21b   : > { %1726 = vst [vmem:[#allocation3 + $0x78] sm:$0xff] %v1661_v16  ;;  %v1660_v19 = vmul.f32 %v5693_v12, %v1508_v17  ;;  %1790 = vst [vmem:[#allocation2 + $0x150] sm:$0xff] %v1508_v17  ;;  %v1523_v20 = vadd.f32 %v4751_v18, %v5691_v10 }
 0x21c   : > { %v1517_v21 = vpop.f32.mrf.mxu1 }
 0x21d   : > { %1725 = vst [vmem:[#allocation3 + $0xe8] sm:$0xff] %v1660_v19  ;;  %v1663_v22 = vmul.f32 %v5693_v12, %v1523_v20  ;;  %1793 = vst [vmem:[#allocation2 + $0x168] sm:$0xff] %v1523_v20  ;;  %v1518_v23 = vadd.f32 %v5691_v10, %v1517_v21 }
 0x21e   : > { %v4754_v24 = vpop.f32.mrf.mxu1 }
 0x21f   : > { %1728 = vst [vmem:[#allocation3 + $0x90] sm:$0xff] %v1663_v22  ;;  %v1662_v25 = vmul.f32 %v5693_v12, %v1518_v23  ;;  %1792 = vst [vmem:[#allocation2 + $0x160] sm:$0xff] %v1518_v23  ;;  %v1533_v26 = vadd.f32 %v4754_v24, %v5691_v10 }
 0x220   : > { %v1527_v27 = vpop.f32.mrf.mxu1 }
 0x221   : > { %1727 = vst [vmem:[#allocation3 + $0x70] sm:$0xff] %v1662_v25  ;;  %v1665_v28 = vmul.f32 %v5693_v12, %v1533_v26  ;;  %1795 = vst [vmem:[#allocation2 + $0x178] sm:$0xff] %v1533_v26  ;;  %v1528_v29 = vadd.f32 %v5691_v10, %v1527_v27 }
 0x222   : > { %v4757_v30 = vpop.f32.mrf.mxu1 }
 0x223   : > { %1730 = vst [vmem:[#allocation3 + $0xd0] sm:$0xff] %v1665_v28  ;;  %v1664_v31 = vmul.f32 %v5693_v12, %v1528_v29  ;;  %1794 = vst [vmem:[#allocation2 + $0x170] sm:$0xff] %v1528_v29  ;;  %v1543_v32 = vadd.f32 %v4757_v30, %v5691_v10 }
 0x224   : > { %v1537_v33 = vpop.f32.mrf.mxu1 }
 0x225   : > { %1729 = vst [vmem:[#allocation3 + $0x1d8] sm:$0xff] %v1664_v31  ;;  %v1667_v34 = vmul.f32 %v5693_v12, %v1543_v32  ;;  %1797 = vst [vmem:[#allocation2 + $0x188] sm:$0xff] %v1543_v32  ;;  %v1538_v35 = vadd.f32 %v5691_v10, %v1537_v33 }
 0x226   : > { %v4760_v36 = vpop.f32.mrf.mxu1 }
 0x227   : > { %1732 = vst [vmem:[#allocation3 + $0x88] sm:$0xff] %v1667_v34  ;;  %v1666_v37 = vmul.f32 %v5693_v12, %v1538_v35  ;;  %1796 = vst [vmem:[#allocation2 + $0x180] sm:$0xff] %v1538_v35  ;;  %v1553_v38 = vadd.f32 %v4760_v36, %v5691_v10 }
 0x228   : > { %v1547_v39 = vpop.f32.mrf.mxu1 }
 0x229   : > { %1731 = vst [vmem:[#allocation3 + $0xb8] sm:$0xff] %v1666_v37  ;;  %v1669_v40 = vmul.f32 %v5693_v12, %v1553_v38  ;;  %1799 = vst [vmem:[#allocation2 + $0x198] sm:$0xff] %v1553_v38  ;;  %v1548_v41 = vadd.f32 %v5691_v10, %v1547_v39 }
 0x22a   : > { %v4763_v42 = vpop.f32.mrf.mxu1 }
 0x22b   : > { %1734 = vst [vmem:[#allocation3 + $0x1c8] sm:$0xff] %v1669_v40  ;;  %v1668_v43 = vmul.f32 %v5693_v12, %v1548_v41  ;;  %1798 = vst [vmem:[#allocation2 + $0x190] sm:$0xff] %v1548_v41  ;;  %v1563_v44 = vadd.f32 %v4763_v42, %v5691_v10 }
 0x22c   : > { %v1557_v45 = vpop.f32.mrf.mxu1 }
 0x22d   : > { %1733 = vst [vmem:[#allocation3 + $0xa8] sm:$0xff] %v1668_v43  ;;  %v1671_v46 = vmul.f32 %v5693_v12, %v1563_v44  ;;  %1801 = vst [vmem:[#allocation2 + $0x1a8] sm:$0xff] %v1563_v44  ;;  %v1558_v47 = vadd.f32 %v5691_v10, %v1557_v45 }
 0x22e   : > { %v4766_v48 = vpop.f32.mrf.mxu1 }
 0x22f   : > { %1736 = vst [vmem:[#allocation3 + $0x178] sm:$0xff] %v1671_v46  ;;  %v1670_v49 = vmul.f32 %v5693_v12, %v1558_v47  ;;  %1800 = vst [vmem:[#allocation2 + $0x1a0] sm:$0xff] %v1558_v47  ;;  %v1573_v50 = vadd.f32 %v4766_v48, %v5691_v10 }
 0x230   : > { %v1567_v51 = vpop.f32.mrf.mxu1 }
 0x231   : > { %1735 = vst [vmem:[#allocation3 + $0x170] sm:$0xff] %v1670_v49  ;;  %v1673_v52 = vmul.f32 %v5693_v12, %v1573_v50  ;;  %1803 = vst [vmem:[#allocation2 + $0x1b8] sm:$0xff] %v1573_v50  ;;  %v1568_v53 = vadd.f32 %v5691_v10, %v1567_v51 }
 0x232   : > { %v4769_v54 = vpop.f32.mrf.mxu1 }
 0x233   : > { %1738 = vst [vmem:[#allocation3 + $0x190] sm:$0xff] %v1673_v52  ;;  %v1672_v55 = vmul.f32 %v5693_v12, %v1568_v53  ;;  %1802 = vst [vmem:[#allocation2 + $0x1b0] sm:$0xff] %v1568_v53  ;;  %v1583_v56 = vadd.f32 %v4769_v54, %v5691_v10 }
 0x234   : > { %v1577_v57 = vpop.f32.mrf.mxu1 }
 0x235   : > { %1737 = vst [vmem:[#allocation3 + $0x68] sm:$0xff] %v1672_v55  ;;  %v1675_v58 = vmul.f32 %v5693_v12, %v1583_v56  ;;  %1805 = vst [vmem:[#allocation2 + $0x1c8] sm:$0xff] %v1583_v56  ;;  %v1578_v59 = vadd.f32 %v5691_v10, %v1577_v57 }
 0x236   : > { %v4772_v60 = vpop.f32.mrf.mxu1 }
 0x237   : > { %1740 = vst [vmem:[#allocation3 + $0x38] sm:$0xff] %v1675_v58  ;;  %v1674_v61 = vmul.f32 %v5693_v12, %v1578_v59  ;;  %1804 = vst [vmem:[#allocation2 + $0x1c0] sm:$0xff] %v1578_v59  ;;  %v1593_v62 = vadd.f32 %v4772_v60, %v5691_v10 }
 0x238   : > { %v1587_v63 = vpop.f32.mrf.mxu1 }
 0x239   : > { %1739 = vst [vmem:[#allocation3 + $0x198] sm:$0xff] %v1674_v61  ;;  %v1677_v0 = vmul.f32 %v5693_v12, %v1593_v62  ;;  %1807 = vst [vmem:[#allocation2 + $0x1d8] sm:$0xff] %v1593_v62  ;;  %v1588_v1 = vadd.f32 %v5691_v10, %v1587_v63 }
 0x23a   : > { %v4775_v2 = vpop.f32.mrf.mxu1 }
 0x23b   : > { %1742 = vst [vmem:[#allocation3 + $0x1c0] sm:$0xff] %v1677_v0  ;;  %v1676_v3 = vmul.f32 %v5693_v12, %v1588_v1  ;;  %1806 = vst [vmem:[#allocation2 + $0x1d0] sm:$0xff] %v1588_v1  ;;  %v1603_v4 = vadd.f32 %v4775_v2, %v5691_v10 }
 0x23c   : > { %v1597_v5 = vpop.f32.mrf.mxu1 }
 0x23d   : > { %1741 = vst [vmem:[#allocation3 + $0xc0] sm:$0xff] %v1676_v3  ;;  %v1679_v7 = vmul.f32 %v5693_v12, %v1603_v4  ;;  %1809 = vst [vmem:[#allocation2 + $0x1e8] sm:$0xff] %v1603_v4  ;;  %v1598_v8 = vadd.f32 %v5691_v10, %v1597_v5 }
 0x23e   : > { %v4778_v9 = vpop.f32.mrf.mxu1 }
 0x23f   : > { %1744 = vst [vmem:[#allocation3 + $0x10] sm:$0xff] %v1679_v7  ;;  %v1678_v11 = vmul.f32 %v5693_v12, %v1598_v8  ;;  %1808 = vst [vmem:[#allocation2 + $0x1e0] sm:$0xff] %v1598_v8  ;;  %v1613_v6 = vadd.f32 %v4778_v9, %v5691_v10 }
 0x240   : > { %v1607_v13 = vpop.f32.mrf.mxu1 }
 0x241   : > { %1743 = vst [vmem:[#allocation3 + $0x158] sm:$0xff] %v1678_v11  ;;  %v1681_v14 = vmul.f32 %v5693_v12, %v1613_v6  ;;  %1811 = vst [vmem:[#allocation2 + $0x1f8] sm:$0xff] %v1613_v6  ;;  %v1608_v15 = vadd.f32 %v5691_v10, %v1607_v13 }
 0x243   : > { %1746 = vst [vmem:[#allocation3 + $0xa0] sm:$0xff] %v1681_v14  ;;  %v1680_v16 = vmul.f32 %v5693_v12, %v1608_v15  ;;  %1810 = vst [vmem:[#allocation2 + $0x1f0] sm:$0xff] %v1608_v15 }
 0x245   : > { %1745 = vst [vmem:[#allocation3 + $0x58] sm:$0xff] %v1680_v16 }
 0x246 PF: > { %p4425_p7 = scmp.le.s32.totalorder %s5174_s29, 0 }
 0x248   : > { %1815 = sbr.rel (%p4425_p7) target bundleno = 1636 (0x664), region = 56 }
 0x24d   : > { %p1829_p8 = scmp.lt.s32.totalorder %s5174_s29, 0  ;;  %s1830_s21 = ssub.s32 0, %s5174_s29  ;;  %v5826_v17 = vld [vmem:[#allocation6] sm:$0xff]  ;;  %v5828_v18 = vld [vmem:[#allocation6 + $0x8] sm:$0xff]  ;;  %v5188_v10 = vmov 0.0  }
 0x24e   : > { %s4430_s22 = smin.u32 %s5174_s29, %s1830_s21  ;;  %2298 = vmatprep.subr.mxu0 %v5188_v10  ;;  %2683 = vmatprep.subr.mxu1 %v5188_v10  ;;  %s4426_s23 = sadd.s32 4294967295, %s5174_s29  ;;  %v2043_v12 = vunpack.c.h.bf16 %v5826_v17  ;;  %v2045_v19 = vunpack.c.h.bf16 %v5828_v18 }
 0x24f   : > { %s1832_s24 = sand.u32 1, %s4430_s22   ;;  %s1818_s26 = ssub.s32 0, %s4426_s23 }
 0x250   : > { %s1833_s25 = ssub.s32 0, %s1832_s24  ;;  %2362 = vmatprep.mubr.f32.mxu0 %v2043_v12  ;;  %2747 = vmatprep.mubr.f32.mxu1 %v2045_v19  ;;  %p1817_p9 = scmp.lt.s32.totalorder %s4426_s23, 0  ;;  %v1849_v19 = vld [vmem:[#allocation6 + $0x10] sm:$0xff] }
 0x251   : > { %s7614_s25 = smov (!%p1829_p8, %s1833_s25), %s1832_s24  ;;  %s4427_s27 = smin.u32 %s4426_s23, %s1818_s26 }
 0x252   : > { %p4432_p10 = scmp.lt.s32.totalorder %s7614_s25, 0  ;;  %s1839_s28 = sadd.s32 2, %s7614_s25 }
 0x253   : > { %s1820_s11 = sand.u32 1, %s4427_s27   ;;  %s3133_s16 = sld [smem:[#allocation5 + %s5174_s29]] }
 0x254   : > { %s7616_s28 = smov (!%p4432_p10, %s1839_s28), %s7614_s25  ;;  %s1821_s12 = ssub.s32 0, %s1820_s11 }
 0x255   : > { %s7618_s12 = smov (!%p1817_p9, %s1821_s12), %s1820_s11  ;;  %p4434_p12 = scmp.ge.s32.totalorder %s5174_s29, 10 }
 0x256   : > { %p4429_p11 = scmp.lt.s32.totalorder %s7618_s12, 0  ;;  %s1827_s13 = sadd.s32 2, %s7618_s12 }
 0x257   : > { %s4435_s17 = sshll.u32 (!%p4434_p12), %s7616_s28, 9 }
 0x258   : > { %s7620_s13 = smov (!%p4429_p11, %s1827_s13), %s7618_s12  ;;  %s6423_s18 = scalar_lea.vmem (!%p4434_p12), [#allocation2], %s4435_s17 }
 0x259   : > { %s4433_s14 = sshll.u32 %s7620_s13, 9 }
 0x25a   : > { %s5840_s15 = scalar_lea.vmem [#allocation2], %s4433_s14 }
 0x25b   : > { %v1993_v20 = vld [vmem:[%s5840_s15 + $0x78] sm:$0xff]  ;;  %v1992_v22 = vld [vmem:[%s5840_s15 + $0x70] sm:$0xff]  ;;  %v1991_v24 = vld [vmem:[%s5840_s15 + $0x68] sm:$0xff] }
 0x25c   : > { %v2025_v21 = vld [vmem:[%s5840_s15 + $0x178] sm:$0xff]  ;;  %2299 = vmatpush1.msra.mxu0 %v1993_v20  ;;  %v2024_v23 = vld [vmem:[%s5840_s15 + $0x170] sm:$0xff]  ;;  %v2023_v25 = vld [vmem:[%s5840_s15 + $0x168] sm:$0xff] }
 0x25d   : > { %2684 = vmatpush1.msra.mxu1 %v2025_v21  ;;  %2300 = vmatprep.subr.mxu0 %v5188_v10  ;;  %v1990_v26 = vld [vmem:[%s5840_s15 + $0x60] sm:$0xff]  ;;  %v1989_v28 = vld [vmem:[%s5840_s15 + $0x58] sm:$0xff]  ;;  %v1988_v30 = vld [vmem:[%s5840_s15 + $0x50] sm:$0xff] }
 0x25e   : > { %2685 = vmatprep.subr.mxu1 %v5188_v10  ;;  %2301 = vmatpush1.msra.mxu0 %v1992_v22  ;;  %v2022_v27 = vld [vmem:[%s5840_s15 + $0x160] sm:$0xff]  ;;  %v2021_v29 = vld [vmem:[%s5840_s15 + $0x158] sm:$0xff]  ;;  %v2020_v31 = vld [vmem:[%s5840_s15 + $0x150] sm:$0xff] }
 0x25f   : > { %2686 = vmatpush1.msra.mxu1 %v2024_v23  ;;  %2302 = vmatprep.subr.mxu0 %v5188_v10  ;;  %v1987_v32 = vld [vmem:[%s5840_s15 + $0x48] sm:$0xff]  ;;  %v1986_v34 = vld [vmem:[%s5840_s15 + $0x40] sm:$0xff]  ;;  %v1985_v36 = vld [vmem:[%s5840_s15 + $0x38] sm:$0xff] }
 0x260   : > { %2687 = vmatprep.subr.mxu1 %v5188_v10  ;;  %2303 = vmatpush1.msra.mxu0 %v1991_v24  ;;  %v2019_v33 = vld [vmem:[%s5840_s15 + $0x148] sm:$0xff]  ;;  %v2018_v35 = vld [vmem:[%s5840_s15 + $0x140] sm:$0xff]  ;;  %v2017_v37 = vld [vmem:[%s5840_s15 + $0x138] sm:$0xff]  ;;  %v2042_v24 = vunpack.c.l.bf16 %v5826_v17 }
 0x261   : > { %2688 = vmatpush1.msra.mxu1 %v2023_v25  ;;  %2304 = vmatprep.subr.mxu0 %v5188_v10  ;;  %v1984_v38 = vld [vmem:[%s5840_s15 + $0x30] sm:$0xff]  ;;  %v1983_v40 = vld [vmem:[%s5840_s15 + $0x28] sm:$0xff]  ;;  %v1982_v42 = vld [vmem:[%s5840_s15 + $0x20] sm:$0xff] }
 0x262   : > { %2689 = vmatprep.subr.mxu1 %v5188_v10  ;;  %2305 = vmatpush1.msra.mxu0 %v1990_v26  ;;  %v2016_v39 = vld [vmem:[%s5840_s15 + $0x130] sm:$0xff]  ;;  %v2015_v41 = vld [vmem:[%s5840_s15 + $0x128] sm:$0xff]  ;;  %v2014_v43 = vld [vmem:[%s5840_s15 + $0x120] sm:$0xff]  ;;  %v2044_v26 = vunpack.c.l.bf16 %v5828_v18 }
 0x263   : > { %2690 = vmatpush1.msra.mxu1 %v2022_v27  ;;  %2306 = vmatprep.subr.mxu0 %v5188_v10  ;;  %v1981_v44 = vld [vmem:[%s5840_s15 + $0x18] sm:$0xff]  ;;  %v1980_v46 = vld [vmem:[%s5840_s15 + $0x10] sm:$0xff]  ;;  %v1979_v48 = vld [vmem:[%s5840_s15 + $0x8] sm:$0xff]  ;;  %v2047_v27 = vunpack.c.h.bf16 %v1849_v19 }
 0x264   : > { %2691 = vmatprep.subr.mxu1 %v5188_v10  ;;  %2307 = vmatpush1.msra.mxu0 %v1989_v28  ;;  %v2013_v45 = vld [vmem:[%s5840_s15 + $0x118] sm:$0xff]  ;;  %v2012_v47 = vld [vmem:[%s5840_s15 + $0x110] sm:$0xff]  ;;  %v2011_v49 = vld [vmem:[%s5840_s15 + $0x108] sm:$0xff] }
 0x265   : > { %2692 = vmatpush1.msra.mxu1 %v2021_v29  ;;  %2308 = vmatprep.subr.mxu0 %v5188_v10  ;;  %v1978_v50 = vld [vmem:[%s5840_s15] sm:$0xff]  ;;  %v2009_v52 = vld [vmem:[%s5840_s15 + $0xf8] sm:$0xff]  ;;  %v2008_v54 = vld [vmem:[%s5840_s15 + $0xf0] sm:$0xff] }
 0x266   : > { %2693 = vmatprep.subr.mxu1 %v5188_v10  ;;  %2309 = vmatpush1.msra.mxu0 %v1988_v30  ;;  %v2010_v51 = vld [vmem:[%s5840_s15 + $0x100] sm:$0xff]  ;;  %v2041_v53 = vld [vmem:[%s5840_s15 + $0x1f8] sm:$0xff]  ;;  %v2040_v55 = vld [vmem:[%s5840_s15 + $0x1f0] sm:$0xff] }
 0x267   : > { %2694 = vmatpush1.msra.mxu1 %v2020_v31  ;;  %2310 = vmatprep.subr.mxu0 %v5188_v10  ;;  %v2007_v56 = vld [vmem:[%s5840_s15 + $0xe8] sm:$0xff]  ;;  %v2006_v58 = vld [vmem:[%s5840_s15 + $0xe0] sm:$0xff]  ;;  %v2005_v60 = vld [vmem:[%s5840_s15 + $0xd8] sm:$0xff]  ;;  %v2046_v31 = vunpack.c.l.bf16 %v1849_v19 }
 0x268   : > { %2695 = vmatprep.subr.mxu1 %v5188_v10  ;;  %2311 = vmatpush1.msra.mxu0 %v1987_v32  ;;  %v2039_v57 = vld [vmem:[%s5840_s15 + $0x1e8] sm:$0xff]  ;;  %v2038_v59 = vld [vmem:[%s5840_s15 + $0x1e0] sm:$0xff]  ;;  %v2037_v61 = vld [vmem:[%s5840_s15 + $0x1d8] sm:$0xff] }
 0x269   : > { %2696 = vmatpush1.msra.mxu1 %v2019_v33  ;;  %2312 = vmatprep.subr.mxu0 %v5188_v10  ;;  %v2004_v62 = vld [vmem:[%s5840_s15 + $0xd0] sm:$0xff]  ;;  %v2003_v0 = vld [vmem:[%s5840_s15 + $0xc8] sm:$0xff]  ;;  %v2002_v2 = vld [vmem:[%s5840_s15 + $0xc0] sm:$0xff] }
 0x26a   : > { %2697 = vmatprep.subr.mxu1 %v5188_v10  ;;  %2313 = vmatpush1.msra.mxu0 %v1986_v34  ;;  %v2036_v63 = vld [vmem:[%s5840_s15 + $0x1d0] sm:$0xff]  ;;  %v2035_v1 = vld [vmem:[%s5840_s15 + $0x1c8] sm:$0xff]  ;;  %v2034_v3 = vld [vmem:[%s5840_s15 + $0x1c0] sm:$0xff] }
 0x26b   : > { %2698 = vmatpush1.msra.mxu1 %v2018_v35  ;;  %2314 = vmatprep.subr.mxu0 %v5188_v10  ;;  %v2001_v4 = vld [vmem:[%s5840_s15 + $0xb8] sm:$0xff]  ;;  %v2000_v7 = vld [vmem:[%s5840_s15 + $0xb0] sm:$0xff]  ;;  %v1999_v9 = vld [vmem:[%s5840_s15 + $0xa8] sm:$0xff] }
 0x26c   : > { %2699 = vmatprep.subr.mxu1 %v5188_v10  ;;  %2315 = vmatpush1.msra.mxu0 %v1985_v36  ;;  %v2033_v5 = vld [vmem:[%s5840_s15 + $0x1b8] sm:$0xff]  ;;  %v2032_v8 = vld [vmem:[%s5840_s15 + $0x1b0] sm:$0xff]  ;;  %v2031_v11 = vld [vmem:[%s5840_s15 + $0x1a8] sm:$0xff] }
 0x26d   : > { %2700 = vmatpush1.msra.mxu1 %v2017_v37  ;;  %2316 = vmatprep.subr.mxu0 %v5188_v10  ;;  %v1998_v6 = vld [vmem:[%s5840_s15 + $0xa0] sm:$0xff]  ;;  %v1997_v14 = vld [vmem:[%s5840_s15 + $0x98] sm:$0xff]  ;;  %v1996_v16 = vld [vmem:[%s5840_s15 + $0x90] sm:$0xff] }
 0x26e   : > { %2701 = vmatprep.subr.mxu1 %v5188_v10  ;;  %2317 = vmatpush1.msra.mxu0 %v1984_v38  ;;  %v2030_v13 = vld [vmem:[%s5840_s15 + $0x1a0] sm:$0xff]  ;;  %v2029_v15 = vld [vmem:[%s5840_s15 + $0x198] sm:$0xff]  ;;  %v2028_v12 = vld [vmem:[%s5840_s15 + $0x190] sm:$0xff] }
 0x26f   : > { %2702 = vmatpush1.msra.mxu1 %v2016_v39  ;;  %2318 = vmatprep.subr.mxu0 %v5188_v10  ;;  %v1995_v20 = vld [vmem:[%s5840_s15 + $0x88] sm:$0xff]  ;;  %v1850_v22 = vld [vmem:[#allocation6 + $0x18] sm:$0xff]  ;;  %v1994_v23 = vld [vmem:[%s5840_s15 + $0x80] sm:$0xff] }
 0x270   : > { %2703 = vmatprep.subr.mxu1 %v5188_v10  ;;  %2319 = vmatpush1.msra.mxu0 %v1983_v40  ;;  %v2027_v21 = vld [vmem:[%s5840_s15 + $0x188] sm:$0xff]  ;;  %v2026_v25 = vld [vmem:[%s5840_s15 + $0x180] sm:$0xff]  ;;  %v2049_v28 = vunpack.c.h.bf16 %v1850_v22  ;;  %v2048_v32 = vunpack.c.l.bf16 %v1850_v22  ;;  %v1853_v33 = vld [vmem:[#allocation6 + $0x30] sm:$0xff] }
 0x271   : > { %2704 = vmatpush1.msra.mxu1 %v2015_v41  ;;  %2320 = vmatprep.subr.mxu0 %v5188_v10  ;;  %v1851_v29 = vld [vmem:[#allocation6 + $0x20] sm:$0xff]  ;;  %v1852_v30 = vld [vmem:[#allocation6 + $0x28] sm:$0xff]  ;;  %v1854_v34 = vld [vmem:[#allocation6 + $0x38] sm:$0xff]  ;;  %v2054_v40 = vunpack.c.l.bf16 %v1853_v33 }
 0x272   : > { %2705 = vmatprep.subr.mxu1 %v5188_v10  ;;  %2321 = vmatpush1.msra.mxu0 %v1982_v42  ;;  %v2051_v17 = vunpack.c.h.bf16 %v1851_v29  ;;  %v2053_v18 = vunpack.c.h.bf16 %v1852_v30  ;;  %v2050_v35 = vunpack.c.l.bf16 %v1851_v29  ;;  %v2052_v36 = vunpack.c.l.bf16 %v1852_v30  ;;  %v1855_v38 = vld [vmem:[#allocation6 + $0x40] sm:$0xff]  ;;  %v1856_v39 = vld [vmem:[#allocation6 + $0x48] sm:$0xff]  ;;  %v1869_v19 = vld [vmem:[#allocation6 + $0xb0] sm:$0xff] }
 0x273   : > { %2706 = vmatpush1.msra.mxu1 %v2014_v43  ;;  %2322 = vmatprep.subr.mxu0 %v5188_v10  ;;  %v2057_v37 = vunpack.c.h.bf16 %v1854_v34  ;;  %v2056_v41 = vunpack.c.l.bf16 %v1854_v34  ;;  %v2059_v42 = vunpack.c.h.bf16 %v1855_v38  ;;  %v2061_v43 = vunpack.c.h.bf16 %v1856_v39 }
 0x274   : > { %2707 = vmatprep.subr.mxu1 %v5188_v10  ;;  %2323 = vmatpush1.msra.mxu0 %v1981_v44  ;;  %v1857_v44 = vld [vmem:[#allocation6 + $0x50] sm:$0xff] }
 0x275   : > { %2708 = vmatpush1.msra.mxu1 %v2013_v45  ;;  %2324 = vmatprep.subr.mxu0 %v5188_v10  ;;  %v1858_v45 = vld [vmem:[#allocation6 + $0x58] sm:$0xff] }
 0x276   : > { %2709 = vmatprep.subr.mxu1 %v5188_v10  ;;  %2325 = vmatpush1.msra.mxu0 %v1980_v46  ;;  %v2058_v46 = vunpack.c.l.bf16 %v1855_v38 }
 0x277   : > { %2710 = vmatpush1.msra.mxu1 %v2012_v47  ;;  %2326 = vmatprep.subr.mxu0 %v5188_v10  ;;  %v2060_v47 = vunpack.c.l.bf16 %v1856_v39 }
 0x278   : > { %2711 = vmatprep.subr.mxu1 %v5188_v10  ;;  %2327 = vmatpush1.msra.mxu0 %v1979_v48  ;;  %v2063_v48 = vunpack.c.h.bf16 %v1857_v44 }
 0x279   : > { %2712 = vmatpush1.msra.mxu1 %v2011_v49  ;;  %2328 = vmatprep.subr.mxu0 %v5188_v10  ;;  %v2065_v49 = vunpack.c.h.bf16 %v1858_v45 }
 0x27a   : > { %2713 = vmatprep.subr.mxu1 %v5188_v10  ;;  %2329 = vmatpush1.msra.mxu0 %v1978_v50  ;;  %v1859_v50 = vld [vmem:[#allocation6 + $0x60] sm:$0xff] }
 0x27b   : > { %2714 = vmatpush1.msra.mxu1 %v2010_v51  ;;  %2330 = vmatprep.subr.mxu0 %v5188_v10  ;;  %v1860_v51 = vld [vmem:[#allocation6 + $0x68] sm:$0xff] }
 0x27c   : > { %2715 = vmatprep.subr.mxu1 %v5188_v10  ;;  %2331 = vmatpush2.msra.mxu0 %v2009_v52  ;;  %v2062_v52 = vunpack.c.l.bf16 %v1857_v44 }
 0x27d   : > { %2716 = vmatpush2.msra.mxu1 %v2041_v53  ;;  %2332 = vmatprep.subr.mxu0 %v5188_v10  ;;  %v2064_v53 = vunpack.c.l.bf16 %v1858_v45 }
 0x27e   : > { %2717 = vmatprep.subr.mxu1 %v5188_v10  ;;  %2333 = vmatpush2.msra.mxu0 %v2008_v54  ;;  %v2067_v54 = vunpack.c.h.bf16 %v1859_v50 }
 0x27f   : > { %2718 = vmatpush2.msra.mxu1 %v2040_v55  ;;  %2334 = vmatprep.subr.mxu0 %v5188_v10  ;;  %v2069_v55 = vunpack.c.h.bf16 %v1860_v51 }
 0x280   : > { %2719 = vmatprep.subr.mxu1 %v5188_v10  ;;  %2335 = vmatpush2.msra.mxu0 %v2007_v56  ;;  %v1861_v56 = vld [vmem:[#allocation6 + $0x70] sm:$0xff] }
 0x281   : > { %2720 = vmatpush2.msra.mxu1 %v2039_v57  ;;  %2336 = vmatprep.subr.mxu0 %v5188_v10  ;;  %v1862_v57 = vld [vmem:[#allocation6 + $0x78] sm:$0xff] }
 0x282   : > { %2721 = vmatprep.subr.mxu1 %v5188_v10  ;;  %2337 = vmatpush2.msra.mxu0 %v2006_v58  ;;  %v2066_v58 = vunpack.c.l.bf16 %v1859_v50 }
 0x283   : > { %2722 = vmatpush2.msra.mxu1 %v2038_v59  ;;  %2338 = vmatprep.subr.mxu0 %v5188_v10  ;;  %v2068_v59 = vunpack.c.l.bf16 %v1860_v51 }
 0x284   : > { %2723 = vmatprep.subr.mxu1 %v5188_v10  ;;  %2339 = vmatpush2.msra.mxu0 %v2005_v60  ;;  %v2071_v60 = vunpack.c.h.bf16 %v1861_v56 }
 0x285   : > { %2724 = vmatpush2.msra.mxu1 %v2037_v61  ;;  %2340 = vmatprep.subr.mxu0 %v5188_v10  ;;  %v2073_v61 = vunpack.c.h.bf16 %v1862_v57 }
 0x286   : > { %2725 = vmatprep.subr.mxu1 %v5188_v10  ;;  %2341 = vmatpush2.msra.mxu0 %v2004_v62  ;;  %v1863_v62 = vld [vmem:[#allocation6 + $0x80] sm:$0xff] }
 0x287   : > { %2726 = vmatpush2.msra.mxu1 %v2036_v63  ;;  %2342 = vmatprep.subr.mxu0 %v5188_v10  ;;  %v1864_v63 = vld [vmem:[#allocation6 + $0x88] sm:$0xff] }
 0x288   : > { %2727 = vmatprep.subr.mxu1 %v5188_v10  ;;  %2343 = vmatpush2.msra.mxu0 %v2003_v0  ;;  %v2070_v0 = vunpack.c.l.bf16 %v1861_v56 }
 0x289   : > { %2728 = vmatpush2.msra.mxu1 %v2035_v1  ;;  %2344 = vmatprep.subr.mxu0 %v5188_v10  ;;  %v2072_v1 = vunpack.c.l.bf16 %v1862_v57 }
 0x28a   : > { %2729 = vmatprep.subr.mxu1 %v5188_v10  ;;  %2345 = vmatpush2.msra.mxu0 %v2002_v2  ;;  %v2075_v2 = vunpack.c.h.bf16 %v1863_v62 }
 0x28b   : > { %2730 = vmatpush2.msra.mxu1 %v2034_v3  ;;  %2346 = vmatprep.subr.mxu0 %v5188_v10  ;;  %v2077_v3 = vunpack.c.h.bf16 %v1864_v63 }
 0x28c   : > { %2731 = vmatprep.subr.mxu1 %v5188_v10  ;;  %2347 = vmatpush2.msra.mxu0 %v2001_v4  ;;  %v1865_v4 = vld [vmem:[#allocation6 + $0x90] sm:$0xff] }
 0x28d   : > { %2732 = vmatpush2.msra.mxu1 %v2033_v5  ;;  %2348 = vmatprep.subr.mxu0 %v5188_v10  ;;  %v1866_v5 = vld [vmem:[#allocation6 + $0x98] sm:$0xff] }
 0x28e   : > { %2733 = vmatprep.subr.mxu1 %v5188_v10  ;;  %2349 = vmatpush2.msra.mxu0 %v2000_v7  ;;  %v2074_v7 = vunpack.c.l.bf16 %v1863_v62 }
 0x28f   : > { %2734 = vmatpush2.msra.mxu1 %v2032_v8  ;;  %2350 = vmatprep.subr.mxu0 %v5188_v10  ;;  %v2076_v8 = vunpack.c.l.bf16 %v1864_v63 }
 0x290   : > { %2735 = vmatprep.subr.mxu1 %v5188_v10  ;;  %2351 = vmatpush2.msra.mxu0 %v1999_v9  ;;  %v2079_v9 = vunpack.c.h.bf16 %v1865_v4 }
 0x291   : > { %2736 = vmatpush2.msra.mxu1 %v2031_v11  ;;  %2352 = vmatprep.subr.mxu0 %v5188_v10  ;;  %v2081_v11 = vunpack.c.h.bf16 %v1866_v5 }
 0x292   : > { %2737 = vmatprep.subr.mxu1 %v5188_v10  ;;  %2353 = vmatpush2.msra.mxu0 %v1998_v6  ;;  %v1867_v6 = vld [vmem:[#allocation6 + $0xa0] sm:$0xff] }
 0x293   : > { %2738 = vmatpush2.msra.mxu1 %v2030_v13  ;;  %2354 = vmatprep.subr.mxu0 %v5188_v10  ;;  %v1868_v13 = vld [vmem:[#allocation6 + $0xa8] sm:$0xff] }
 0x294   : > { %2739 = vmatprep.subr.mxu1 %v5188_v10  ;;  %2355 = vmatpush2.msra.mxu0 %v1997_v14  ;;  %v2078_v14 = vunpack.c.l.bf16 %v1865_v4  ;;  %v2084_v22 = vunpack.c.l.bf16 %v1868_v13 }
 0x295   : > { %2740 = vmatpush2.msra.mxu1 %v2029_v15  ;;  %2356 = vmatprep.subr.mxu0 %v5188_v10  ;;  %v2080_v15 = vunpack.c.l.bf16 %v1866_v5 }
 0x296   : > { %2741 = vmatprep.subr.mxu1 %v5188_v10  ;;  %2357 = vmatpush2.msra.mxu0 %v1996_v16  ;;  %v2083_v16 = vunpack.c.h.bf16 %v1867_v6 }
 0x297   : > { %2742 = vmatpush2.msra.mxu1 %v2028_v12  ;;  %2358 = vmatprep.subr.mxu0 %v5188_v10  ;;  %v2085_v12 = vunpack.c.h.bf16 %v1868_v13 }
 0x298   : > { %2743 = vmatprep.subr.mxu1 %v5188_v10  ;;  %2359 = vmatpush2.msra.mxu0 %v1995_v20  ;;  %v1870_v20 = vld [vmem:[#allocation6 + $0xb8] sm:$0xff] }
 0x299   : > { %2744 = vmatpush2.msra.mxu1 %v2027_v21  ;;  %2360 = vmatprep.subr.mxu0 %v5188_v10  ;;  %v2082_v21 = vunpack.c.l.bf16 %v1867_v6 }
 0x29a   : > { %2745 = vmatprep.subr.mxu1 %v5188_v10  ;;  %2361 = vmatpush2.msra.mxu0 %v1994_v23  ;;  %v2055_v10 = vunpack.c.h.bf16 %v1853_v33  ;;  %v2087_v23 = vunpack.c.h.bf16 %v1869_v19 }
 0x29b   : > { %2746 = vmatpush2.msra.mxu1 %v2026_v25  ;;  %2363 = vmatmul.mubr.f32.vlgmr.msra.gmra.mxu0 %v2042_v24  ;;  %v2089_v24 = vunpack.c.h.bf16 %v1870_v20  ;;  %v1871_v25 = vld [vmem:[#allocation6 + $0xc0] sm:$0xff] }
 0x29c   : > { %2748 = vmatmul.mubr.f32.vlgmr.msra.gmra.mxu1 %v2044_v26  ;;  %2367 = vmatprep.mubr.f32.mxu0 %v2047_v27  ;;  %v1872_v26 = vld [vmem:[#allocation6 + $0xc8] sm:$0xff]  ;;  %v2086_v27 = vunpack.c.l.bf16 %v1869_v19  ;;  %v2091_v29 = vunpack.c.h.bf16 %v1871_v25 }
 0x29d   : > { %2752 = vmatprep.mubr.f32.mxu1 %v2049_v28  ;;  %v2088_v28 = vunpack.c.l.bf16 %v1870_v20  ;;  %v2093_v30 = vunpack.c.h.bf16 %v1872_v26 }
 0x29f   : > { %2368 = vmatmul.mubr.f32.gmra.mxu0 %v2046_v31  ;;  %v1873_v31 = vld [vmem:[#allocation6 + $0xd0] sm:$0xff] }
 0x2a0   : > { %2753 = vmatmul.mubr.f32.gmra.mxu1 %v2048_v32  ;;  %2372 = vmatprep.mubr.f32.mxu0 %v2051_v17  ;;  %v1874_v32 = vld [vmem:[#allocation6 + $0xd8] sm:$0xff]  ;;  %v2090_v17 = vunpack.c.l.bf16 %v1871_v25  ;;  %v2095_v33 = vunpack.c.h.bf16 %v1873_v31 }
 0x2a1   : > { %2757 = vmatprep.mubr.f32.mxu1 %v2053_v18  ;;  %v2092_v18 = vunpack.c.l.bf16 %v1872_v26  ;;  %v2097_v34 = vunpack.c.h.bf16 %v1874_v32 }
 0x2a3   : > { %2373 = vmatmul.mubr.f32.gmra.mxu0 %v2050_v35  ;;  %v1875_v35 = vld [vmem:[#allocation6 + $0xe0] sm:$0xff] }
 0x2a4   : > { %2758 = vmatmul.mubr.f32.gmra.mxu1 %v2052_v36  ;;  %2377 = vmatprep.mubr.f32.mxu0 %v2055_v10  ;;  %v1876_v36 = vld [vmem:[#allocation6 + $0xe8] sm:$0xff]  ;;  %v2094_v10 = vunpack.c.l.bf16 %v1873_v31  ;;  %v2099_v38 = vunpack.c.h.bf16 %v1875_v35 }
 0x2a5   : > { %2762 = vmatprep.mubr.f32.mxu1 %v2057_v37  ;;  %v2096_v37 = vunpack.c.l.bf16 %v1874_v32  ;;  %v2101_v39 = vunpack.c.h.bf16 %v1876_v36 }
 0x2a7   : > { %2378 = vmatmul.mubr.f32.gmra.mxu0 %v2054_v40  ;;  %v1877_v40 = vld [vmem:[#allocation6 + $0xf0] sm:$0xff] }
 0x2a8   : > { %2763 = vmatmul.mubr.f32.gmra.mxu1 %v2056_v41  ;;  %2382 = vmatprep.mubr.f32.mxu0 %v2059_v42  ;;  %v1878_v41 = vld [vmem:[#allocation6 + $0xf8] sm:$0xff]  ;;  %v2098_v42 = vunpack.c.l.bf16 %v1875_v35  ;;  %v2103_v44 = vunpack.c.h.bf16 %v1877_v40 }
 0x2a9   : > { %2767 = vmatprep.mubr.f32.mxu1 %v2061_v43  ;;  %v2100_v43 = vunpack.c.l.bf16 %v1876_v36  ;;  %v2105_v45 = vunpack.c.h.bf16 %v1878_v41 }
 0x2ab   : > { %2383 = vmatmul.mubr.f32.gmra.mxu0 %v2058_v46  ;;  %v1879_v46 = vld [vmem:[#allocation6 + $0x100] sm:$0xff] }
 0x2ac   : > { %2768 = vmatmul.mubr.f32.gmra.mxu1 %v2060_v47  ;;  %2387 = vmatprep.mubr.f32.mxu0 %v2063_v48  ;;  %v1880_v47 = vld [vmem:[#allocation6 + $0x108] sm:$0xff]  ;;  %v2102_v48 = vunpack.c.l.bf16 %v1877_v40  ;;  %v2107_v50 = vunpack.c.h.bf16 %v1879_v46 }
 0x2ad   : > { %2772 = vmatprep.mubr.f32.mxu1 %v2065_v49  ;;  %v2104_v49 = vunpack.c.l.bf16 %v1878_v41  ;;  %v2109_v51 = vunpack.c.h.bf16 %v1880_v47 }
 0x2af   : > { %2388 = vmatmul.mubr.f32.gmra.mxu0 %v2062_v52  ;;  %v1881_v52 = vld [vmem:[#allocation6 + $0x110] sm:$0xff] }
 0x2b0   : > { %2773 = vmatmul.mubr.f32.gmra.mxu1 %v2064_v53  ;;  %2392 = vmatprep.mubr.f32.mxu0 %v2067_v54  ;;  %v1882_v53 = vld [vmem:[#allocation6 + $0x118] sm:$0xff]  ;;  %v2106_v54 = vunpack.c.l.bf16 %v1879_v46  ;;  %v2111_v56 = vunpack.c.h.bf16 %v1881_v52 }
 0x2b1   : > { %2777 = vmatprep.mubr.f32.mxu1 %v2069_v55  ;;  %v2108_v55 = vunpack.c.l.bf16 %v1880_v47  ;;  %v2113_v57 = vunpack.c.h.bf16 %v1882_v53 }
 0x2b3   : > { %2393 = vmatmul.mubr.f32.gmra.mxu0 %v2066_v58  ;;  %v1883_v58 = vld [vmem:[#allocation6 + $0x120] sm:$0xff] }
 0x2b4   : > { %2778 = vmatmul.mubr.f32.gmra.mxu1 %v2068_v59  ;;  %2397 = vmatprep.mubr.f32.mxu0 %v2071_v60  ;;  %v1884_v59 = vld [vmem:[#allocation6 + $0x128] sm:$0xff]  ;;  %v2110_v60 = vunpack.c.l.bf16 %v1881_v52  ;;  %v2115_v62 = vunpack.c.h.bf16 %v1883_v58 }
 0x2b5   : > { %2782 = vmatprep.mubr.f32.mxu1 %v2073_v61  ;;  %v2112_v61 = vunpack.c.l.bf16 %v1882_v53  ;;  %v2117_v63 = vunpack.c.h.bf16 %v1884_v59 }
 0x2b7   : > { %2398 = vmatmul.mubr.f32.gmra.mxu0 %v2070_v0  ;;  %v1885_v0 = vld [vmem:[#allocation6 + $0x130] sm:$0xff] }
 0x2b8   : > { %2783 = vmatmul.mubr.f32.gmra.mxu1 %v2072_v1  ;;  %2402 = vmatprep.mubr.f32.mxu0 %v2075_v2  ;;  %v1886_v1 = vld [vmem:[#allocation6 + $0x138] sm:$0xff]  ;;  %v2114_v2 = vunpack.c.l.bf16 %v1883_v58  ;;  %v2119_v4 = vunpack.c.h.bf16 %v1885_v0 }
 0x2b9   : > { %2787 = vmatprep.mubr.f32.mxu1 %v2077_v3  ;;  %v2116_v3 = vunpack.c.l.bf16 %v1884_v59  ;;  %v2121_v5 = vunpack.c.h.bf16 %v1886_v1 }
 0x2bb   : > { %2403 = vmatmul.mubr.f32.gmra.mxu0 %v2074_v7  ;;  %v1887_v7 = vld [vmem:[#allocation6 + $0x140] sm:$0xff] }
 0x2bc   : > { %2788 = vmatmul.mubr.f32.gmra.mxu1 %v2076_v8  ;;  %2407 = vmatprep.mubr.f32.mxu0 %v2079_v9  ;;  %v1888_v8 = vld [vmem:[#allocation6 + $0x148] sm:$0xff]  ;;  %v2118_v9 = vunpack.c.l.bf16 %v1885_v0  ;;  %v2123_v6 = vunpack.c.h.bf16 %v1887_v7 }
 0x2bd   : > { %2792 = vmatprep.mubr.f32.mxu1 %v2081_v11  ;;  %v2120_v11 = vunpack.c.l.bf16 %v1886_v1  ;;  %v2125_v13 = vunpack.c.h.bf16 %v1888_v8 }
 0x2bf   : > { %2408 = vmatmul.mubr.f32.gmra.mxu0 %v2078_v14  ;;  %v1889_v14 = vld [vmem:[#allocation6 + $0x150] sm:$0xff] }
 0x2c0   : > { %2793 = vmatmul.mubr.f32.gmra.mxu1 %v2080_v15  ;;  %2412 = vmatprep.mubr.f32.mxu0 %v2083_v16  ;;  %v1890_v15 = vld [vmem:[#allocation6 + $0x158] sm:$0xff]  ;;  %v2122_v16 = vunpack.c.l.bf16 %v1887_v7  ;;  %v2127_v19 = vunpack.c.h.bf16 %v1889_v14 }
 0x2c1   : > { %2797 = vmatprep.mubr.f32.mxu1 %v2085_v12  ;;  %v2124_v12 = vunpack.c.l.bf16 %v1888_v8  ;;  %v2129_v20 = vunpack.c.h.bf16 %v1890_v15 }
 0x2c3   : > { %2413 = vmatmul.mubr.f32.gmra.mxu0 %v2082_v21  ;;  %v1891_v21 = vld [vmem:[#allocation6 + $0x160] sm:$0xff] }
 0x2c4   : > { %2798 = vmatmul.mubr.f32.gmra.mxu1 %v2084_v22  ;;  %2417 = vmatprep.mubr.f32.mxu0 %v2087_v23  ;;  %v1892_v22 = vld [vmem:[#allocation6 + $0x168] sm:$0xff]  ;;  %v2126_v23 = vunpack.c.l.bf16 %v1889_v14  ;;  %v2131_v25 = vunpack.c.h.bf16 %v1891_v21 }
 0x2c5   : > { %2802 = vmatprep.mubr.f32.mxu1 %v2089_v24  ;;  %v2128_v24 = vunpack.c.l.bf16 %v1890_v15  ;;  %v2133_v26 = vunpack.c.h.bf16 %v1892_v22 }
 0x2c7   : > { %2418 = vmatmul.mubr.f32.gmra.mxu0 %v2086_v27  ;;  %v1893_v27 = vld [vmem:[#allocation6 + $0x170] sm:$0xff] }
 0x2c8   : > { %2803 = vmatmul.mubr.f32.gmra.mxu1 %v2088_v28  ;;  %2422 = vmatprep.mubr.f32.mxu0 %v2091_v29  ;;  %v1894_v28 = vld [vmem:[#allocation6 + $0x178] sm:$0xff]  ;;  %v2130_v29 = vunpack.c.l.bf16 %v1891_v21  ;;  %v2135_v31 = vunpack.c.h.bf16 %v1893_v27 }
 0x2c9   : > { %2807 = vmatprep.mubr.f32.mxu1 %v2093_v30  ;;  %v2132_v30 = vunpack.c.l.bf16 %v1892_v22  ;;  %v2137_v32 = vunpack.c.h.bf16 %v1894_v28 }
 0x2cb   : > { %2423 = vmatmul.mubr.f32.gmra.mxu0 %v2090_v17  ;;  %v1895_v17 = vld [vmem:[#allocation6 + $0x180] sm:$0xff] }
 0x2cc   : > { %2808 = vmatmul.mubr.f32.gmra.mxu1 %v2092_v18  ;;  %2427 = vmatprep.mubr.f32.mxu0 %v2095_v33  ;;  %v1896_v18 = vld [vmem:[#allocation6 + $0x188] sm:$0xff]  ;;  %v2134_v33 = vunpack.c.l.bf16 %v1893_v27  ;;  %v2139_v35 = vunpack.c.h.bf16 %v1895_v17 }
 0x2cd   : > { %2812 = vmatprep.mubr.f32.mxu1 %v2097_v34  ;;  %v2136_v34 = vunpack.c.l.bf16 %v1894_v28  ;;  %v2141_v36 = vunpack.c.h.bf16 %v1896_v18 }
 0x2cf   : > { %2428 = vmatmul.mubr.f32.gmra.mxu0 %v2094_v10  ;;  %v1897_v10 = vld [vmem:[#allocation6 + $0x190] sm:$0xff] }
 0x2d0   : > { %2813 = vmatmul.mubr.f32.gmra.mxu1 %v2096_v37  ;;  %2432 = vmatprep.mubr.f32.mxu0 %v2099_v38  ;;  %v1898_v37 = vld [vmem:[#allocation6 + $0x198] sm:$0xff]  ;;  %v2138_v38 = vunpack.c.l.bf16 %v1895_v17  ;;  %v2143_v40 = vunpack.c.h.bf16 %v1897_v10 }
 0x2d1   : > { %2817 = vmatprep.mubr.f32.mxu1 %v2101_v39  ;;  %v2140_v39 = vunpack.c.l.bf16 %v1896_v18  ;;  %v2145_v41 = vunpack.c.h.bf16 %v1898_v37 }
 0x2d3   : > { %2433 = vmatmul.mubr.f32.gmra.mxu0 %v2098_v42  ;;  %v1899_v42 = vld [vmem:[#allocation6 + $0x1a0] sm:$0xff] }
 0x2d4   : > { %2818 = vmatmul.mubr.f32.gmra.mxu1 %v2100_v43  ;;  %2437 = vmatprep.mubr.f32.mxu0 %v2103_v44  ;;  %v1900_v43 = vld [vmem:[#allocation6 + $0x1a8] sm:$0xff]  ;;  %v2142_v44 = vunpack.c.l.bf16 %v1897_v10  ;;  %v2147_v46 = vunpack.c.h.bf16 %v1899_v42 }
 0x2d5   : > { %2822 = vmatprep.mubr.f32.mxu1 %v2105_v45  ;;  %v2144_v45 = vunpack.c.l.bf16 %v1898_v37  ;;  %v2149_v47 = vunpack.c.h.bf16 %v1900_v43 }
 0x2d7   : > { %2438 = vmatmul.mubr.f32.gmra.mxu0 %v2102_v48  ;;  %v1901_v48 = vld [vmem:[#allocation6 + $0x1b0] sm:$0xff] }
 0x2d8   : > { %2823 = vmatmul.mubr.f32.gmra.mxu1 %v2104_v49  ;;  %2442 = vmatprep.mubr.f32.mxu0 %v2107_v50  ;;  %v1902_v49 = vld [vmem:[#allocation6 + $0x1b8] sm:$0xff]  ;;  %v2146_v50 = vunpack.c.l.bf16 %v1899_v42  ;;  %v2151_v52 = vunpack.c.h.bf16 %v1901_v48 }
 0x2d9   : > { %2827 = vmatprep.mubr.f32.mxu1 %v2109_v51  ;;  %v2148_v51 = vunpack.c.l.bf16 %v1900_v43  ;;  %v2153_v53 = vunpack.c.h.bf16 %v1902_v49 }
 0x2db   : > { %2443 = vmatmul.mubr.f32.gmra.mxu0 %v2106_v54  ;;  %v1903_v54 = vld [vmem:[#allocation6 + $0x1c0] sm:$0xff] }
 0x2dc   : > { %2828 = vmatmul.mubr.f32.gmra.mxu1 %v2108_v55  ;;  %2447 = vmatprep.mubr.f32.mxu0 %v2111_v56  ;;  %v1904_v55 = vld [vmem:[#allocation6 + $0x1c8] sm:$0xff]  ;;  %v2150_v56 = vunpack.c.l.bf16 %v1901_v48  ;;  %v2155_v58 = vunpack.c.h.bf16 %v1903_v54 }
 0x2dd   : > { %2832 = vmatprep.mubr.f32.mxu1 %v2113_v57  ;;  %v2152_v57 = vunpack.c.l.bf16 %v1902_v49  ;;  %v2157_v59 = vunpack.c.h.bf16 %v1904_v55 }
 0x2df   : > { %2448 = vmatmul.mubr.f32.gmra.mxu0 %v2110_v60  ;;  %v1905_v60 = vld [vmem:[#allocation6 + $0x1d0] sm:$0xff] }
 0x2e0   : > { %2833 = vmatmul.mubr.f32.gmra.mxu1 %v2112_v61  ;;  %2452 = vmatprep.mubr.f32.mxu0 %v2115_v62  ;;  %v1906_v61 = vld [vmem:[#allocation6 + $0x1d8] sm:$0xff]  ;;  %v2154_v62 = vunpack.c.l.bf16 %v1903_v54  ;;  %v2159_v0 = vunpack.c.h.bf16 %v1905_v60 }
 0x2e1   : > { %2837 = vmatprep.mubr.f32.mxu1 %v2117_v63  ;;  %v2156_v63 = vunpack.c.l.bf16 %v1904_v55  ;;  %v2161_v1 = vunpack.c.h.bf16 %v1906_v61 }
 0x2e3   : > { %2453 = vmatmul.mubr.f32.gmra.mxu0 %v2114_v2  ;;  %v1907_v2 = vld [vmem:[#allocation6 + $0x1e0] sm:$0xff] }
 0x2e4   : > { %2838 = vmatmul.mubr.f32.gmra.mxu1 %v2116_v3  ;;  %2457 = vmatprep.mubr.f32.mxu0 %v2119_v4  ;;  %v1908_v3 = vld [vmem:[#allocation6 + $0x1e8] sm:$0xff]  ;;  %v2158_v4 = vunpack.c.l.bf16 %v1905_v60  ;;  %v2163_v7 = vunpack.c.h.bf16 %v1907_v2 }
 0x2e5   : > { %2842 = vmatprep.mubr.f32.mxu1 %v2121_v5  ;;  %v2160_v5 = vunpack.c.l.bf16 %v1906_v61  ;;  %v2165_v8 = vunpack.c.h.bf16 %v1908_v3 }
 0x2e7   : > { %2458 = vmatmul.mubr.f32.gmra.mxu0 %v2118_v9  ;;  %v1909_v9 = vld [vmem:[#allocation6 + $0x1f0] sm:$0xff] }
 0x2e8   : > { %2843 = vmatmul.mubr.f32.gmra.mxu1 %v2120_v11  ;;  %2462 = vmatprep.mubr.f32.mxu0 %v2123_v6  ;;  %v1910_v11 = vld [vmem:[#allocation6 + $0x1f8] sm:$0xff]  ;;  %v2162_v6 = vunpack.c.l.bf16 %v1907_v2  ;;  %v2167_v14 = vunpack.c.h.bf16 %v1909_v9 }
 0x2e9   : > { %2847 = vmatprep.mubr.f32.mxu1 %v2125_v13  ;;  %v2164_v13 = vunpack.c.l.bf16 %v1908_v3  ;;  %v2169_v15 = vunpack.c.h.bf16 %v1910_v11 }
 0x2eb   : > { %2463 = vmatmul.mubr.f32.gmra.mxu0 %v2122_v16  ;;  %v1911_v16 = vld [vmem:[#allocation6 + $0x200] sm:$0xff] }
 0x2ec   : > { %2848 = vmatmul.mubr.f32.gmra.mxu1 %v2124_v12  ;;  %2467 = vmatprep.mubr.f32.mxu0 %v2127_v19  ;;  %v1912_v12 = vld [vmem:[#allocation6 + $0x208] sm:$0xff]  ;;  %v2166_v19 = vunpack.c.l.bf16 %v1909_v9  ;;  %v2171_v21 = vunpack.c.h.bf16 %v1911_v16 }
 0x2ed   : > { %2852 = vmatprep.mubr.f32.mxu1 %v2129_v20  ;;  %v2168_v20 = vunpack.c.l.bf16 %v1910_v11  ;;  %v2173_v22 = vunpack.c.h.bf16 %v1912_v12 }
 0x2ef   : > { %2468 = vmatmul.mubr.f32.gmra.mxu0 %v2126_v23  ;;  %v1913_v23 = vld [vmem:[#allocation6 + $0x210] sm:$0xff] }
 0x2f0   : > { %2853 = vmatmul.mubr.f32.gmra.mxu1 %v2128_v24  ;;  %2472 = vmatprep.mubr.f32.mxu0 %v2131_v25  ;;  %v1914_v24 = vld [vmem:[#allocation6 + $0x218] sm:$0xff]  ;;  %v2170_v25 = vunpack.c.l.bf16 %v1911_v16  ;;  %v2175_v27 = vunpack.c.h.bf16 %v1913_v23 }
 0x2f1   : > { %2857 = vmatprep.mubr.f32.mxu1 %v2133_v26  ;;  %v2172_v26 = vunpack.c.l.bf16 %v1912_v12  ;;  %v2177_v28 = vunpack.c.h.bf16 %v1914_v24 }
 0x2f3   : > { %2473 = vmatmul.mubr.f32.gmra.mxu0 %v2130_v29  ;;  %v1915_v29 = vld [vmem:[#allocation6 + $0x220] sm:$0xff] }
 0x2f4   : > { %2858 = vmatmul.mubr.f32.gmra.mxu1 %v2132_v30  ;;  %2477 = vmatprep.mubr.f32.mxu0 %v2135_v31  ;;  %v1916_v30 = vld [vmem:[#allocation6 + $0x228] sm:$0xff]  ;;  %v2174_v31 = vunpack.c.l.bf16 %v1913_v23  ;;  %v2179_v17 = vunpack.c.h.bf16 %v1915_v29 }
 0x2f5   : > { %2862 = vmatprep.mubr.f32.mxu1 %v2137_v32  ;;  %v2176_v32 = vunpack.c.l.bf16 %v1914_v24  ;;  %v2181_v18 = vunpack.c.h.bf16 %v1916_v30 }
 0x2f7   : > { %2478 = vmatmul.mubr.f32.gmra.mxu0 %v2134_v33  ;;  %v1917_v33 = vld [vmem:[#allocation6 + $0x230] sm:$0xff] }
 0x2f8   : > { %2863 = vmatmul.mubr.f32.gmra.mxu1 %v2136_v34  ;;  %2482 = vmatprep.mubr.f32.mxu0 %v2139_v35  ;;  %v1918_v34 = vld [vmem:[#allocation6 + $0x238] sm:$0xff]  ;;  %v2178_v35 = vunpack.c.l.bf16 %v1915_v29  ;;  %v2183_v10 = vunpack.c.h.bf16 %v1917_v33 }
 0x2f9   : > { %2867 = vmatprep.mubr.f32.mxu1 %v2141_v36  ;;  %v2180_v36 = vunpack.c.l.bf16 %v1916_v30  ;;  %v2185_v37 = vunpack.c.h.bf16 %v1918_v34 }
 0x2fb   : > { %2483 = vmatmul.mubr.f32.gmra.mxu0 %v2138_v38  ;;  %v1919_v38 = vld [vmem:[#allocation6 + $0x240] sm:$0xff] }
 0x2fc   : > { %2868 = vmatmul.mubr.f32.gmra.mxu1 %v2140_v39  ;;  %2487 = vmatprep.mubr.f32.mxu0 %v2143_v40  ;;  %v1920_v39 = vld [vmem:[#allocation6 + $0x248] sm:$0xff]  ;;  %v2182_v40 = vunpack.c.l.bf16 %v1917_v33  ;;  %v2187_v42 = vunpack.c.h.bf16 %v1919_v38 }
 0x2fd   : > { %2872 = vmatprep.mubr.f32.mxu1 %v2145_v41  ;;  %v2184_v41 = vunpack.c.l.bf16 %v1918_v34  ;;  %v2189_v43 = vunpack.c.h.bf16 %v1920_v39 }
 0x2ff   : > { %2488 = vmatmul.mubr.f32.gmra.mxu0 %v2142_v44  ;;  %v1921_v44 = vld [vmem:[#allocation6 + $0x250] sm:$0xff] }
 0x300   : > { %2873 = vmatmul.mubr.f32.gmra.mxu1 %v2144_v45  ;;  %2492 = vmatprep.mubr.f32.mxu0 %v2147_v46  ;;  %v1922_v45 = vld [vmem:[#allocation6 + $0x258] sm:$0xff]  ;;  %v2186_v46 = vunpack.c.l.bf16 %v1919_v38  ;;  %v2191_v48 = vunpack.c.h.bf16 %v1921_v44 }
 0x301   : > { %2877 = vmatprep.mubr.f32.mxu1 %v2149_v47  ;;  %v2188_v47 = vunpack.c.l.bf16 %v1920_v39  ;;  %v2193_v49 = vunpack.c.h.bf16 %v1922_v45 }
 0x303   : > { %2493 = vmatmul.mubr.f32.gmra.mxu0 %v2146_v50  ;;  %v1923_v50 = vld [vmem:[#allocation6 + $0x260] sm:$0xff] }
 0x304   : > { %2878 = vmatmul.mubr.f32.gmra.mxu1 %v2148_v51  ;;  %2497 = vmatprep.mubr.f32.mxu0 %v2151_v52  ;;  %v1924_v51 = vld [vmem:[#allocation6 + $0x268] sm:$0xff]  ;;  %v2190_v52 = vunpack.c.l.bf16 %v1921_v44  ;;  %v2195_v54 = vunpack.c.h.bf16 %v1923_v50 }
 0x305   : > { %2882 = vmatprep.mubr.f32.mxu1 %v2153_v53  ;;  %v2192_v53 = vunpack.c.l.bf16 %v1922_v45  ;;  %v2197_v55 = vunpack.c.h.bf16 %v1924_v51 }
 0x307   : > { %2498 = vmatmul.mubr.f32.gmra.mxu0 %v2150_v56  ;;  %v1925_v56 = vld [vmem:[#allocation6 + $0x270] sm:$0xff] }
 0x308   : > { %2883 = vmatmul.mubr.f32.gmra.mxu1 %v2152_v57  ;;  %2502 = vmatprep.mubr.f32.mxu0 %v2155_v58  ;;  %v1926_v57 = vld [vmem:[#allocation6 + $0x278] sm:$0xff]  ;;  %v2194_v58 = vunpack.c.l.bf16 %v1923_v50  ;;  %v2199_v60 = vunpack.c.h.bf16 %v1925_v56 }
 0x309   : > { %2887 = vmatprep.mubr.f32.mxu1 %v2157_v59  ;;  %v2196_v59 = vunpack.c.l.bf16 %v1924_v51  ;;  %v2201_v61 = vunpack.c.h.bf16 %v1926_v57 }
 0x30b   : > { %2503 = vmatmul.mubr.f32.gmra.mxu0 %v2154_v62  ;;  %v1927_v62 = vld [vmem:[#allocation6 + $0x280] sm:$0xff] }
 0x30c   : > { %2888 = vmatmul.mubr.f32.gmra.mxu1 %v2156_v63  ;;  %2507 = vmatprep.mubr.f32.mxu0 %v2159_v0  ;;  %v1928_v63 = vld [vmem:[#allocation6 + $0x288] sm:$0xff]  ;;  %v2198_v0 = vunpack.c.l.bf16 %v1925_v56  ;;  %v2203_v2 = vunpack.c.h.bf16 %v1927_v62 }
 0x30d   : > { %2892 = vmatprep.mubr.f32.mxu1 %v2161_v1  ;;  %v2200_v1 = vunpack.c.l.bf16 %v1926_v57  ;;  %v2205_v3 = vunpack.c.h.bf16 %v1928_v63 }
 0x30f   : > { %2508 = vmatmul.mubr.f32.gmra.mxu0 %v2158_v4  ;;  %v1929_v4 = vld [vmem:[#allocation6 + $0x290] sm:$0xff] }
 0x310   : > { %2893 = vmatmul.mubr.f32.gmra.mxu1 %v2160_v5  ;;  %2512 = vmatprep.mubr.f32.mxu0 %v2163_v7  ;;  %v1930_v5 = vld [vmem:[#allocation6 + $0x298] sm:$0xff]  ;;  %v2202_v7 = vunpack.c.l.bf16 %v1927_v62  ;;  %v2207_v9 = vunpack.c.h.bf16 %v1929_v4  ;;  %v5971_v62 = vstv %s3133_s16 }
 0x311   : > { %2897 = vmatprep.mubr.f32.mxu1 %v2165_v8  ;;  %v2204_v8 = vunpack.c.l.bf16 %v1928_v63  ;;  %v2209_v11 = vunpack.c.h.bf16 %v1930_v5 }
 0x313   : > { %2513 = vmatmul.mubr.f32.gmra.mxu0 %v2162_v6  ;;  %v1931_v6 = vld [vmem:[#allocation6 + $0x2a0] sm:$0xff] }
 0x314   : > { %2898 = vmatmul.mubr.f32.gmra.mxu1 %v2164_v13  ;;  %2517 = vmatprep.mubr.f32.mxu0 %v2167_v14  ;;  %v1932_v13 = vld [vmem:[#allocation6 + $0x2a8] sm:$0xff]  ;;  %v2206_v14 = vunpack.c.l.bf16 %v1929_v4  ;;  %v2211_v16 = vunpack.c.h.bf16 %v1931_v6  ;;  %v3069_v4 = vld [vmem:[#allocation3 + $0xb0] sm:$0xff] }
 0x315   : > { %2902 = vmatprep.mubr.f32.mxu1 %v2169_v15  ;;  %v2208_v15 = vunpack.c.l.bf16 %v1930_v5  ;;  %v2213_v12 = vunpack.c.h.bf16 %v1932_v13 }
 0x317   : > { %2518 = vmatmul.mubr.f32.gmra.mxu0 %v2166_v19  ;;  %v1933_v19 = vld [vmem:[#allocation6 + $0x2b0] sm:$0xff] }
 0x318   : > { %2903 = vmatmul.mubr.f32.gmra.mxu1 %v2168_v20  ;;  %2522 = vmatprep.mubr.f32.mxu0 %v2171_v21  ;;  %v1934_v20 = vld [vmem:[#allocation6 + $0x2b8] sm:$0xff]  ;;  %v2210_v21 = vunpack.c.l.bf16 %v1931_v6  ;;  %v2215_v23 = vunpack.c.h.bf16 %v1933_v19 }
 0x319   : > { %2907 = vmatprep.mubr.f32.mxu1 %v2173_v22  ;;  %v2212_v22 = vunpack.c.l.bf16 %v1932_v13  ;;  %v2217_v24 = vunpack.c.h.bf16 %v1934_v20 }
 0x31b   : > { %2523 = vmatmul.mubr.f32.gmra.mxu0 %v2170_v25  ;;  %v1935_v25 = vld [vmem:[#allocation6 + $0x2c0] sm:$0xff] }
 0x31c   : > { %2908 = vmatmul.mubr.f32.gmra.mxu1 %v2172_v26  ;;  %2527 = vmatprep.mubr.f32.mxu0 %v2175_v27  ;;  %v1936_v26 = vld [vmem:[#allocation6 + $0x2c8] sm:$0xff]  ;;  %v2214_v27 = vunpack.c.l.bf16 %v1933_v19  ;;  %v2219_v29 = vunpack.c.h.bf16 %v1935_v25 }
 0x31d   : > { %2912 = vmatprep.mubr.f32.mxu1 %v2177_v28  ;;  %v2216_v28 = vunpack.c.l.bf16 %v1934_v20  ;;  %v2221_v30 = vunpack.c.h.bf16 %v1936_v26 }
 0x31f   : > { %2528 = vmatmul.mubr.f32.gmra.mxu0 %v2174_v31  ;;  %v1937_v31 = vld [vmem:[#allocation6 + $0x2d0] sm:$0xff] }
 0x320   : > { %2913 = vmatmul.mubr.f32.gmra.mxu1 %v2176_v32  ;;  %2532 = vmatprep.mubr.f32.mxu0 %v2179_v17  ;;  %v1938_v32 = vld [vmem:[#allocation6 + $0x2d8] sm:$0xff]  ;;  %v2218_v17 = vunpack.c.l.bf16 %v1935_v25  ;;  %v2223_v33 = vunpack.c.h.bf16 %v1937_v31  ;;  %v1952_v25 = vld [vmem:[#allocation6 + $0x348] sm:$0xff] }
 0x321   : > { %2917 = vmatprep.mubr.f32.mxu1 %v2181_v18  ;;  %v2220_v18 = vunpack.c.l.bf16 %v1936_v26  ;;  %v2225_v34 = vunpack.c.h.bf16 %v1938_v32 }
 0x323   : > { %2533 = vmatmul.mubr.f32.gmra.mxu0 %v2178_v35  ;;  %v1939_v35 = vld [vmem:[#allocation6 + $0x2e0] sm:$0xff] }
 0x324   : > { %2918 = vmatmul.mubr.f32.gmra.mxu1 %v2180_v36  ;;  %2537 = vmatprep.mubr.f32.mxu0 %v2183_v10  ;;  %v1940_v36 = vld [vmem:[#allocation6 + $0x2e8] sm:$0xff]  ;;  %v2222_v10 = vunpack.c.l.bf16 %v1937_v31  ;;  %v2227_v38 = vunpack.c.h.bf16 %v1939_v35 }
 0x325   : > { %2922 = vmatprep.mubr.f32.mxu1 %v2185_v37  ;;  %v2224_v37 = vunpack.c.l.bf16 %v1938_v32  ;;  %v2229_v39 = vunpack.c.h.bf16 %v1940_v36 }
 0x327   : > { %2538 = vmatmul.mubr.f32.gmra.mxu0 %v2182_v40  ;;  %v1941_v40 = vld [vmem:[#allocation6 + $0x2f0] sm:$0xff] }
 0x328   : > { %2923 = vmatmul.mubr.f32.gmra.mxu1 %v2184_v41  ;;  %2542 = vmatprep.mubr.f32.mxu0 %v2187_v42  ;;  %v1942_v41 = vld [vmem:[#allocation6 + $0x2f8] sm:$0xff]  ;;  %v2226_v42 = vunpack.c.l.bf16 %v1939_v35  ;;  %v2231_v44 = vunpack.c.h.bf16 %v1941_v40 }
 0x329   : > { %2927 = vmatprep.mubr.f32.mxu1 %v2189_v43  ;;  %v2228_v43 = vunpack.c.l.bf16 %v1940_v36  ;;  %v2233_v45 = vunpack.c.h.bf16 %v1942_v41  ;;  %v1953_v36 = vld [vmem:[#allocation6 + $0x350] sm:$0xff] }
 0x32b   : > { %2543 = vmatmul.mubr.f32.gmra.mxu0 %v2186_v46  ;;  %v1943_v46 = vld [vmem:[#allocation6 + $0x300] sm:$0xff] }
 0x32c   : > { %2928 = vmatmul.mubr.f32.gmra.mxu1 %v2188_v47  ;;  %2547 = vmatprep.mubr.f32.mxu0 %v2191_v48  ;;  %v1944_v47 = vld [vmem:[#allocation6 + $0x308] sm:$0xff]  ;;  %v2230_v48 = vunpack.c.l.bf16 %v1941_v40  ;;  %v2235_v50 = vunpack.c.h.bf16 %v1943_v46 }
 0x32d   : > { %2932 = vmatprep.mubr.f32.mxu1 %v2193_v49  ;;  %v2232_v49 = vunpack.c.l.bf16 %v1942_v41  ;;  %v2237_v51 = vunpack.c.h.bf16 %v1944_v47  ;;  %v2252_v41 = vunpack.c.l.bf16 %v1952_v25 }
 0x32f   : > { %2548 = vmatmul.mubr.f32.gmra.mxu0 %v2190_v52  ;;  %v1945_v52 = vld [vmem:[#allocation6 + $0x310] sm:$0xff] }
 0x330   : > { %2933 = vmatmul.mubr.f32.gmra.mxu1 %v2192_v53  ;;  %2552 = vmatprep.mubr.f32.mxu0 %v2195_v54  ;;  %v1946_v53 = vld [vmem:[#allocation6 + $0x318] sm:$0xff]  ;;  %v2234_v54 = vunpack.c.l.bf16 %v1943_v46  ;;  %v2239_v56 = vunpack.c.h.bf16 %v1945_v52  ;;  %v2238_v63 = vunpack.c.l.bf16 %v1945_v52 }
 0x331   : > { %2937 = vmatprep.mubr.f32.mxu1 %v2197_v55  ;;  %v2236_v55 = vunpack.c.l.bf16 %v1944_v47  ;;  %v2241_v57 = vunpack.c.h.bf16 %v1946_v53  ;;  %v3072_v46 = vld [vmem:[#allocation3 + $0x18] sm:$0xff] }
 0x333   : > { %2553 = vmatmul.mubr.f32.gmra.mxu0 %v2194_v58  ;;  %v1947_v58 = vld [vmem:[#allocation6 + $0x320] sm:$0xff] }
 0x334   : > { %2938 = vmatmul.mubr.f32.gmra.mxu1 %v2196_v59  ;;  %2557 = vmatprep.mubr.f32.mxu0 %v2199_v60  ;;  %v1948_v59 = vld [vmem:[#allocation6 + $0x328] sm:$0xff] }
 0x335   : > { %2942 = vmatprep.mubr.f32.mxu1 %v2201_v61 }
 0x337   : > { %2558 = vmatmul.mubr.f32.gmra.mxu0 %v2198_v0  ;;  %v2240_v0 = vunpack.c.l.bf16 %v1946_v53 }
 0x338   : > { %2943 = vmatmul.mubr.f32.gmra.mxu1 %v2200_v1  ;;  %2562 = vmatprep.mubr.f32.mxu0 %v2203_v2  ;;  %v2243_v2 = vunpack.c.h.bf16 %v1947_v58 }
 0x339   : > { %2947 = vmatprep.mubr.f32.mxu1 %v2205_v3  ;;  %v2245_v3 = vunpack.c.h.bf16 %v1948_v59 }
 0x33b   : > { %2563 = vmatmul.mubr.f32.gmra.mxu0 %v2202_v7 }
 0x33c   : > { %2948 = vmatmul.mubr.f32.gmra.mxu1 %v2204_v8  ;;  %2567 = vmatprep.mubr.f32.mxu0 %v2207_v9  ;;  %v1949_v8 = vld [vmem:[#allocation6 + $0x330] sm:$0xff]  ;;  %v1950_v9 = vld [vmem:[#allocation6 + $0x338] sm:$0xff] }
 0x33d   : > { %2952 = vmatprep.mubr.f32.mxu1 %v2209_v11  ;;  %v2247_v19 = vunpack.c.h.bf16 %v1949_v8  ;;  %v2249_v20 = vunpack.c.h.bf16 %v1950_v9 }
 0x33f   : > { %2568 = vmatmul.mubr.f32.gmra.mxu0 %v2206_v14  ;;  %v2242_v14 = vunpack.c.l.bf16 %v1947_v58 }
 0x340   : > { %2953 = vmatmul.mubr.f32.gmra.mxu1 %v2208_v15  ;;  %2572 = vmatprep.mubr.f32.mxu0 %v2211_v16  ;;  %v2244_v15 = vunpack.c.l.bf16 %v1948_v59 }
 0x341   : > { %2957 = vmatprep.mubr.f32.mxu1 %v2213_v12 }
 0x343   : > { %2573 = vmatmul.mubr.f32.gmra.mxu0 %v2210_v21  ;;  %v3070_v21 = vld [vmem:[#allocation3 + $0x1b0] sm:$0xff] }
 0x344   : > { %2958 = vmatmul.mubr.f32.gmra.mxu1 %v2212_v22  ;;  %2577 = vmatprep.mubr.f32.mxu0 %v2215_v23 }
 0x345   : > { %2962 = vmatprep.mubr.f32.mxu1 %v2217_v24  ;;  %v1951_v24 = vld [vmem:[#allocation6 + $0x340] sm:$0xff] }
 0x346   : > { %v2250_v40 = vunpack.c.l.bf16 %v1951_v24 }
 0x347   : > { %2578 = vmatmul.mubr.f32.gmra.mxu0 %v2214_v27 }
 0x348   : > { %2963 = vmatmul.mubr.f32.gmra.mxu1 %v2216_v28  ;;  %2582 = vmatprep.mubr.f32.mxu0 %v2219_v29  ;;  %v2246_v29 = vunpack.c.l.bf16 %v1949_v8 }
 0x349   : > { %2967 = vmatprep.mubr.f32.mxu1 %v2221_v30  ;;  %v2248_v30 = vunpack.c.l.bf16 %v1950_v9 }
 0x34b   : > { %2583 = vmatmul.mubr.f32.gmra.mxu0 %v2218_v17  ;;  %v2251_v17 = vunpack.c.h.bf16 %v1951_v24 }
 0x34c   : > { %2968 = vmatmul.mubr.f32.gmra.mxu1 %v2220_v18  ;;  %2587 = vmatprep.mubr.f32.mxu0 %v2223_v33  ;;  %v2253_v18 = vunpack.c.h.bf16 %v1952_v25  ;;  %v3071_v33 = vld [vmem:[#allocation3 + $0xd8] sm:$0xff] }
 0x34d   : > { %2972 = vmatprep.mubr.f32.mxu1 %v2225_v34 }
 0x34f   : > { %2588 = vmatmul.mubr.f32.gmra.mxu0 %v2222_v10  ;;  %v1954_v10 = vld [vmem:[#allocation6 + $0x358] sm:$0xff] }
 0x350   : > { %2973 = vmatmul.mubr.f32.gmra.mxu1 %v2224_v37  ;;  %2592 = vmatprep.mubr.f32.mxu0 %v2227_v38 }
 0x351   : > { %2977 = vmatprep.mubr.f32.mxu1 %v2229_v39 }
 0x353   : > { %2593 = vmatmul.mubr.f32.gmra.mxu0 %v2226_v42 }
 0x354   : > { %2978 = vmatmul.mubr.f32.gmra.mxu1 %v2228_v43  ;;  %2597 = vmatprep.mubr.f32.mxu0 %v2231_v44  ;;  %v2255_v44 = vunpack.c.h.bf16 %v1953_v36 }
 0x355   : > { %2982 = vmatprep.mubr.f32.mxu1 %v2233_v45  ;;  %v2257_v45 = vunpack.c.h.bf16 %v1954_v10 }
 0x357   : > { %2598 = vmatmul.mubr.f32.gmra.mxu0 %v2230_v48 }
 0x358   : > { %2983 = vmatmul.mubr.f32.gmra.mxu1 %v2232_v49  ;;  %2602 = vmatprep.mubr.f32.mxu0 %v2235_v50  ;;  %v1955_v49 = vld [vmem:[#allocation6 + $0x360] sm:$0xff]  ;;  %v1956_v50 = vld [vmem:[#allocation6 + $0x368] sm:$0xff] }
 0x359   : > { %2987 = vmatprep.mubr.f32.mxu1 %v2237_v51  ;;  %v2259_v58 = vunpack.c.h.bf16 %v1955_v49  ;;  %v2261_v59 = vunpack.c.h.bf16 %v1956_v50  ;;  %v2260_v8 = vunpack.c.l.bf16 %v1956_v50  ;;  %v1964_v50 = vld [vmem:[#allocation6 + $0x3a8] sm:$0xff] }
 0x35b   : > { %v2364_v60 = vpop.f32.mrf.mxu0  ;;  %2603 = vmatmul.mubr.f32.gmra.mxu0 %v2234_v54  ;;  %v2254_v54 = vunpack.c.l.bf16 %v1953_v36 }
 0x35c   : > { %v2749_v61 = vpop.f32.mrf.mxu1  ;;  %2988 = vmatmul.mubr.f32.gmra.mxu1 %v2236_v55  ;;  %2607 = vmatprep.mubr.f32.mxu0 %v2239_v56  ;;  %v2256_v55 = vunpack.c.l.bf16 %v1954_v10 }
 0x35d   : > { %v5973_v1 = vadd.f32 %v2749_v61, %v2364_v60  ;;  %2992 = vmatprep.mubr.f32.mxu1 %v2241_v57  ;;  %v2366_v5 = vpop.f32.mrf.mxu0  ;;  %v3073_v60 = vld [vmem:[#allocation3 + $0x50] sm:$0xff] }
 0x35e   : > { %v2751_v7 = vpop.f32.mrf.mxu1 }
 0x35f   : > { %7385 = vst [vmem:[#allocation13_spill] sm:$0xff] %v5973_v1  ;;  %v3135_v11 = vmul.f32 %v5971_v62, %v5973_v1  ;;  %v2369_v6 = vpop.f32.mrf.mxu0  ;;  %2608 = vmatmul.mubr.f32.gmra.mxu0 %v2238_v63  ;;  %v2258_v7 = vunpack.c.l.bf16 %v1955_v49  ;;  %v1963_v49 = vld [vmem:[#allocation6 + $0x3a0] sm:$0xff] }
 0x360   : > { %v2754_v13 = vpop.f32.mrf.mxu1  ;;  %2993 = vmatmul.mubr.f32.gmra.mxu1 %v2240_v0  ;;  %2612 = vmatprep.mubr.f32.mxu0 %v2243_v2  ;;  %v1957_v0 = vld [vmem:[#allocation6 + $0x370] sm:$0xff]  ;;  %v1958_v2 = vld [vmem:[#allocation6 + $0x378] sm:$0xff] }
 0x361   : > { %v5977_v16 = vadd.f32 %v3135_v11, %v3069_v4  ;;  %v5979_v12 = vadd.f32 %v2754_v13, %v2369_v6  ;;  %2997 = vmatprep.mubr.f32.mxu1 %v2245_v3  ;;  %v2371_v22 = vpop.f32.mrf.mxu0  ;;  %v2263_v6 = vunpack.c.h.bf16 %v1957_v0  ;;  %v2265_v13 = vunpack.c.h.bf16 %v1958_v2 }
 0x362   : > { %v2756_v23 = vpop.f32.mrf.mxu1  ;;  %v2262_v25 = vunpack.c.l.bf16 %v1957_v0 }
 0x363   : > { %7386 = vst [vmem:[#allocation14_spill] sm:$0xff] %v5979_v12  ;;  %v3136_v26 = vmul.f32 %v5971_v62, %v5979_v12  ;;  %v2374_v27 = vpop.f32.mrf.mxu0  ;;  %2613 = vmatmul.mubr.f32.gmra.mxu0 %v2242_v14  ;;  %v3074_v14 = vld [vmem:[#allocation3 + $0x168] sm:$0xff] }
 0x364   : > { %v2759_v28 = vpop.f32.mrf.mxu1  ;;  %2998 = vmatmul.mubr.f32.gmra.mxu1 %v2244_v15  ;;  %2617 = vmatprep.mubr.f32.mxu0 %v2247_v19 }
 0x365   : > { %v5983_v31 = vadd.f32 %v3136_v26, %v3070_v21  ;;  %v5985_v32 = vadd.f32 %v2759_v28, %v2374_v27  ;;  %3002 = vmatprep.mubr.f32.mxu1 %v2249_v20  ;;  %v2376_v34 = vpop.f32.mrf.mxu0  ;;  %v1959_v20 = vld [vmem:[#allocation6 + $0x380] sm:$0xff]  ;;  %v1960_v21 = vld [vmem:[#allocation6 + $0x388] sm:$0xff]  ;;  %v2264_v26 = vunpack.c.l.bf16 %v1958_v2 }
 0x366   : > { %v2761_v35 = vpop.f32.mrf.mxu1  ;;  %v1961_v34 = vld [vmem:[#allocation6 + $0x390] sm:$0xff] }
 0x367   : > { %7387 = vst [vmem:[#allocation15_spill] sm:$0xff] %v5985_v32  ;;  %v3137_v37 = vmul.f32 %v5971_v62, %v5985_v32  ;;  %v2379_v38 = vpop.f32.mrf.mxu0  ;;  %2618 = vmatmul.mubr.f32.gmra.mxu0 %v2246_v29  ;;  %v2267_v29 = vunpack.c.h.bf16 %v1959_v20  ;;  %v1962_v35 = vld [vmem:[#allocation6 + $0x398] sm:$0xff] }
 0x368   : > { %v2764_v39 = vpop.f32.mrf.mxu1  ;;  %3003 = vmatmul.mubr.f32.gmra.mxu1 %v2248_v30  ;;  %2622 = vmatprep.mubr.f32.mxu0 %v2251_v17  ;;  %v2269_v30 = vunpack.c.h.bf16 %v1960_v21  ;;  %v3075_v17 = vld [vmem:[#allocation3 + $0x130] sm:$0xff] }
 0x369   : > { %v5989_v42 = vadd.f32 %v3137_v37, %v3071_v33  ;;  %v5991_v43 = vadd.f32 %v2764_v39, %v2379_v38  ;;  %3007 = vmatprep.mubr.f32.mxu1 %v2253_v18  ;;  %v2381_v47 = vpop.f32.mrf.mxu0  ;;  %v2266_v38 = vunpack.c.l.bf16 %v1959_v20  ;;  %v2268_v39 = vunpack.c.l.bf16 %v1960_v21  ;;  %v3078_v21 = vld [vmem:[#allocation3 + $0x110] sm:$0xff] }
 0x36a   : > { %v2766_v48 = vpop.f32.mrf.mxu1 }
 0x36b   : > { %7388 = vst [vmem:[#allocation16_spill] sm:$0xff] %v5991_v43  ;;  %v3138_v51 = vmul.f32 %v5971_v62, %v5991_v43  ;;  %v2384_v52 = vpop.f32.mrf.mxu0  ;;  %2623 = vmatmul.mubr.f32.gmra.mxu0 %v2250_v40 }
 0x36c   : > { %v2769_v53 = vpop.f32.mrf.mxu1  ;;  %3008 = vmatmul.mubr.f32.gmra.mxu1 %v2252_v41  ;;  %2627 = vmatprep.mubr.f32.mxu0 %v2255_v44  ;;  %v2271_v44 = vunpack.c.h.bf16 %v1961_v34 }
 0x36d   : > { %v5995_v56 = vadd.f32 %v3138_v51, %v3072_v46  ;;  %v5997_v57 = vadd.f32 %v2769_v53, %v2384_v52  ;;  %3012 = vmatprep.mubr.f32.mxu1 %v2257_v45  ;;  %v2386_v61 = vpop.f32.mrf.mxu0  ;;  %v2273_v45 = vunpack.c.h.bf16 %v1962_v35  ;;  %v3076_v46 = vld [vmem:[#allocation3 + $0x48] sm:$0xff] }
 0x36e   : > { %v2771_v63 = vpop.f32.mrf.mxu1  ;;  %v2277_v61 = vunpack.c.h.bf16 %v1964_v50 }
 0x36f   : > { %7389 = vst [vmem:[#allocation17_spill] sm:$0xff] %v5997_v57  ;;  %v3139_v3 = vmul.f32 %v5971_v62, %v5997_v57  ;;  %v2389_v4 = vpop.f32.mrf.mxu0  ;;  %2628 = vmatmul.mubr.f32.gmra.mxu0 %v2254_v54  ;;  %v2270_v54 = vunpack.c.l.bf16 %v1961_v34  ;;  %v3077_v63 = vld [vmem:[#allocation3 + $0x180] sm:$0xff] }
 0x370   : > { %v2774_v5 = vpop.f32.mrf.mxu1  ;;  %3013 = vmatmul.mubr.f32.gmra.mxu1 %v2256_v55  ;;  %2632 = vmatprep.mubr.f32.mxu0 %v2259_v58  ;;  %v2272_v55 = vunpack.c.l.bf16 %v1962_v35 }
 0x371   : > { %v6001_v9 = vadd.f32 %v3139_v3, %v3073_v60  ;;  %v6003_v11 = vadd.f32 %v2774_v5, %v2389_v4  ;;  %3017 = vmatprep.mubr.f32.mxu1 %v2261_v59  ;;  %v2391_v15 = vpop.f32.mrf.mxu0  ;;  %v2275_v60 = vunpack.c.h.bf16 %v1963_v49  ;;  %v1965_v3 = vld [vmem:[#allocation6 + $0x3b0] sm:$0xff]  ;;  %v1966_v4 = vld [vmem:[#allocation6 + $0x3b8] sm:$0xff] }
 0x372   : > { %v2776_v19 = vpop.f32.mrf.mxu1  ;;  %v2281_v20 = vunpack.c.h.bf16 %v1966_v4 }
 0x373   : > { %7390 = vst [vmem:[#allocation18_spill] sm:$0xff] %v6003_v11  ;;  %v3140_v22 = vmul.f32 %v5971_v62, %v6003_v11  ;;  %v2394_v23 = vpop.f32.mrf.mxu0  ;;  %2633 = vmatmul.mubr.f32.gmra.mxu0 %v2258_v7  ;;  %v2279_v19 = vunpack.c.h.bf16 %v1965_v3 }
 0x374   : > { %v2779_v24 = vpop.f32.mrf.mxu1  ;;  %3018 = vmatmul.mubr.f32.gmra.mxu1 %v2260_v8  ;;  %2637 = vmatprep.mubr.f32.mxu0 %v2263_v6  ;;  %v2274_v6 = vunpack.c.l.bf16 %v1963_v49 }
 0x375   : > { %v6007_v27 = vadd.f32 %v3140_v22, %v3074_v14  ;;  %v6009_v28 = vadd.f32 %v2779_v24, %v2394_v23  ;;  %3022 = vmatprep.mubr.f32.mxu1 %v2265_v13  ;;  %v2396_v18 = vpop.f32.mrf.mxu0  ;;  %v2276_v13 = vunpack.c.l.bf16 %v1964_v50  ;;  %v1967_v24 = vld [vmem:[#allocation6 + $0x3c0] sm:$0xff] }
 0x376   : > { %v2781_v33 = vpop.f32.mrf.mxu1  ;;  %v2280_v18 = vunpack.c.l.bf16 %v1966_v4  ;;  %v2283_v35 = vunpack.c.h.bf16 %v1967_v24 }
 0x377   : > { %7391 = vst [vmem:[#allocation19_spill] sm:$0xff] %v6009_v28  ;;  %v3141_v36 = vmul.f32 %v5971_v62, %v6009_v28  ;;  %v2399_v10 = vpop.f32.mrf.mxu0  ;;  %2638 = vmatmul.mubr.f32.gmra.mxu0 %v2262_v25  ;;  %v1968_v25 = vld [vmem:[#allocation6 + $0x3c8] sm:$0xff] }
 0x378   : > { %v2784_v37 = vpop.f32.mrf.mxu1  ;;  %3023 = vmatmul.mubr.f32.gmra.mxu1 %v2264_v26  ;;  %2642 = vmatprep.mubr.f32.mxu0 %v2267_v29  ;;  %v2284_v49 = vunpack.c.l.bf16 %v1968_v25 }
 0x379   : > { %v6013_v40 = vadd.f32 %v3141_v36, %v3075_v17  ;;  %v6015_v41 = vadd.f32 %v2784_v37, %v2399_v10  ;;  %3027 = vmatprep.mubr.f32.mxu1 %v2269_v30  ;;  %v2401_v47 = vpop.f32.mrf.mxu0  ;;  %v2278_v17 = vunpack.c.l.bf16 %v1965_v3  ;;  %v2285_v36 = vunpack.c.h.bf16 %v1968_v25  ;;  %v3079_v10 = vld [vmem:[#allocation3 + $0x118] sm:$0xff] }
 0x37a   : > { %v2786_v48 = vpop.f32.mrf.mxu1 }
 0x37b   : > { %7392 = vst [vmem:[#allocation20_spill] sm:$0xff] %v6015_v41  ;;  %v3142_v51 = vmul.f32 %v5971_v62, %v6015_v41  ;;  %v2404_v52 = vpop.f32.mrf.mxu0  ;;  %2643 = vmatmul.mubr.f32.gmra.mxu0 %v2266_v38  ;;  %v2282_v48 = vunpack.c.l.bf16 %v1967_v24 }
 0x37c   : > { %v2789_v53 = vpop.f32.mrf.mxu1  ;;  %3028 = vmatmul.mubr.f32.gmra.mxu1 %v2268_v39  ;;  %2647 = vmatprep.mubr.f32.mxu0 %v2271_v44  ;;  %v1969_v39 = vld [vmem:[#allocation6 + $0x3d0] sm:$0xff]  ;;  %v1970_v44 = vld [vmem:[#allocation6 + $0x3d8] sm:$0xff] }
 0x37d   : > { %v6019_v58 = vadd.f32 %v3142_v51, %v3076_v46  ;;  %v6021_v59 = vadd.f32 %v2789_v53, %v2404_v52  ;;  %3032 = vmatprep.mubr.f32.mxu1 %v2273_v45  ;;  %v2406_v0 = vpop.f32.mrf.mxu0  ;;  %v2287_v52 = vunpack.c.h.bf16 %v1969_v39  ;;  %v2289_v53 = vunpack.c.h.bf16 %v1970_v44 }
 0x37e   : > { %v2791_v2 = vpop.f32.mrf.mxu1  ;;  %v2286_v4 = vunpack.c.l.bf16 %v1969_v39 }
 0x37f   : > { %7393 = vst [vmem:[#allocation21_spill] sm:$0xff] %v6021_v59  ;;  %v3143_v5 = vmul.f32 %v5971_v62, %v6021_v59  ;;  %v2409_v7 = vpop.f32.mrf.mxu0  ;;  %2648 = vmatmul.mubr.f32.gmra.mxu0 %v2270_v54  ;;  %v3080_v54 = vld [vmem:[#allocation3 + $0x98] sm:$0xff] }
 0x380   : > { %v2794_v8 = vpop.f32.mrf.mxu1  ;;  %3033 = vmatmul.mubr.f32.gmra.mxu1 %v2272_v55  ;;  %2652 = vmatprep.mubr.f32.mxu0 %v2275_v60 }
 0x381   : > { %v6025_v14 = vadd.f32 %v3143_v5, %v3077_v63  ;;  %v6027_v15 = vadd.f32 %v2794_v8, %v2409_v7  ;;  %3037 = vmatprep.mubr.f32.mxu1 %v2277_v61  ;;  %v2411_v22 = vpop.f32.mrf.mxu0  ;;  %v1971_v61 = vld [vmem:[#allocation6 + $0x3e0] sm:$0xff]  ;;  %v1972_v63 = vld [vmem:[#allocation6 + $0x3e8] sm:$0xff]  ;;  %v2288_v5 = vunpack.c.l.bf16 %v1970_v44 }
 0x382   : > { %v2796_v23 = vpop.f32.mrf.mxu1  ;;  %v1973_v22 = vld [vmem:[#allocation6 + $0x3f0] sm:$0xff] }
 0x383   : > { %7394 = vst [vmem:[#allocation22_spill] sm:$0xff] %v6027_v15  ;;  %v3144_v26 = vmul.f32 %v5971_v62, %v6027_v15  ;;  %v2414_v29 = vpop.f32.mrf.mxu0  ;;  %2653 = vmatmul.mubr.f32.gmra.mxu0 %v2274_v6  ;;  %v2291_v6 = vunpack.c.h.bf16 %v1971_v61  ;;  %v1974_v23 = vld [vmem:[#allocation6 + $0x3f8] sm:$0xff] }
 0x384   : > { %v2799_v30 = vpop.f32.mrf.mxu1  ;;  %3038 = vmatmul.mubr.f32.gmra.mxu1 %v2276_v13  ;;  %2657 = vmatprep.mubr.f32.mxu0 %v2279_v19  ;;  %v2293_v13 = vunpack.c.h.bf16 %v1972_v63  ;;  %v3081_v19 = vld [vmem:[#allocation3 + $0x120] sm:$0xff] }
 0x385   : > { %v6031_v33 = vadd.f32 %v3144_v26, %v3078_v21  ;;  %v6033_v34 = vadd.f32 %v2799_v30, %v2414_v29  ;;  %3042 = vmatprep.mubr.f32.mxu1 %v2281_v20  ;;  %v2416_v37 = vpop.f32.mrf.mxu0  ;;  %v2290_v29 = vunpack.c.l.bf16 %v1971_v61  ;;  %v2292_v30 = vunpack.c.l.bf16 %v1972_v63 }
 0x386   : > { %v2801_v38 = vpop.f32.mrf.mxu1 }
 0x387   : > { %7395 = vst [vmem:[#allocation23_spill] sm:$0xff] %v6033_v34  ;;  %v3145_v45 = vmul.f32 %v5971_v62, %v6033_v34  ;;  %v2419_v46 = vpop.f32.mrf.mxu0  ;;  %2658 = vmatmul.mubr.f32.gmra.mxu0 %v2278_v17 }
 0x388   : > { %v2804_v47 = vpop.f32.mrf.mxu1  ;;  %3043 = vmatmul.mubr.f32.gmra.mxu1 %v2280_v18  ;;  %2662 = vmatprep.mubr.f32.mxu0 %v2283_v35  ;;  %v2295_v35 = vunpack.c.h.bf16 %v1973_v22 }
 0x389   : > { %v6037_v50 = vadd.f32 %v3145_v45, %v3079_v10  ;;  %v6039_v51 = vadd.f32 %v2804_v47, %v2419_v46  ;;  %3047 = vmatprep.mubr.f32.mxu1 %v2285_v36  ;;  %v2421_v55 = vpop.f32.mrf.mxu0  ;;  %v2297_v36 = vunpack.c.h.bf16 %v1974_v23  ;;  %v3082_v10 = vld [vmem:[#allocation3 + $0x150] sm:$0xff]  ;;  %v2294_v46 = vunpack.c.l.bf16 %v1973_v22 }
 0x38a   : > { %v2806_v60 = vpop.f32.mrf.mxu1  ;;  %v2296_v47 = vunpack.c.l.bf16 %v1974_v23 }
 0x38b   : > { %7396 = vst [vmem:[#allocation24_spill] sm:$0xff] %v6039_v51  ;;  %v3146_v0 = vmul.f32 %v5971_v62, %v6039_v51  ;;  %v2424_v2 = vpop.f32.mrf.mxu0  ;;  %2663 = vmatmul.mubr.f32.gmra.mxu0 %v2282_v48 }
 0x38c   : > { %v2809_v3 = vpop.f32.mrf.mxu1  ;;  %3048 = vmatmul.mubr.f32.gmra.mxu1 %v2284_v49  ;;  %2667 = vmatprep.mubr.f32.mxu0 %v2287_v52  ;;  %v3083_v52 = vld [vmem:[#allocation3 + $0x108] sm:$0xff] }
 0x38d   : > { %v6043_v7 = vadd.f32 %v3146_v0, %v3080_v54  ;;  %v6045_v8 = vadd.f32 %v2809_v3, %v2424_v2  ;;  %3052 = vmatprep.mubr.f32.mxu1 %v2289_v53  ;;  %v2426_v20 = vpop.f32.mrf.mxu0  ;;  %v3084_v2 = vld [vmem:[#allocation3 + $0x60] sm:$0xff] }
 0x38e   : > { %v2811_v21 = vpop.f32.mrf.mxu1 }
 0x38f   : > { %7397 = vst [vmem:[#allocation25_spill] sm:$0xff] %v6045_v8  ;;  %v3147_v24 = vmul.f32 %v5971_v62, %v6045_v8  ;;  %v2429_v25 = vpop.f32.mrf.mxu0  ;;  %2668 = vmatmul.mubr.f32.gmra.mxu0 %v2286_v4  ;;  %v3085_v21 = vld [vmem:[#allocation3 + $0xe0] sm:$0xff] }
 0x390   : > { %v2814_v26 = vpop.f32.mrf.mxu1  ;;  %3053 = vmatmul.mubr.f32.gmra.mxu1 %v2288_v5  ;;  %2672 = vmatprep.mubr.f32.mxu0 %v2291_v6 }
 0x391   : > { %v6049_v17 = vadd.f32 %v3147_v24, %v3081_v19  ;;  %v6051_v18 = vadd.f32 %v2814_v26, %v2429_v25  ;;  %3057 = vmatprep.mubr.f32.mxu1 %v2293_v13  ;;  %v2431_v37 = vpop.f32.mrf.mxu0 }
 0x392   : > { %v2816_v38 = vpop.f32.mrf.mxu1 }
 0x393   : > { %7398 = vst [vmem:[#allocation26_spill] sm:$0xff] %v6051_v18  ;;  %v3148_v39 = vmul.f32 %v5971_v62, %v6051_v18  ;;  %v2434_v44 = vpop.f32.mrf.mxu0  ;;  %2673 = vmatmul.mubr.f32.gmra.mxu0 %v2290_v29 }
 0x394   : > { %v2819_v45 = vpop.f32.mrf.mxu1  ;;  %3058 = vmatmul.mubr.f32.gmra.mxu1 %v2292_v30  ;;  %2677 = vmatprep.mubr.f32.mxu0 %v2295_v35  ;;  %v3086_v35 = vld [vmem:[#allocation3 + $0x188] sm:$0xff] }
 0x395   : > { %v6055_v48 = vadd.f32 %v3148_v39, %v3082_v10  ;;  %v6057_v49 = vadd.f32 %v2819_v45, %v2434_v44  ;;  %3062 = vmatprep.mubr.f32.mxu1 %v2297_v36  ;;  %v2436_v53 = vpop.f32.mrf.mxu0 }
 0x396   : > { %v2821_v54 = vpop.f32.mrf.mxu1 }
 0x397   : > { %7399 = vst [vmem:[#allocation27_spill] sm:$0xff] %v6057_v49  ;;  %v3149_v55 = vmul.f32 %v5971_v62, %v6057_v49  ;;  %v2439_v60 = vpop.f32.mrf.mxu0  ;;  %2678 = vmatmul.mubr.f32.gmra.mxu0 %v2294_v46  ;;  %v3087_v46 = vld [vmem:[#allocation3 + $0x138] sm:$0xff] }
 0x398   : > { %v2824_v61 = vpop.f32.mrf.mxu1  ;;  %3063 = vmatmul.mubr.f32.gmra.mxu1 %v2296_v47 }
 0x399   : > { %v6061_v63 = vadd.f32 %v3149_v55, %v3083_v52  ;;  %v6063_v0 = vadd.f32 %v2824_v61, %v2439_v60  ;;  %v2441_v3 = vpop.f32.mrf.mxu0 }
 0x39a   : > { %v2826_v4 = vpop.f32.mrf.mxu1 }
 0x39b   : > { %7400 = vst [vmem:[#allocation28_spill] sm:$0xff] %v6063_v0  ;;  %v3150_v5 = vmul.f32 %v5971_v62, %v6063_v0  ;;  %v2444_v6 = vpop.f32.mrf.mxu0 }
 0x39c   : > { %v2829_v13 = vpop.f32.mrf.mxu1 }
 0x39d   : > { %v6067_v19 = vadd.f32 %v3150_v5, %v3084_v2  ;;  %v6069_v20 = vadd.f32 %v2829_v13, %v2444_v6  ;;  %v2446_v22 = vpop.f32.mrf.mxu0  ;;  %v3088_v2 = vld [vmem:[#allocation3 + $0x140] sm:$0xff] }
 0x39e   : > { %v2831_v23 = vpop.f32.mrf.mxu1 }
 0x39f   : > { %7401 = vst [vmem:[#allocation29_spill] sm:$0xff] %v6069_v20  ;;  %v3151_v24 = vmul.f32 %v5971_v62, %v6069_v20  ;;  %v2449_v25 = vpop.f32.mrf.mxu0  ;;  %v3089_v23 = vld [vmem:[#allocation3 + $0x80] sm:$0xff] }
 0x3a0   : > { %v2834_v26 = vpop.f32.mrf.mxu1 }
 0x3a1   : > { %v6073_v29 = vadd.f32 %v3151_v24, %v3085_v21  ;;  %v6075_v30 = vadd.f32 %v2834_v26, %v2449_v25  ;;  %v2451_v36 = vpop.f32.mrf.mxu0 }
 0x3a2   : > { %v2836_v10 = vpop.f32.mrf.mxu1 }
 0x3a3   : > { %7402 = vst [vmem:[#allocation30_spill] sm:$0xff] %v6075_v30  ;;  %v3152_v37 = vmul.f32 %v5971_v62, %v6075_v30  ;;  %v2454_v38 = vpop.f32.mrf.mxu0 }
 0x3a4   : > { %v2839_v39 = vpop.f32.mrf.mxu1 }
 0x3a5   : > { %v6079_v44 = vadd.f32 %v3152_v37, %v3086_v35  ;;  %v6081_v45 = vadd.f32 %v2839_v39, %v2454_v38  ;;  %v2456_v47 = vpop.f32.mrf.mxu0  ;;  %v3090_v38 = vld [vmem:[#allocation3 + $0x1a8] sm:$0xff] }
 0x3a6   : > { %v2841_v52 = vpop.f32.mrf.mxu1 }
 0x3a7   : > { %7403 = vst [vmem:[#allocation31_spill] sm:$0xff] %v6081_v45  ;;  %v3153_v53 = vmul.f32 %v5971_v62, %v6081_v45  ;;  %v2459_v54 = vpop.f32.mrf.mxu0 }
 0x3a8   : > { %v2844_v55 = vpop.f32.mrf.mxu1 }
 0x3a9   : > { %v6085_v60 = vadd.f32 %v3153_v53, %v3087_v46  ;;  %v6087_v61 = vadd.f32 %v2844_v55, %v2459_v54  ;;  %v2461_v3 = vpop.f32.mrf.mxu0 }
 0x3aa   : > { %v2846_v4 = vpop.f32.mrf.mxu1 }
 0x3ab   : > { %7404 = vst [vmem:[#allocation32_spill] sm:$0xff] %v6087_v61  ;;  %v3154_v5 = vmul.f32 %v5971_v62, %v6087_v61  ;;  %v2464_v6 = vpop.f32.mrf.mxu0 }
 0x3ac   : > { %v2849_v13 = vpop.f32.mrf.mxu1 }
 0x3ad   : > { %v6091_v21 = vadd.f32 %v3154_v5, %v3088_v2  ;;  %v6093_v22 = vadd.f32 %v2849_v13, %v2464_v6  ;;  %v2466_v24 = vpop.f32.mrf.mxu0  ;;  %v3091_v2 = vld [vmem:[#allocation3 + $0x1b8] sm:$0xff] }
 0x3ae   : > { %v2851_v25 = vpop.f32.mrf.mxu1 }
 0x3af   : > { %7405 = vst [vmem:[#allocation33_spill] sm:$0xff] %v6093_v22  ;;  %v3155_v26 = vmul.f32 %v5971_v62, %v6093_v22  ;;  %v2469_v35 = vpop.f32.mrf.mxu0  ;;  %v3092_v25 = vld [vmem:[#allocation3 + $0x28] sm:$0xff] }
 0x3b0   : > { %v2854_v36 = vpop.f32.mrf.mxu1 }
 0x3b1   : > { %v6097_v10 = vadd.f32 %v3155_v26, %v3089_v23  ;;  %v6099_v37 = vadd.f32 %v2854_v36, %v2469_v35  ;;  %v2471_v39 = vpop.f32.mrf.mxu0 }
 0x3b2   : > { %v2856_v46 = vpop.f32.mrf.mxu1 }
 0x3b3   : > { %7406 = vst [vmem:[#allocation34_spill] sm:$0xff] %v6099_v37  ;;  %v3156_v47 = vmul.f32 %v5971_v62, %v6099_v37  ;;  %v2474_v52 = vpop.f32.mrf.mxu0 }
 0x3b4   : > { %v2859_v53 = vpop.f32.mrf.mxu1 }
 0x3b5   : > { %v6103_v54 = vadd.f32 %v3156_v47, %v3090_v38  ;;  %v6105_v55 = vadd.f32 %v2859_v53, %v2474_v52  ;;  %v2476_v3 = vpop.f32.mrf.mxu0  ;;  %v3093_v52 = vld [vmem:[#allocation3 + $0x1e8] sm:$0xff] }
 0x3b6   : > { %v2861_v4 = vpop.f32.mrf.mxu1 }
 0x3b7   : > { %7407 = vst [vmem:[#allocation35_spill] sm:$0xff] %v6105_v55  ;;  %v3157_v5 = vmul.f32 %v5971_v62, %v6105_v55  ;;  %v2479_v6 = vpop.f32.mrf.mxu0 }
 0x3b8   : > { %v2864_v13 = vpop.f32.mrf.mxu1 }
 0x3b9   : > { %v6109_v23 = vadd.f32 %v3157_v5, %v3091_v2  ;;  %v6111_v24 = vadd.f32 %v2864_v13, %v2479_v6  ;;  %v2481_v26 = vpop.f32.mrf.mxu0 }
 0x3ba   : > { %v2866_v35 = vpop.f32.mrf.mxu1  ;;  %v3094_v26 = vld [vmem:[#allocation3 + $0xf8] sm:$0xff] }
 0x3bb   : > { %7408 = vst [vmem:[#allocation36_spill] sm:$0xff] %v6111_v24  ;;  %v3158_v36 = vmul.f32 %v5971_v62, %v6111_v24  ;;  %v2484_v38 = vpop.f32.mrf.mxu0 }
 0x3bc   : > { %v2869_v39 = vpop.f32.mrf.mxu1 }
 0x3bd   : > { %v6115_v46 = vadd.f32 %v3158_v36, %v3092_v25  ;;  %v6117_v47 = vadd.f32 %v2869_v39, %v2484_v38  ;;  %v2486_v53 = vpop.f32.mrf.mxu0 }
 0x3be   : > { %v2871_v3 = vpop.f32.mrf.mxu1 }
 0x3bf   : > { %7409 = vst [vmem:[#allocation37_spill] sm:$0xff] %v6117_v47  ;;  %v3159_v2 = vmul.f32 %v5971_v62, %v6117_v47  ;;  %v2489_v4 = vpop.f32.mrf.mxu0  ;;  %v3095_v3 = vld [vmem:[#allocation3 + $0x160] sm:$0xff] }
 0x3c0   : > { %v2874_v5 = vpop.f32.mrf.mxu1 }
 0x3c1   : > { %v6121_v6 = vadd.f32 %v3159_v2, %v3093_v52  ;;  %v6123_v13 = vadd.f32 %v2874_v5, %v2489_v4  ;;  %v2491_v35 = vpop.f32.mrf.mxu0 }
 0x3c2   : > { %v2876_v24 = vpop.f32.mrf.mxu1  ;;  %v3096_v35 = vld [vmem:[#allocation3 + $0x30] sm:$0xff] }
 0x3c3   : > { %7410 = vst [vmem:[#allocation38_spill] sm:$0xff] %v6123_v13  ;;  %v3160_v25 = vmul.f32 %v5971_v62, %v6123_v13  ;;  %v2494_v36 = vpop.f32.mrf.mxu0 }
 0x3c4   : > { %v2879_v38 = vpop.f32.mrf.mxu1 }
 0x3c5   : > { %v6127_v39 = vadd.f32 %v3160_v25, %v3094_v26  ;;  %v6129_v53 = vadd.f32 %v2879_v38, %v2494_v36  ;;  %v2496_v47 = vpop.f32.mrf.mxu0 }
 0x3c6   : > { %v2881_v55 = vpop.f32.mrf.mxu1  ;;  %v3097_v47 = vld [vmem:[#allocation3 + $0x1e0] sm:$0xff] }
 0x3c7   : > { %7411 = vst [vmem:[#allocation39_spill] sm:$0xff] %v6129_v53  ;;  %v3161_v52 = vmul.f32 %v5971_v62, %v6129_v53  ;;  %v2499_v2 = vpop.f32.mrf.mxu0 }
 0x3c8   : > { %v2884_v4 = vpop.f32.mrf.mxu1 }
 0x3c9   : > { %v6133_v5 = vadd.f32 %v3161_v52, %v3095_v3  ;;  %v6135_v24 = vadd.f32 %v2884_v4, %v2499_v2  ;;  %v2501_v13 = vpop.f32.mrf.mxu0 }
 0x3ca   : > { %v2886_v37 = vpop.f32.mrf.mxu1  ;;  %v3098_v13 = vld [vmem:[#allocation3] sm:$0xff] }
 0x3cb   : > { %7412 = vst [vmem:[#allocation40_spill] sm:$0xff] %v6135_v24  ;;  %v3162_v26 = vmul.f32 %v5971_v62, %v6135_v24  ;;  %v2504_v25 = vpop.f32.mrf.mxu0 }
 0x3cc   : > { %v2889_v36 = vpop.f32.mrf.mxu1 }
 0x3cd   : > { %v6139_v38 = vadd.f32 %v3162_v26, %v3096_v35  ;;  %v6141_v55 = vadd.f32 %v2889_v36, %v2504_v25  ;;  %v2506_v53 = vpop.f32.mrf.mxu0 }
 0x3ce   : > { %v2891_v22 = vpop.f32.mrf.mxu1  ;;  %v3099_v53 = vld [vmem:[#allocation3 + $0xf0] sm:$0xff] }
 0x3cf   : > { %7413 = vst [vmem:[#allocation41_spill] sm:$0xff] %v6141_v55  ;;  %v3163_v3 = vmul.f32 %v5971_v62, %v6141_v55  ;;  %v2509_v52 = vpop.f32.mrf.mxu0 }
 0x3d0   : > { %v2894_v2 = vpop.f32.mrf.mxu1 }
 0x3d1   : > { %v6145_v4 = vadd.f32 %v3163_v3, %v3097_v47  ;;  %v6147_v37 = vadd.f32 %v2894_v2, %v2509_v52  ;;  %v2511_v24 = vpop.f32.mrf.mxu0 }
 0x3d2   : > { %v2896_v61 = vpop.f32.mrf.mxu1  ;;  %v3100_v24 = vld [vmem:[#allocation3 + $0x8] sm:$0xff] }
 0x3d3   : > { %7414 = vst [vmem:[#allocation42_spill] sm:$0xff] %v6147_v37  ;;  %v3164_v35 = vmul.f32 %v5971_v62, %v6147_v37  ;;  %v2514_v26 = vpop.f32.mrf.mxu0 }
 0x3d4   : > { %v2899_v25 = vpop.f32.mrf.mxu1 }
 0x3d5   : > { %v6151_v36 = vadd.f32 %v3164_v35, %v3098_v13  ;;  %v6153_v22 = vadd.f32 %v2899_v25, %v2514_v26  ;;  %v2516_v55 = vpop.f32.mrf.mxu0 }
 0x3d6   : > { %v2901_v45 = vpop.f32.mrf.mxu1  ;;  %v3101_v55 = vld [vmem:[#allocation3 + $0x148] sm:$0xff] }
 0x3d7   : > { %7415 = vst [vmem:[#allocation43_spill] sm:$0xff] %v6153_v22  ;;  %v3165_v47 = vmul.f32 %v5971_v62, %v6153_v22  ;;  %v2519_v3 = vpop.f32.mrf.mxu0 }
 0x3d8   : > { %v2904_v52 = vpop.f32.mrf.mxu1 }
 0x3d9   : > { %v6157_v2 = vadd.f32 %v3165_v47, %v3099_v53  ;;  %v6159_v61 = vadd.f32 %v2904_v52, %v2519_v3  ;;  %v2521_v37 = vpop.f32.mrf.mxu0 }
 0x3da   : > { %v2906_v30 = vpop.f32.mrf.mxu1  ;;  %v3102_v37 = vld [vmem:[#allocation3 + $0x1d0] sm:$0xff] }
 0x3db   : > { %7416 = vst [vmem:[#allocation44_spill] sm:$0xff] %v6159_v61  ;;  %v3166_v13 = vmul.f32 %v5971_v62, %v6159_v61  ;;  %v2524_v35 = vpop.f32.mrf.mxu0 }
 0x3dc   : > { %v2909_v26 = vpop.f32.mrf.mxu1 }
 0x3dd   : > { %v6163_v25 = vadd.f32 %v3166_v13, %v3100_v24  ;;  %v6165_v45 = vadd.f32 %v2909_v26, %v2524_v35  ;;  %v2526_v22 = vpop.f32.mrf.mxu0 }
 0x3de   : > { %v2911_v20 = vpop.f32.mrf.mxu1  ;;  %v3103_v22 = vld [vmem:[#allocation3 + $0x100] sm:$0xff] }
 0x3df   : > { %7417 = vst [vmem:[#allocation45_spill] sm:$0xff] %v6165_v45  ;;  %v3167_v53 = vmul.f32 %v5971_v62, %v6165_v45  ;;  %v2529_v47 = vpop.f32.mrf.mxu0 }
 0x3e0   : > { %v2914_v3 = vpop.f32.mrf.mxu1 }
 0x3e1   : > { %v6169_v52 = vadd.f32 %v3167_v53, %v3101_v55  ;;  %v6171_v30 = vadd.f32 %v2914_v3, %v2529_v47  ;;  %v2531_v61 = vpop.f32.mrf.mxu0 }
 0x3e2   : > { %v2916_v0 = vpop.f32.mrf.mxu1  ;;  %v3104_v61 = vld [vmem:[#allocation3 + $0xc8] sm:$0xff] }
 0x3e3   : > { %7418 = vst [vmem:[#allocation46_spill] sm:$0xff] %v6171_v30  ;;  %v3168_v24 = vmul.f32 %v5971_v62, %v6171_v30  ;;  %v2534_v13 = vpop.f32.mrf.mxu0 }
 0x3e4   : > { %v2919_v35 = vpop.f32.mrf.mxu1 }
 0x3e5   : > { %v6175_v26 = vadd.f32 %v3168_v24, %v3102_v37  ;;  %v6177_v20 = vadd.f32 %v2919_v35, %v2534_v13  ;;  %v2536_v45 = vpop.f32.mrf.mxu0 }
 0x3e6   : > { %v2921_v49 = vpop.f32.mrf.mxu1  ;;  %v3105_v45 = vld [vmem:[#allocation3 + $0x40] sm:$0xff] }
 0x3e7   : > { %7419 = vst [vmem:[#allocation47_spill] sm:$0xff] %v6177_v20  ;;  %v3169_v55 = vmul.f32 %v5971_v62, %v6177_v20  ;;  %v2539_v53 = vpop.f32.mrf.mxu0 }
 0x3e8   : > { %v2924_v47 = vpop.f32.mrf.mxu1 }
 0x3e9   : > { %v6181_v3 = vadd.f32 %v3169_v55, %v3103_v22  ;;  %v6183_v0 = vadd.f32 %v2924_v47, %v2539_v53  ;;  %v2541_v30 = vpop.f32.mrf.mxu0 }
 0x3ea   : > { %v2926_v18 = vpop.f32.mrf.mxu1  ;;  %v3106_v30 = vld [vmem:[#allocation3 + $0x1f8] sm:$0xff] }
 0x3eb   : > { %7420 = vst [vmem:[#allocation48_spill] sm:$0xff] %v6183_v0  ;;  %v3170_v37 = vmul.f32 %v5971_v62, %v6183_v0  ;;  %v2544_v24 = vpop.f32.mrf.mxu0 }
 0x3ec   : > { %v2929_v13 = vpop.f32.mrf.mxu1 }
 0x3ed   : > { %v6187_v35 = vadd.f32 %v3170_v37, %v3104_v61  ;;  %v6189_v49 = vadd.f32 %v2929_v13, %v2544_v24  ;;  %v2546_v20 = vpop.f32.mrf.mxu0 }
 0x3ee   : > { %v2931_v8 = vpop.f32.mrf.mxu1  ;;  %v3107_v20 = vld [vmem:[#allocation3 + $0x20] sm:$0xff] }
 0x3ef   : > { %7421 = vst [vmem:[#allocation49_spill] sm:$0xff] %v6189_v49  ;;  %v3171_v22 = vmul.f32 %v5971_v62, %v6189_v49  ;;  %v2549_v55 = vpop.f32.mrf.mxu0 }
 0x3f0   : > { %v2934_v53 = vpop.f32.mrf.mxu1 }
 0x3f1   : > { %v6193_v47 = vadd.f32 %v3171_v22, %v3105_v45  ;;  %v6195_v18 = vadd.f32 %v2934_v53, %v2549_v55  ;;  %v2551_v0 = vpop.f32.mrf.mxu0 }
 0x3f2   : > { %v2936_v51 = vpop.f32.mrf.mxu1  ;;  %v3108_v0 = vld [vmem:[#allocation3 + $0x128] sm:$0xff] }
 0x3f3   : > { %7422 = vst [vmem:[#allocation50_spill] sm:$0xff] %v6195_v18  ;;  %v3172_v61 = vmul.f32 %v5971_v62, %v6195_v18  ;;  %v2554_v37 = vpop.f32.mrf.mxu0 }
 0x3f4   : > { %v2939_v24 = vpop.f32.mrf.mxu1 }
 0x3f5   : > { %v6199_v13 = vadd.f32 %v3172_v61, %v3106_v30  ;;  %v6201_v8 = vadd.f32 %v2939_v24, %v2554_v37  ;;  %v2556_v49 = vpop.f32.mrf.mxu0 }
 0x3f6   : > { %v2941_v34 = vpop.f32.mrf.mxu1  ;;  %v3109_v49 = vld [vmem:[#allocation3 + $0x1a0] sm:$0xff] }
 0x3f7   : > { %7423 = vst [vmem:[#allocation51_spill] sm:$0xff] %v6201_v8  ;;  %v3173_v45 = vmul.f32 %v5971_v62, %v6201_v8  ;;  %v2559_v22 = vpop.f32.mrf.mxu0 }
 0x3f8   : > { %v2944_v55 = vpop.f32.mrf.mxu1 }
 0x3f9   : > { %v6205_v53 = vadd.f32 %v3173_v45, %v3107_v20  ;;  %v6207_v51 = vadd.f32 %v2944_v55, %v2559_v22  ;;  %v2561_v18 = vpop.f32.mrf.mxu0 }
 0x3fa   : > { %v2946_v15 = vpop.f32.mrf.mxu1  ;;  %v3110_v18 = vld [vmem:[#allocation3 + $0x1f0] sm:$0xff] }
 0x3fb   : > { %7424 = vst [vmem:[#allocation52_spill] sm:$0xff] %v6207_v51  ;;  %v3174_v30 = vmul.f32 %v5971_v62, %v6207_v51  ;;  %v2564_v61 = vpop.f32.mrf.mxu0 }
 0x3fc   : > { %v2949_v37 = vpop.f32.mrf.mxu1 }
 0x3fd   : > { %v6211_v24 = vadd.f32 %v3174_v30, %v3108_v0  ;;  %v6213_v34 = vadd.f32 %v2949_v37, %v2564_v61  ;;  %v2566_v8 = vpop.f32.mrf.mxu0 }
 0x3fe   : > { %v2951_v59 = vpop.f32.mrf.mxu1  ;;  %v3111_v8 = vld [vmem:[#allocation3 + $0xe8] sm:$0xff] }
 0x3ff   : > { %7425 = vst [vmem:[#allocation53_spill] sm:$0xff] %v6213_v34  ;;  %v3175_v20 = vmul.f32 %v5971_v62, %v6213_v34  ;;  %v2569_v45 = vpop.f32.mrf.mxu0 }
 0x400   : > { %v2954_v22 = vpop.f32.mrf.mxu1 }
 0x401   : > { %v6217_v55 = vadd.f32 %v3175_v20, %v3109_v49  ;;  %v6219_v15 = vadd.f32 %v2954_v22, %v2569_v45  ;;  %v2571_v51 = vpop.f32.mrf.mxu0 }
 0x402   : > { %v2956_v41 = vpop.f32.mrf.mxu1  ;;  %v3112_v51 = vld [vmem:[#allocation3 + $0x78] sm:$0xff] }
 0x403   : > { %7426 = vst [vmem:[#allocation54_spill] sm:$0xff] %v6219_v15  ;;  %v3176_v0 = vmul.f32 %v5971_v62, %v6219_v15  ;;  %v2574_v30 = vpop.f32.mrf.mxu0 }
 0x404   : > { %v2959_v61 = vpop.f32.mrf.mxu1 }
 0x405   : > { %v6223_v37 = vadd.f32 %v3176_v0, %v3110_v18  ;;  %v6225_v59 = vadd.f32 %v2959_v61, %v2574_v30  ;;  %v2576_v34 = vpop.f32.mrf.mxu0 }
 0x406   : > { %v2961_v28 = vpop.f32.mrf.mxu1  ;;  %v3113_v34 = vld [vmem:[#allocation3 + $0x70] sm:$0xff] }
 0x407   : > { %7427 = vst [vmem:[#allocation55_spill] sm:$0xff] %v6225_v59  ;;  %v3177_v49 = vmul.f32 %v5971_v62, %v6225_v59  ;;  %v2579_v20 = vpop.f32.mrf.mxu0 }
 0x408   : > { %v2964_v45 = vpop.f32.mrf.mxu1 }
 0x409   : > { %v6229_v22 = vadd.f32 %v3177_v49, %v3111_v8  ;;  %v6231_v41 = vadd.f32 %v2964_v45, %v2579_v20  ;;  %v2581_v15 = vpop.f32.mrf.mxu0 }
 0x40a   : > { %v2966_v11 = vpop.f32.mrf.mxu1  ;;  %v3114_v15 = vld [vmem:[#allocation3 + $0x90] sm:$0xff] }
 0x40b   : > { %7428 = vst [vmem:[#allocation56_spill] sm:$0xff] %v6231_v41  ;;  %v3178_v18 = vmul.f32 %v5971_v62, %v6231_v41  ;;  %v2584_v0 = vpop.f32.mrf.mxu0 }
 0x40c   : > { %v2969_v30 = vpop.f32.mrf.mxu1 }
 0x40d   : > { %v6235_v61 = vadd.f32 %v3178_v18, %v3112_v51  ;;  %v6237_v28 = vadd.f32 %v2969_v30, %v2584_v0  ;;  %v2586_v59 = vpop.f32.mrf.mxu0 }
 0x40e   : > { %v2971_v57 = vpop.f32.mrf.mxu1  ;;  %v3115_v59 = vld [vmem:[#allocation3 + $0x1d8] sm:$0xff] }
 0x40f   : > { %7429 = vst [vmem:[#allocation57_spill] sm:$0xff] %v6237_v28  ;;  %v3179_v8 = vmul.f32 %v5971_v62, %v6237_v28  ;;  %v2589_v49 = vpop.f32.mrf.mxu0 }
 0x410   : > { %v2974_v20 = vpop.f32.mrf.mxu1 }
 0x411   : > { %v6241_v45 = vadd.f32 %v3179_v8, %v3113_v34  ;;  %v6243_v11 = vadd.f32 %v2974_v20, %v2589_v49  ;;  %v2591_v41 = vpop.f32.mrf.mxu0 }
 0x412   : > { %v2976_v43 = vpop.f32.mrf.mxu1  ;;  %v3116_v41 = vld [vmem:[#allocation3 + $0xd0] sm:$0xff] }
 0x413   : > { %7430 = vst [vmem:[#allocation58_spill] sm:$0xff] %v6243_v11  ;;  %v3180_v51 = vmul.f32 %v5971_v62, %v6243_v11  ;;  %v2594_v18 = vpop.f32.mrf.mxu0 }
 0x414   : > { %v2979_v0 = vpop.f32.mrf.mxu1 }
 0x415   : > { %v6247_v30 = vadd.f32 %v3180_v51, %v3114_v15  ;;  %v6249_v57 = vadd.f32 %v2979_v0, %v2594_v18  ;;  %v2596_v28 = vpop.f32.mrf.mxu0 }
 0x416   : > { %v2981_v32 = vpop.f32.mrf.mxu1  ;;  %v3117_v28 = vld [vmem:[#allocation3 + $0xb8] sm:$0xff] }
 0x417   : > { %7431 = vst [vmem:[#allocation59_spill] sm:$0xff] %v6249_v57  ;;  %v3181_v34 = vmul.f32 %v5971_v62, %v6249_v57  ;;  %v2599_v8 = vpop.f32.mrf.mxu0 }
 0x418   : > { %v2984_v49 = vpop.f32.mrf.mxu1 }
 0x419   : > { %v6253_v20 = vadd.f32 %v3181_v34, %v3115_v59  ;;  %v6255_v43 = vadd.f32 %v2984_v49, %v2599_v8  ;;  %v2601_v11 = vpop.f32.mrf.mxu0 }
 0x41a   : > { %v2986_v12 = vpop.f32.mrf.mxu1  ;;  %v3118_v11 = vld [vmem:[#allocation3 + $0x88] sm:$0xff] }
 0x41b   : > { %7432 = vst [vmem:[#allocation60_spill] sm:$0xff] %v6253_v20  ;;  %7433 = vst [vmem:[#allocation61_spill] sm:$0xff] %v6255_v43  ;;  %v3182_v15 = vmul.f32 %v5971_v62, %v6255_v43  ;;  %v2604_v51 = vpop.f32.mrf.mxu0 }
 0x41c   : > { %v2989_v18 = vpop.f32.mrf.mxu1 }
 0x41d   : > { %v6259_v0 = vadd.f32 %v3182_v15, %v3116_v41  ;;  %v6261_v32 = vadd.f32 %v2989_v18, %v2604_v51  ;;  %v2606_v57 = vpop.f32.mrf.mxu0 }
 0x41e   : > { %v2991_v1 = vpop.f32.mrf.mxu1  ;;  %v3119_v57 = vld [vmem:[#allocation3 + $0xa8] sm:$0xff] }
 0x41f   : > { %7434 = vst [vmem:[#allocation62_spill] sm:$0xff] %v6259_v0  ;;  %7435 = vst [vmem:[#allocation63_spill] sm:$0xff] %v6261_v32  ;;  %v3183_v59 = vmul.f32 %v5971_v62, %v6261_v32  ;;  %v2609_v34 = vpop.f32.mrf.mxu0 }
 0x420   : > { %v2994_v8 = vpop.f32.mrf.mxu1 }
 0x421   : > { %v6265_v49 = vadd.f32 %v3183_v59, %v3117_v28  ;;  %v6267_v12 = vadd.f32 %v2994_v8, %v2609_v34  ;;  %v2611_v43 = vpop.f32.mrf.mxu0 }
 0x422   : > { %v2996_v20 = vpop.f32.mrf.mxu1  ;;  %v3120_v43 = vld [vmem:[#allocation3 + $0x1c8] sm:$0xff] }
 0x423   : > { %7436 = vst [vmem:[#allocation64_spill] sm:$0xff] %v6265_v49  ;;  %7437 = vst [vmem:[#allocation65_spill] sm:$0xff] %v6267_v12  ;;  %v3184_v41 = vmul.f32 %v5971_v62, %v6267_v12  ;;  %v2614_v15 = vpop.f32.mrf.mxu0 }
 0x424   : > { %v2999_v51 = vpop.f32.mrf.mxu1 }
 0x425   : > { %v6271_v18 = vadd.f32 %v3184_v41, %v3118_v11  ;;  %v6273_v1 = vadd.f32 %v2999_v51, %v2614_v15  ;;  %v2616_v32 = vpop.f32.mrf.mxu0 }
 0x426   : > { %v3001_v0 = vpop.f32.mrf.mxu1  ;;  %v3121_v32 = vld [vmem:[#allocation3 + $0x170] sm:$0xff] }
 0x427   : > { %7438 = vst [vmem:[#allocation66_spill] sm:$0xff] %v6271_v18  ;;  %7439 = vst [vmem:[#allocation67_spill] sm:$0xff] %v6273_v1  ;;  %v3185_v28 = vmul.f32 %v5971_v62, %v6273_v1  ;;  %v2619_v59 = vpop.f32.mrf.mxu0 }
 0x428   : > { %v3004_v34 = vpop.f32.mrf.mxu1 }
 0x429   : > { %v6277_v8 = vadd.f32 %v3185_v28, %v3119_v57  ;;  %v6279_v20 = vadd.f32 %v3004_v34, %v2619_v59  ;;  %v2621_v12 = vpop.f32.mrf.mxu0 }
 0x42a   : > { %v3006_v49 = vpop.f32.mrf.mxu1  ;;  %v3122_v12 = vld [vmem:[#allocation3 + $0x178] sm:$0xff] }
 0x42b   : > { %7440 = vst [vmem:[#allocation68_spill] sm:$0xff] %v6277_v8  ;;  %7441 = vst [vmem:[#allocation69_spill] sm:$0xff] %v6279_v20  ;;  %v3186_v11 = vmul.f32 %v5971_v62, %v6279_v20  ;;  %v2624_v41 = vpop.f32.mrf.mxu0 }
 0x42c   : > { %v3009_v15 = vpop.f32.mrf.mxu1 }
 0x42d   : > { %v6283_v51 = vadd.f32 %v3186_v11, %v3120_v43  ;;  %v6285_v0 = vadd.f32 %v3009_v15, %v2624_v41  ;;  %v2626_v1 = vpop.f32.mrf.mxu0 }
 0x42e   : > { %v3011_v18 = vpop.f32.mrf.mxu1  ;;  %v3123_v1 = vld [vmem:[#allocation3 + $0x68] sm:$0xff] }
 0x42f   : > { %7442 = vst [vmem:[#allocation70_spill] sm:$0xff] %v6283_v51  ;;  %7443 = vst [vmem:[#allocation71_spill] sm:$0xff] %v6285_v0  ;;  %v3187_v57 = vmul.f32 %v5971_v62, %v6285_v0  ;;  %v2629_v28 = vpop.f32.mrf.mxu0 }
 0x430   : > { %v3014_v59 = vpop.f32.mrf.mxu1 }
 0x431   : > { %v6289_v34 = vadd.f32 %v3187_v57, %v3121_v32  ;;  %v6291_v49 = vadd.f32 %v3014_v59, %v2629_v28  ;;  %v2631_v20 = vpop.f32.mrf.mxu0 }
 0x432   : > { %v3016_v8 = vpop.f32.mrf.mxu1  ;;  %v3124_v20 = vld [vmem:[#allocation3 + $0x190] sm:$0xff] }
 0x433   : > { %7444 = vst [vmem:[#allocation72_spill] sm:$0xff] %v6289_v34  ;;  %7445 = vst [vmem:[#allocation73_spill] sm:$0xff] %v6291_v49  ;;  %v3188_v43 = vmul.f32 %v5971_v62, %v6291_v49  ;;  %v2634_v11 = vpop.f32.mrf.mxu0 }
 0x434   : > { %v3019_v41 = vpop.f32.mrf.mxu1 }
 0x435   : > { %v6295_v15 = vadd.f32 %v3188_v43, %v3122_v12  ;;  %v6297_v18 = vadd.f32 %v3019_v41, %v2634_v11  ;;  %v2636_v0 = vpop.f32.mrf.mxu0 }
 0x436   : > { %v3021_v51 = vpop.f32.mrf.mxu1  ;;  %v3125_v0 = vld [vmem:[#allocation3 + $0x198] sm:$0xff] }
 0x437   : > { %7446 = vst [vmem:[#allocation74_spill] sm:$0xff] %v6295_v15  ;;  %7447 = vst [vmem:[#allocation75_spill] sm:$0xff] %v6297_v18  ;;  %v3189_v32 = vmul.f32 %v5971_v62, %v6297_v18  ;;  %v2639_v57 = vpop.f32.mrf.mxu0 }
 0x438   : > { %v3024_v28 = vpop.f32.mrf.mxu1 }
 0x439   : > { %v6301_v59 = vadd.f32 %v3189_v32, %v3123_v1  ;;  %v6303_v8 = vadd.f32 %v3024_v28, %v2639_v57  ;;  %v2641_v49 = vpop.f32.mrf.mxu0 }
 0x43a   : > { %v3026_v34 = vpop.f32.mrf.mxu1  ;;  %v3126_v49 = vld [vmem:[#allocation3 + $0x38] sm:$0xff] }
 0x43b   : > { %7448 = vst [vmem:[#allocation76_spill] sm:$0xff] %v6301_v59  ;;  %7449 = vst [vmem:[#allocation77_spill] sm:$0xff] %v6303_v8  ;;  %v3190_v12 = vmul.f32 %v5971_v62, %v6303_v8  ;;  %v2644_v43 = vpop.f32.mrf.mxu0 }
 0x43c   : > { %v3029_v11 = vpop.f32.mrf.mxu1 }
 0x43d   : > { %v6307_v41 = vadd.f32 %v3190_v12, %v3124_v20  ;;  %v6309_v51 = vadd.f32 %v3029_v11, %v2644_v43  ;;  %v2646_v18 = vpop.f32.mrf.mxu0 }
 0x43e   : > { %v3031_v15 = vpop.f32.mrf.mxu1  ;;  %v3127_v18 = vld [vmem:[#allocation3 + $0xc0] sm:$0xff] }
 0x43f   : > { %7450 = vst [vmem:[#allocation78_spill] sm:$0xff] %v6307_v41  ;;  %7451 = vst [vmem:[#allocation79_spill] sm:$0xff] %v6309_v51  ;;  %v3191_v1 = vmul.f32 %v5971_v62, %v6309_v51  ;;  %v2649_v32 = vpop.f32.mrf.mxu0 }
 0x440   : > { %v3034_v57 = vpop.f32.mrf.mxu1 }
 0x441   : > { %v6313_v28 = vadd.f32 %v3191_v1, %v3125_v0  ;;  %v6315_v34 = vadd.f32 %v3034_v57, %v2649_v32  ;;  %v2651_v8 = vpop.f32.mrf.mxu0 }
 0x442   : > { %v3036_v59 = vpop.f32.mrf.mxu1  ;;  %v3128_v8 = vld [vmem:[#allocation3 + $0x1c0] sm:$0xff] }
 0x443   : > { %7452 = vst [vmem:[#allocation80_spill] sm:$0xff] %v6313_v28  ;;  %7453 = vst [vmem:[#allocation81_spill] sm:$0xff] %v6315_v34  ;;  %v3192_v20 = vmul.f32 %v5971_v62, %v6315_v34  ;;  %v2654_v12 = vpop.f32.mrf.mxu0 }
 0x444   : > { %v3039_v43 = vpop.f32.mrf.mxu1 }
 0x445   : > { %v6319_v11 = vadd.f32 %v3192_v20, %v3126_v49  ;;  %v6321_v15 = vadd.f32 %v3039_v43, %v2654_v12  ;;  %v2656_v51 = vpop.f32.mrf.mxu0 }
 0x446   : > { %v3041_v41 = vpop.f32.mrf.mxu1  ;;  %v3129_v51 = vld [vmem:[#allocation3 + $0x158] sm:$0xff] }
 0x447   : > { %7454 = vst [vmem:[#allocation82_spill] sm:$0xff] %v6319_v11  ;;  %7455 = vst [vmem:[#allocation83_spill] sm:$0xff] %v6321_v15  ;;  %v3193_v0 = vmul.f32 %v5971_v62, %v6321_v15  ;;  %v2659_v1 = vpop.f32.mrf.mxu0 }
 0x448   : > { %v3044_v32 = vpop.f32.mrf.mxu1 }
 0x449   : > { %v6325_v57 = vadd.f32 %v3193_v0, %v3127_v18  ;;  %v6327_v59 = vadd.f32 %v3044_v32, %v2659_v1  ;;  %v2661_v34 = vpop.f32.mrf.mxu0 }
 0x44a   : > { %v3046_v28 = vpop.f32.mrf.mxu1  ;;  %v3130_v34 = vld [vmem:[#allocation3 + $0x10] sm:$0xff] }
 0x44b   : > { %7456 = vst [vmem:[#allocation84_spill] sm:$0xff] %v6325_v57  ;;  %7457 = vst [vmem:[#allocation85_spill] sm:$0xff] %v6327_v59  ;;  %v3194_v49 = vmul.f32 %v5971_v62, %v6327_v59  ;;  %v2664_v20 = vpop.f32.mrf.mxu0 }
 0x44c   : > { %v3049_v12 = vpop.f32.mrf.mxu1 }
 0x44d   : > { %v6331_v43 = vadd.f32 %v3194_v49, %v3128_v8  ;;  %v6333_v41 = vadd.f32 %v3049_v12, %v2664_v20  ;;  %v2666_v15 = vpop.f32.mrf.mxu0 }
 0x44e   : > { %v3051_v11 = vpop.f32.mrf.mxu1  ;;  %v3131_v15 = vld [vmem:[#allocation3 + $0x58] sm:$0xff] }
 0x44f   : > { %7458 = vst [vmem:[#allocation86_spill] sm:$0xff] %v6331_v43  ;;  %7459 = vst [vmem:[#allocation87_spill] sm:$0xff] %v6333_v41  ;;  %v3195_v18 = vmul.f32 %v5971_v62, %v6333_v41  ;;  %v2669_v0 = vpop.f32.mrf.mxu0 }
 0x450   : > { %v3054_v1 = vpop.f32.mrf.mxu1 }
 0x451   : > { %v6337_v32 = vadd.f32 %v3195_v18, %v3129_v51  ;;  %v6339_v28 = vadd.f32 %v3054_v1, %v2669_v0  ;;  %v2671_v59 = vpop.f32.mrf.mxu0 }
 0x452   : > { %v3056_v57 = vpop.f32.mrf.mxu1  ;;  %v3132_v59 = vld [vmem:[#allocation3 + $0xa0] sm:$0xff] }
 0x453   : > { %7460 = vst [vmem:[#allocation88_spill] sm:$0xff] %v6337_v32  ;;  %7461 = vst [vmem:[#allocation89_spill] sm:$0xff] %v6339_v28  ;;  %v3196_v8 = vmul.f32 %v5971_v62, %v6339_v28  ;;  %v2674_v49 = vpop.f32.mrf.mxu0 }
 0x454   : > { %v3059_v20 = vpop.f32.mrf.mxu1 }
 0x455   : > { %v6343_v12 = vadd.f32 %v3196_v8, %v3130_v34  ;;  %v6345_v11 = vadd.f32 %v3059_v20, %v2674_v49  ;;  %v2676_v41 = vpop.f32.mrf.mxu0 }
 0x456   : > { %v3061_v43 = vpop.f32.mrf.mxu1 }
 0x457   : > { %v3197_v51 = vmul.f32 %v5971_v62, %v6345_v11  ;;  %v2679_v18 = vpop.f32.mrf.mxu0 }
 0x458   : > { %v3064_v0 = vpop.f32.mrf.mxu1 }
 0x459   : > { %v6349_v1 = vadd.f32 %v3197_v51, %v3131_v15  ;;  %v6351_v57 = vadd.f32 %v3064_v0, %v2679_v18  ;;  %v2681_v28 = vpop.f32.mrf.mxu0  ;;  %3266 = sbr.rel (%p4434_p12) target bundleno = 1182 (0x49e), region = 60 }
 0x45a   : > { %v3066_v32 = vpop.f32.mrf.mxu1 }
 0x45b   : > { %v3198_v34 = vmul.f32 %v5971_v62, %v6351_v57 }
 0x45d   : > { %v6355_v8 = vadd.f32 %v3198_v34, %v3132_v59 }
 0x45e   : > { %3267 = vst [vmem:[#allocation3 + $0xb0] sm:$0xff] %v5977_v16  ;;  %3268 = vst [vmem:[#allocation3 + $0x1b0] sm:$0xff] %v5983_v31  ;;  %v7462_v62 = vld [vmem:[#allocation60_spill] sm:$0xff]  ;;  %v7463_v43 = vld [vmem:[#allocation62_spill] sm:$0xff] }
 0x45f   : > { %3269 = vst [vmem:[#allocation3 + $0xd8] sm:$0xff] %v5989_v42  ;;  %3270 = vst [vmem:[#allocation3 + $0x18] sm:$0xff] %v5995_v56  ;;  %v7464_v41 = vld [vmem:[#allocation64_spill] sm:$0xff]  ;;  %v7465_v32 = vld [vmem:[#allocation66_spill] sm:$0xff] }
 0x460   : > { %3271 = vst [vmem:[#allocation3 + $0x50] sm:$0xff] %v6001_v9  ;;  %3272 = vst [vmem:[#allocation3 + $0x168] sm:$0xff] %v6007_v27  ;;  %v7466_v28 = vld [vmem:[#allocation68_spill] sm:$0xff]  ;;  %v7467_v49 = vld [vmem:[#allocation70_spill] sm:$0xff] }
 0x461   : > { %3273 = vst [vmem:[#allocation3 + $0x130] sm:$0xff] %v6013_v40  ;;  %3274 = vst [vmem:[#allocation3 + $0x48] sm:$0xff] %v6019_v58  ;;  %v7468_v20 = vld [vmem:[#allocation72_spill] sm:$0xff]  ;;  %v7469_v15 = vld [vmem:[#allocation74_spill] sm:$0xff] }
 0x462   : > { %3275 = vst [vmem:[#allocation3 + $0x180] sm:$0xff] %v6025_v14  ;;  %3276 = vst [vmem:[#allocation3 + $0x110] sm:$0xff] %v6031_v33  ;;  %v7470_v51 = vld [vmem:[#allocation76_spill] sm:$0xff]  ;;  %v7471_v18 = vld [vmem:[#allocation78_spill] sm:$0xff] }
 0x463   : > { %3277 = vst [vmem:[#allocation3 + $0x118] sm:$0xff] %v6037_v50  ;;  %3278 = vst [vmem:[#allocation3 + $0x98] sm:$0xff] %v6043_v7  ;;  %v7472_v0 = vld [vmem:[#allocation80_spill] sm:$0xff]  ;;  %v7473_v59 = vld [vmem:[#allocation82_spill] sm:$0xff] }
 0x464   : > { %3279 = vst [vmem:[#allocation3 + $0x120] sm:$0xff] %v6049_v17  ;;  %3280 = vst [vmem:[#allocation3 + $0x150] sm:$0xff] %v6055_v48  ;;  %v7474_v34 = vld [vmem:[#allocation84_spill] sm:$0xff] }
 0x465   : > { %3281 = vst [vmem:[#allocation3 + $0x108] sm:$0xff] %v6061_v63  ;;  %3282 = vst [vmem:[#allocation3 + $0x60] sm:$0xff] %v6067_v19 }
 0x466   : > { %3283 = vst [vmem:[#allocation3 + $0xe0] sm:$0xff] %v6073_v29  ;;  %3284 = vst [vmem:[#allocation3 + $0x188] sm:$0xff] %v6079_v44 }
 0x467   : > { %3285 = vst [vmem:[#allocation3 + $0x138] sm:$0xff] %v6085_v60  ;;  %3286 = vst [vmem:[#allocation3 + $0x140] sm:$0xff] %v6091_v21 }
 0x468   : > { %3287 = vst [vmem:[#allocation3 + $0x80] sm:$0xff] %v6097_v10  ;;  %3288 = vst [vmem:[#allocation3 + $0x1a8] sm:$0xff] %v6103_v54 }
 0x469   : > { %3289 = vst [vmem:[#allocation3 + $0x1b8] sm:$0xff] %v6109_v23  ;;  %3290 = vst [vmem:[#allocation3 + $0x28] sm:$0xff] %v6115_v46 }
 0x46a   : > { %3291 = vst [vmem:[#allocation3 + $0x1e8] sm:$0xff] %v6121_v6  ;;  %3292 = vst [vmem:[#allocation3 + $0xf8] sm:$0xff] %v6127_v39 }
 0x46b   : > { %3293 = vst [vmem:[#allocation3 + $0x160] sm:$0xff] %v6133_v5  ;;  %3294 = vst [vmem:[#allocation3 + $0x30] sm:$0xff] %v6139_v38 }
 0x46c   : > { %3295 = vst [vmem:[#allocation3 + $0x1e0] sm:$0xff] %v6145_v4  ;;  %3296 = vst [vmem:[#allocation3] sm:$0xff] %v6151_v36 }
 0x46d   : > { %3297 = vst [vmem:[#allocation3 + $0xf0] sm:$0xff] %v6157_v2  ;;  %3298 = vst [vmem:[#allocation3 + $0x8] sm:$0xff] %v6163_v25 }
 0x46e   : > { %3299 = vst [vmem:[#allocation3 + $0x148] sm:$0xff] %v6169_v52  ;;  %3300 = vst [vmem:[#allocation3 + $0x1d0] sm:$0xff] %v6175_v26 }
 0x46f   : > { %3301 = vst [vmem:[#allocation3 + $0x100] sm:$0xff] %v6181_v3  ;;  %3302 = vst [vmem:[#allocation3 + $0xc8] sm:$0xff] %v6187_v35 }
 0x470   : > { %3303 = vst [vmem:[#allocation3 + $0x40] sm:$0xff] %v6193_v47  ;;  %3304 = vst [vmem:[#allocation3 + $0x1f8] sm:$0xff] %v6199_v13 }
 0x471   : > { %3305 = vst [vmem:[#allocation3 + $0x20] sm:$0xff] %v6205_v53  ;;  %3306 = vst [vmem:[#allocation3 + $0x128] sm:$0xff] %v6211_v24 }
 0x472   : > { %3307 = vst [vmem:[#allocation3 + $0x1a0] sm:$0xff] %v6217_v55  ;;  %3308 = vst [vmem:[#allocation3 + $0x1f0] sm:$0xff] %v6223_v37 }
 0x473   : > { %3309 = vst [vmem:[#allocation3 + $0xe8] sm:$0xff] %v6229_v22  ;;  %3310 = vst [vmem:[#allocation3 + $0x78] sm:$0xff] %v6235_v61 }
 0x474   : > { %3311 = vst [vmem:[#allocation3 + $0x70] sm:$0xff] %v6241_v45  ;;  %3312 = vst [vmem:[#allocation3 + $0x90] sm:$0xff] %v6247_v30 }
 0x475   : > { %3313 = vst [vmem:[#allocation3 + $0x1d8] sm:$0xff] %v7462_v62  ;;  %3314 = vst [vmem:[#allocation3 + $0xd0] sm:$0xff] %v7463_v43  ;;  %v7475_v62 = vld [vmem:[#allocation86_spill] sm:$0xff]  ;;  %v7476_v43 = vld [vmem:[#allocation88_spill] sm:$0xff] }
 0x476   : > { %3315 = vst [vmem:[#allocation3 + $0xb8] sm:$0xff] %v7464_v41  ;;  %3316 = vst [vmem:[#allocation3 + $0x88] sm:$0xff] %v7465_v32  ;;  %v7477_v41 = vld [vmem:[#allocation13_spill] sm:$0xff]  ;;  %v7478_v32 = vld [vmem:[#allocation14_spill] sm:$0xff] }
 0x477   : > { %3317 = vst [vmem:[#allocation3 + $0xa8] sm:$0xff] %v7466_v28  ;;  %3318 = vst [vmem:[#allocation3 + $0x1c8] sm:$0xff] %v7467_v49  ;;  %v7479_v28 = vld [vmem:[#allocation15_spill] sm:$0xff]  ;;  %v7480_v49 = vld [vmem:[#allocation16_spill] sm:$0xff] }
 0x478   : > { %3319 = vst [vmem:[#allocation3 + $0x170] sm:$0xff] %v7468_v20  ;;  %3320 = vst [vmem:[#allocation3 + $0x178] sm:$0xff] %v7469_v15  ;;  %v7481_v20 = vld [vmem:[#allocation17_spill] sm:$0xff]  ;;  %v7482_v15 = vld [vmem:[#allocation18_spill] sm:$0xff] }
 0x479   : > { %3321 = vst [vmem:[#allocation3 + $0x68] sm:$0xff] %v7470_v51  ;;  %3322 = vst [vmem:[#allocation3 + $0x190] sm:$0xff] %v7471_v18  ;;  %v7483_v51 = vld [vmem:[#allocation19_spill] sm:$0xff]  ;;  %v7484_v18 = vld [vmem:[#allocation20_spill] sm:$0xff] }
 0x47a   : > { %3323 = vst [vmem:[#allocation3 + $0x198] sm:$0xff] %v7472_v0  ;;  %3324 = vst [vmem:[#allocation3 + $0x38] sm:$0xff] %v7473_v59  ;;  %v7485_v0 = vld [vmem:[#allocation21_spill] sm:$0xff]  ;;  %v7486_v59 = vld [vmem:[#allocation22_spill] sm:$0xff] }
 0x47b   : > { %3325 = vst [vmem:[#allocation3 + $0xc0] sm:$0xff] %v7474_v34  ;;  %3326 = vst [vmem:[#allocation3 + $0x1c0] sm:$0xff] %v7475_v62  ;;  %v7487_v34 = vld [vmem:[#allocation23_spill] sm:$0xff]  ;;  %v7488_v62 = vld [vmem:[#allocation24_spill] sm:$0xff] }
 0x47c   : > { %3327 = vst [vmem:[#allocation3 + $0x158] sm:$0xff] %v7476_v43  ;;  %3328 = vst [vmem:[#allocation3 + $0x10] sm:$0xff] %v6343_v12  ;;  %v7489_v43 = vld [vmem:[#allocation25_spill] sm:$0xff] }
 0x47d   : > { %3329 = vst [vmem:[#allocation3 + $0x58] sm:$0xff] %v6349_v1  ;;  %3330 = vst [vmem:[#allocation3 + $0xa0] sm:$0xff] %v6355_v8 }
 0x47e   : > { %3334 = vst [vmem:[%s6423_s18] sm:$0xff] %v7477_v41  ;;  %3335 = vst [vmem:[%s6423_s18 + $0x8] sm:$0xff] %v7478_v32  ;;  %v7490_v41 = vld [vmem:[#allocation26_spill] sm:$0xff]  ;;  %v7491_v32 = vld [vmem:[#allocation27_spill] sm:$0xff] }
 0x47f   : > { %3336 = vst [vmem:[%s6423_s18 + $0x10] sm:$0xff] %v7479_v28  ;;  %3337 = vst [vmem:[%s6423_s18 + $0x18] sm:$0xff] %v7480_v49  ;;  %v7492_v28 = vld [vmem:[#allocation28_spill] sm:$0xff]  ;;  %v7493_v49 = vld [vmem:[#allocation29_spill] sm:$0xff] }
 0x480   : > { %3338 = vst [vmem:[%s6423_s18 + $0x20] sm:$0xff] %v7481_v20  ;;  %3339 = vst [vmem:[%s6423_s18 + $0x28] sm:$0xff] %v7482_v15  ;;  %v7494_v20 = vld [vmem:[#allocation30_spill] sm:$0xff]  ;;  %v7495_v15 = vld [vmem:[#allocation31_spill] sm:$0xff] }
 0x481   : > { %3340 = vst [vmem:[%s6423_s18 + $0x30] sm:$0xff] %v7483_v51  ;;  %3341 = vst [vmem:[%s6423_s18 + $0x38] sm:$0xff] %v7484_v18  ;;  %v7496_v51 = vld [vmem:[#allocation32_spill] sm:$0xff]  ;;  %v7497_v18 = vld [vmem:[#allocation33_spill] sm:$0xff] }
 0x482   : > { %3342 = vst [vmem:[%s6423_s18 + $0x40] sm:$0xff] %v7485_v0  ;;  %3343 = vst [vmem:[%s6423_s18 + $0x48] sm:$0xff] %v7486_v59  ;;  %v7498_v0 = vld [vmem:[#allocation34_spill] sm:$0xff]  ;;  %v7499_v59 = vld [vmem:[#allocation35_spill] sm:$0xff] }
 0x483   : > { %3344 = vst [vmem:[%s6423_s18 + $0x50] sm:$0xff] %v7487_v34  ;;  %3345 = vst [vmem:[%s6423_s18 + $0x58] sm:$0xff] %v7488_v62  ;;  %v7500_v34 = vld [vmem:[#allocation36_spill] sm:$0xff]  ;;  %v7501_v62 = vld [vmem:[#allocation37_spill] sm:$0xff] }
 0x484   : > { %3346 = vst [vmem:[%s6423_s18 + $0x60] sm:$0xff] %v7489_v43  ;;  %3347 = vst [vmem:[%s6423_s18 + $0x68] sm:$0xff] %v7490_v41  ;;  %v7502_v43 = vld [vmem:[#allocation38_spill] sm:$0xff]  ;;  %v7503_v41 = vld [vmem:[#allocation39_spill] sm:$0xff] }
 0x485   : > { %3348 = vst [vmem:[%s6423_s18 + $0x70] sm:$0xff] %v7491_v32  ;;  %3349 = vst [vmem:[%s6423_s18 + $0x78] sm:$0xff] %v7492_v28  ;;  %v7504_v32 = vld [vmem:[#allocation40_spill] sm:$0xff]  ;;  %v7505_v28 = vld [vmem:[#allocation41_spill] sm:$0xff] }
 0x486   : > { %3350 = vst [vmem:[%s6423_s18 + $0x80] sm:$0xff] %v7493_v49  ;;  %3351 = vst [vmem:[%s6423_s18 + $0x88] sm:$0xff] %v7494_v20  ;;  %v7506_v49 = vld [vmem:[#allocation42_spill] sm:$0xff]  ;;  %v7507_v20 = vld [vmem:[#allocation43_spill] sm:$0xff] }
 0x487   : > { %3352 = vst [vmem:[%s6423_s18 + $0x90] sm:$0xff] %v7495_v15  ;;  %3353 = vst [vmem:[%s6423_s18 + $0x98] sm:$0xff] %v7496_v51  ;;  %v7508_v15 = vld [vmem:[#allocation44_spill] sm:$0xff]  ;;  %v7509_v51 = vld [vmem:[#allocation45_spill] sm:$0xff] }
 0x488   : > { %3354 = vst [vmem:[%s6423_s18 + $0xa0] sm:$0xff] %v7497_v18  ;;  %3355 = vst [vmem:[%s6423_s18 + $0xa8] sm:$0xff] %v7498_v0  ;;  %v7510_v18 = vld [vmem:[#allocation46_spill] sm:$0xff]  ;;  %v7511_v0 = vld [vmem:[#allocation47_spill] sm:$0xff] }
 0x489   : > { %3356 = vst [vmem:[%s6423_s18 + $0xb0] sm:$0xff] %v7499_v59  ;;  %3357 = vst [vmem:[%s6423_s18 + $0xb8] sm:$0xff] %v7500_v34  ;;  %v7512_v59 = vld [vmem:[#allocation48_spill] sm:$0xff]  ;;  %v7513_v34 = vld [vmem:[#allocation49_spill] sm:$0xff] }
 0x48a   : > { %3358 = vst [vmem:[%s6423_s18 + $0xc0] sm:$0xff] %v7501_v62  ;;  %3359 = vst [vmem:[%s6423_s18 + $0xc8] sm:$0xff] %v7502_v43  ;;  %v7514_v62 = vld [vmem:[#allocation50_spill] sm:$0xff]  ;;  %v7515_v43 = vld [vmem:[#allocation51_spill] sm:$0xff] }
 0x48b   : > { %3360 = vst [vmem:[%s6423_s18 + $0xd0] sm:$0xff] %v7503_v41  ;;  %3361 = vst [vmem:[%s6423_s18 + $0xd8] sm:$0xff] %v7504_v32  ;;  %v7516_v41 = vld [vmem:[#allocation52_spill] sm:$0xff]  ;;  %v7517_v32 = vld [vmem:[#allocation53_spill] sm:$0xff] }
 0x48c   : > { %3362 = vst [vmem:[%s6423_s18 + $0xe0] sm:$0xff] %v7505_v28  ;;  %3363 = vst [vmem:[%s6423_s18 + $0xe8] sm:$0xff] %v7506_v49  ;;  %v7518_v28 = vld [vmem:[#allocation54_spill] sm:$0xff]  ;;  %v7519_v49 = vld [vmem:[#allocation55_spill] sm:$0xff] }
 0x48d   : > { %3364 = vst [vmem:[%s6423_s18 + $0xf0] sm:$0xff] %v7507_v20  ;;  %3365 = vst [vmem:[%s6423_s18 + $0xf8] sm:$0xff] %v7508_v15  ;;  %v7520_v20 = vld [vmem:[#allocation56_spill] sm:$0xff]  ;;  %v7521_v15 = vld [vmem:[#allocation57_spill] sm:$0xff] }
 0x48e   : > { %3366 = vst [vmem:[%s6423_s18 + $0x100] sm:$0xff] %v7509_v51  ;;  %3367 = vst [vmem:[%s6423_s18 + $0x108] sm:$0xff] %v7510_v18  ;;  %v7522_v51 = vld [vmem:[#allocation58_spill] sm:$0xff]  ;;  %v7523_v18 = vld [vmem:[#allocation59_spill] sm:$0xff] }
 0x48f   : > { %3368 = vst [vmem:[%s6423_s18 + $0x110] sm:$0xff] %v7511_v0  ;;  %3369 = vst [vmem:[%s6423_s18 + $0x118] sm:$0xff] %v7512_v59  ;;  %v7524_v0 = vld [vmem:[#allocation61_spill] sm:$0xff]  ;;  %v7525_v59 = vld [vmem:[#allocation63_spill] sm:$0xff] }
 0x490   : > { %3370 = vst [vmem:[%s6423_s18 + $0x120] sm:$0xff] %v7513_v34  ;;  %3371 = vst [vmem:[%s6423_s18 + $0x128] sm:$0xff] %v7514_v62  ;;  %v7526_v34 = vld [vmem:[#allocation65_spill] sm:$0xff]  ;;  %v7527_v62 = vld [vmem:[#allocation67_spill] sm:$0xff] }
 0x491   : > { %3372 = vst [vmem:[%s6423_s18 + $0x130] sm:$0xff] %v7515_v43  ;;  %3373 = vst [vmem:[%s6423_s18 + $0x138] sm:$0xff] %v7516_v41  ;;  %v7528_v43 = vld [vmem:[#allocation69_spill] sm:$0xff]  ;;  %v7529_v41 = vld [vmem:[#allocation71_spill] sm:$0xff] }
 0x492   : > { %3374 = vst [vmem:[%s6423_s18 + $0x140] sm:$0xff] %v7517_v32  ;;  %3375 = vst [vmem:[%s6423_s18 + $0x148] sm:$0xff] %v7518_v28  ;;  %v7530_v32 = vld [vmem:[#allocation73_spill] sm:$0xff]  ;;  %v7531_v28 = vld [vmem:[#allocation75_spill] sm:$0xff] }
 0x493   : > { %3376 = vst [vmem:[%s6423_s18 + $0x150] sm:$0xff] %v7519_v49  ;;  %3377 = vst [vmem:[%s6423_s18 + $0x158] sm:$0xff] %v7520_v20  ;;  %v7532_v49 = vld [vmem:[#allocation77_spill] sm:$0xff]  ;;  %v7533_v20 = vld [vmem:[#allocation79_spill] sm:$0xff] }
 0x494   : > { %3378 = vst [vmem:[%s6423_s18 + $0x160] sm:$0xff] %v7521_v15  ;;  %3379 = vst [vmem:[%s6423_s18 + $0x168] sm:$0xff] %v7522_v51  ;;  %v7534_v15 = vld [vmem:[#allocation81_spill] sm:$0xff]  ;;  %v7535_v51 = vld [vmem:[#allocation83_spill] sm:$0xff] }
 0x495   : > { %3380 = vst [vmem:[%s6423_s18 + $0x170] sm:$0xff] %v7523_v18  ;;  %3381 = vst [vmem:[%s6423_s18 + $0x178] sm:$0xff] %v7524_v0  ;;  %v7536_v18 = vld [vmem:[#allocation85_spill] sm:$0xff]  ;;  %v7537_v0 = vld [vmem:[#allocation87_spill] sm:$0xff] }
 0x496   : > { %3382 = vst [vmem:[%s6423_s18 + $0x180] sm:$0xff] %v7525_v59  ;;  %3383 = vst [vmem:[%s6423_s18 + $0x188] sm:$0xff] %v7526_v34  ;;  %v7538_v59 = vld [vmem:[#allocation89_spill] sm:$0xff] }
 0x497   : > { %3384 = vst [vmem:[%s6423_s18 + $0x190] sm:$0xff] %v7527_v62  ;;  %3385 = vst [vmem:[%s6423_s18 + $0x198] sm:$0xff] %v7528_v43 }
 0x498   : > { %3386 = vst [vmem:[%s6423_s18 + $0x1a0] sm:$0xff] %v7529_v41  ;;  %3387 = vst [vmem:[%s6423_s18 + $0x1a8] sm:$0xff] %v7530_v32 }
 0x499   : > { %3388 = vst [vmem:[%s6423_s18 + $0x1b0] sm:$0xff] %v7531_v28  ;;  %3389 = vst [vmem:[%s6423_s18 + $0x1b8] sm:$0xff] %v7532_v49 }
 0x49a   : > { %3390 = vst [vmem:[%s6423_s18 + $0x1c0] sm:$0xff] %v7533_v20  ;;  %3391 = vst [vmem:[%s6423_s18 + $0x1c8] sm:$0xff] %v7534_v15 }
 0x49b   : > { %3392 = vst [vmem:[%s6423_s18 + $0x1d0] sm:$0xff] %v7535_v51  ;;  %3393 = vst [vmem:[%s6423_s18 + $0x1d8] sm:$0xff] %v7536_v18 }
 0x49c   : > { %3394 = vst [vmem:[%s6423_s18 + $0x1e0] sm:$0xff] %v7537_v0  ;;  %3395 = vst [vmem:[%s6423_s18 + $0x1e8] sm:$0xff] %v7538_v59 }
 0x49d   : > { %3396 = vst [vmem:[%s6423_s18 + $0x1f0] sm:$0xff] %v6345_v11  ;;  %3397 = vst [vmem:[%s6423_s18 + $0x1f8] sm:$0xff] %v6351_v57 }
 0x49e PF: > { %p4436_p13 = scmp.ne.s32.totalorder %s5174_s29, 10 }
 0x4a0   : > { %3401 = sbr.rel (%p4436_p13) target bundleno = 1636 (0x664), region = 64 }
 0x4a5   : > { %v3402_v34 = vlaneseq  ;;  %v7540_v32 = vld [vmem:[#allocation62_spill] sm:$0xff]  ;;  %v7543_v15 = vld [vmem:[#allocation68_spill] sm:$0xff] }
 0x4a6   : > { %v7542_v49 = vld [vmem:[#allocation66_spill] sm:$0xff]  ;;  %v7545_v59 = vld [vmem:[#allocation72_spill] sm:$0xff] }
 0x4a7   : > { %v6554_v62 = vand.u32 127, %v3402_v34  ;;  %v7544_v18 = vld [vmem:[#allocation70_spill] sm:$0xff] }
 0x4a9   : > { %vm3404_vm2 = vcmp.lt.s32.totalorder %v6554_v62, 8 }
 0x4aa   : > { %v6560_v43 = vsel %vm3404_vm2, %v5977_v16, -1e+30  ;;  %v6565_v11 = vsel %vm3404_vm2, %v5989_v42, -1e+30  ;;  %v6572_v57 = vsel %vm3404_vm2, %v5983_v31, -1e+30 }
 0x4ab   : > { %3469 = vmax.xlane.f32.xlu0 %v6560_v43  ;;  %3473 = vmax.xlane.f32.xlu1 %v6565_v11  ;;  %v6577_v41 = vsel %vm3404_vm2, %v5995_v56, -1e+30  ;;  %v6584_v16 = vsel %vm3404_vm2, %v6001_v9, -1e+30  ;;  %v6589_v42 = vsel %vm3404_vm2, %v6007_v27, -1e+30 }
 0x4ac   : > { %v6596_v31 = vsel %vm3404_vm2, %v6013_v40, -1e+30  ;;  %v6601_v56 = vsel %vm3404_vm2, %v6019_v58, -1e+30  ;;  %v6608_v9 = vsel %vm3404_vm2, %v6025_v14, -1e+30 }
 0x4ad   : > { %v6613_v27 = vsel %vm3404_vm2, %v6031_v33, -1e+30  ;;  %v6620_v40 = vsel %vm3404_vm2, %v6037_v50, -1e+30  ;;  %v6625_v58 = vsel %vm3404_vm2, %v6043_v7, -1e+30 }
 0x4ae   : > { %v6632_v14 = vsel %vm3404_vm2, %v6049_v17, -1e+30  ;;  %v6637_v33 = vsel %vm3404_vm2, %v6055_v48, -1e+30  ;;  %v6644_v50 = vsel %vm3404_vm2, %v6061_v63, -1e+30 }
 0x4af   : > { %3471 = vmax.xlane.f32.xlu0 %v6572_v57  ;;  %3475 = vmax.xlane.f32.xlu1 %v6577_v41  ;;  %v6649_v7 = vsel %vm3404_vm2, %v6067_v19, -1e+30  ;;  %v6656_v17 = vsel %vm3404_vm2, %v6073_v29, -1e+30  ;;  %v6661_v48 = vsel %vm3404_vm2, %v6079_v44, -1e+30 }
 0x4b0   : > { %v6668_v63 = vsel %vm3404_vm2, %v6085_v60, -1e+30  ;;  %v6673_v19 = vsel %vm3404_vm2, %v6091_v21, -1e+30  ;;  %v6680_v29 = vsel %vm3404_vm2, %v6097_v10, -1e+30 }
 0x4b1   : > { %v6685_v44 = vsel %vm3404_vm2, %v6103_v54, -1e+30  ;;  %v6692_v60 = vsel %vm3404_vm2, %v6109_v23, -1e+30  ;;  %v6697_v21 = vsel %vm3404_vm2, %v6115_v46, -1e+30 }
 0x4b2   : > { %v6704_v10 = vsel %vm3404_vm2, %v6121_v6, -1e+30  ;;  %v6709_v54 = vsel %vm3404_vm2, %v6127_v39, -1e+30  ;;  %v6716_v23 = vsel %vm3404_vm2, %v6133_v5, -1e+30 }
 0x4b3   : > { %3477 = vmax.xlane.f32.xlu0 %v6584_v16  ;;  %3479 = vmax.xlane.f32.xlu1 %v6589_v42  ;;  %v6721_v46 = vsel %vm3404_vm2, %v6139_v38, -1e+30  ;;  %v6728_v6 = vsel %vm3404_vm2, %v6145_v4, -1e+30  ;;  %v6733_v39 = vsel %vm3404_vm2, %v6151_v36, -1e+30 }
 0x4b4   : > { %v6740_v5 = vsel %vm3404_vm2, %v6157_v2, -1e+30  ;;  %v6745_v38 = vsel %vm3404_vm2, %v6163_v25, -1e+30  ;;  %v6752_v4 = vsel %vm3404_vm2, %v6169_v52, -1e+30 }
 0x4b5   : > { %v6757_v36 = vsel %vm3404_vm2, %v6175_v26, -1e+30  ;;  %v6764_v2 = vsel %vm3404_vm2, %v6181_v3, -1e+30  ;;  %v6769_v25 = vsel %vm3404_vm2, %v6187_v35, -1e+30 }
 0x4b6   : > { %v6776_v52 = vsel %vm3404_vm2, %v6193_v47, -1e+30  ;;  %v6781_v26 = vsel %vm3404_vm2, %v6199_v13, -1e+30  ;;  %v6788_v3 = vsel %vm3404_vm2, %v6205_v53, -1e+30 }
 0x4b7   : > { %3481 = vmax.xlane.f32.xlu0 %v6596_v31  ;;  %3483 = vmax.xlane.f32.xlu1 %v6601_v56  ;;  %v6793_v35 = vsel %vm3404_vm2, %v6211_v24, -1e+30  ;;  %v6800_v47 = vsel %vm3404_vm2, %v6217_v55, -1e+30  ;;  %v6805_v13 = vsel %vm3404_vm2, %v6223_v37, -1e+30 }
 0x4b8   : > { %v6812_v53 = vsel %vm3404_vm2, %v6229_v22, -1e+30  ;;  %v6817_v24 = vsel %vm3404_vm2, %v6235_v61, -1e+30  ;;  %v6824_v55 = vsel %vm3404_vm2, %v6241_v45, -1e+30 }
 0x4b9   : > { %v6829_v37 = vsel %vm3404_vm2, %v6247_v30, -1e+30  ;;  %v7539_v22 = vld [vmem:[#allocation60_spill] sm:$0xff]  ;;  %v6841_v28 = vsel %vm3404_vm2, %v7540_v32, -1e+30 }
 0x4ba   : > { %v6836_v61 = vsel %vm3404_vm2, %v7539_v22, -1e+30  ;;  %v7541_v45 = vld [vmem:[#allocation64_spill] sm:$0xff]  ;;  %v6853_v20 = vsel %vm3404_vm2, %v7542_v49, -1e+30  ;;  %v7547_v22 = vld [vmem:[#allocation74_spill] sm:$0xff] }
 0x4bb   : > { %3485 = vmax.xlane.f32.xlu0 %v6608_v9  ;;  %3487 = vmax.xlane.f32.xlu1 %v6613_v27  ;;  %v6848_v30 = vsel %vm3404_vm2, %v7541_v45, -1e+30  ;;  %v6860_v51 = vsel %vm3404_vm2, %v7543_v15, -1e+30  ;;  %v6865_v0 = vsel %vm3404_vm2, %v7544_v18, -1e+30 }
 0x4bc   : > { %v6872_v34 = vsel %vm3404_vm2, %v7545_v59, -1e+30  ;;  %v6877_v32 = vsel %vm3404_vm2, %v7547_v22, -1e+30  ;;  %v7549_v45 = vld [vmem:[#allocation76_spill] sm:$0xff]  ;;  %v7551_v15 = vld [vmem:[#allocation78_spill] sm:$0xff] }
 0x4bd   : > { %7546 = vst [vmem:[#allocation90_spill] sm:$0xff] %v6872_v34  ;;  %7548 = vst [vmem:[#allocation91_spill] sm:$0xff] %v6877_v32  ;;  %v6884_v49 = vsel %vm3404_vm2, %v7549_v45, -1e+30  ;;  %v6889_v18 = vsel %vm3404_vm2, %v7551_v15, -1e+30 }
 0x4be   : > { %7550 = vst [vmem:[#allocation92_spill] sm:$0xff] %v6884_v49  ;;  %7552 = vst [vmem:[#allocation93_spill] sm:$0xff] %v6889_v18  ;;  %v7553_v59 = vld [vmem:[#allocation80_spill] sm:$0xff] }
 0x4bf   : > { %3489 = vmax.xlane.f32.xlu0 %v6620_v40  ;;  %3491 = vmax.xlane.f32.xlu1 %v6625_v58  ;;  %v6896_v22 = vsel %vm3404_vm2, %v7553_v59, -1e+30  ;;  %v7556_v45 = vld [vmem:[#allocation84_spill] sm:$0xff] }
 0x4c0   : > { %v6908_v15 = vsel %vm3404_vm2, %v7556_v45, -1e+30  ;;  %v6937_v45 = vsel %vm3404_vm2, %v6355_v8, -1e+30 }
 0x4c1   : > { %7557 = vst [vmem:[#allocation95_spill] sm:$0xff] %v6908_v15  ;;  %7563 = vst [vmem:[#allocation99_spill] sm:$0xff] %v6937_v45 }
 0x4c3   : > { %3493 = vmax.xlane.f32.xlu0 %v6632_v14  ;;  %3495 = vmax.xlane.f32.xlu1 %v6637_v33 }
 0x4c7   : > { %3497 = vmax.xlane.f32.xlu0 %v6644_v50  ;;  %3499 = vmax.xlane.f32.xlu1 %v6649_v7 }
 0x4cb   : > { %3501 = vmax.xlane.f32.xlu0 %v6656_v17  ;;  %3503 = vmax.xlane.f32.xlu1 %v6661_v48 }
 0x4cf   : > { %3505 = vmax.xlane.f32.xlu0 %v6668_v63  ;;  %3507 = vmax.xlane.f32.xlu1 %v6673_v19 }
 0x4d3   : > { %3509 = vmax.xlane.f32.xlu0 %v6680_v29  ;;  %3511 = vmax.xlane.f32.xlu1 %v6685_v44 }
 0x4d7   : > { %3513 = vmax.xlane.f32.xlu0 %v6692_v60  ;;  %3515 = vmax.xlane.f32.xlu1 %v6697_v21 }
 0x4db   : > { %3517 = vmax.xlane.f32.xlu0 %v6704_v10  ;;  %3519 = vmax.xlane.f32.xlu1 %v6709_v54 }
 0x4df   : > { %3521 = vmax.xlane.f32.xlu0 %v6716_v23  ;;  %3523 = vmax.xlane.f32.xlu1 %v6721_v46 }
 0x4e3   : > { %3525 = vmax.xlane.f32.xlu0 %v6728_v6  ;;  %3527 = vmax.xlane.f32.xlu1 %v6733_v39 }
 0x4e7   : > { %3529 = vmax.xlane.f32.xlu0 %v6740_v5  ;;  %3531 = vmax.xlane.f32.xlu1 %v6745_v38 }
 0x4eb   : > { %3533 = vmax.xlane.f32.xlu0 %v6752_v4  ;;  %3535 = vmax.xlane.f32.xlu1 %v6757_v36 }
 0x4ef   : > { %3537 = vmax.xlane.f32.xlu0 %v6764_v2  ;;  %3539 = vmax.xlane.f32.xlu1 %v6769_v25 }
 0x4f3   : > { %3541 = vmax.xlane.f32.xlu0 %v6776_v52  ;;  %3543 = vmax.xlane.f32.xlu1 %v6781_v26 }
 0x4f7   : > { %3545 = vmax.xlane.f32.xlu0 %v6788_v3  ;;  %3547 = vmax.xlane.f32.xlu1 %v6793_v35 }
 0x4fb   : > { %3549 = vmax.xlane.f32.xlu0 %v6800_v47  ;;  %3551 = vmax.xlane.f32.xlu1 %v6805_v13 }
 0x4ff   : > { %3553 = vmax.xlane.f32.xlu0 %v6812_v53  ;;  %3555 = vmax.xlane.f32.xlu1 %v6817_v24 }
 0x503   : > { %3557 = vmax.xlane.f32.xlu0 %v6824_v55  ;;  %3559 = vmax.xlane.f32.xlu1 %v6829_v37 }
 0x507   : > { %3561 = vmax.xlane.f32.xlu0 %v6836_v61  ;;  %3563 = vmax.xlane.f32.xlu1 %v6841_v28 }
 0x50b   : > { %3565 = vmax.xlane.f32.xlu0 %v6848_v30  ;;  %3567 = vmax.xlane.f32.xlu1 %v6853_v20 }
 0x50f   : > { %3569 = vmax.xlane.f32.xlu0 %v6860_v51  ;;  %3571 = vmax.xlane.f32.xlu1 %v6865_v0 }
 0x513   : > { %3573 = vmax.xlane.f32.xlu0 %v6872_v34  ;;  %3575 = vmax.xlane.f32.xlu1 %v6877_v32  ;;  %v7554_v32 = vld [vmem:[#allocation82_spill] sm:$0xff] }
 0x514   : > { %v6901_v34 = vsel %vm3404_vm2, %v7554_v32, -1e+30  ;;  %v7560_v32 = vld [vmem:[#allocation88_spill] sm:$0xff] }
 0x515   : > { %7555 = vst [vmem:[#allocation94_spill] sm:$0xff] %v6901_v34  ;;  %v6920_v59 = vsel %vm3404_vm2, %v7560_v32, -1e+30 }
 0x516   : > { %7561 = vst [vmem:[#allocation97_spill] sm:$0xff] %v6920_v59 }
 0x517   : > { %3577 = vmax.xlane.f32.xlu0 %v6884_v49  ;;  %3579 = vmax.xlane.f32.xlu1 %v6889_v18  ;;  %v7558_v18 = vld [vmem:[#allocation86_spill] sm:$0xff] }
 0x518   : > { %v6913_v49 = vsel %vm3404_vm2, %v7558_v18, -1e+30  ;;  %v6932_v18 = vsel %vm3404_vm2, %v6349_v1, -1e+30 }
 0x519   : > { %7559 = vst [vmem:[#allocation96_spill] sm:$0xff] %v6913_v49 }
 0x51b   : > { %3581 = vmax.xlane.f32.xlu0 %v6896_v22  ;;  %3583 = vmax.xlane.f32.xlu1 %v6901_v34  ;;  %v6925_v34 = vsel %vm3404_vm2, %v6343_v12, -1e+30 }
 0x51c   : > { %7562 = vst [vmem:[#allocation98_spill] sm:$0xff] %v6925_v34 }
 0x51f   : > { %3585 = vmax.xlane.f32.xlu0 %v6908_v15  ;;  %3587 = vmax.xlane.f32.xlu1 %v6913_v49 }
 0x523   : > { %3589 = vmax.xlane.f32.xlu0 %v6920_v59  ;;  %3591 = vmax.xlane.f32.xlu1 %v6925_v34 }
 0x527   : > { %3593 = vmax.xlane.f32.xlu0 %v6932_v18  ;;  %3595 = vmax.xlane.f32.xlu1 %v6937_v45 }
 0x534   : > { %v3470_v12 = vpop.xlane.xlu0 %3469  ;;  %v3474_v32 = vpop.xlane.xlu1 %3473 }
 0x535   : > { %v6942_v59 = vsub.f32 %v6560_v43, %v3470_v12  ;;  %v6945_v34 = vsub.f32 %v6565_v11, %v3474_v32 }
 0x537   : > { %7564 = vst [vmem:[#allocation100_spill] sm:$0xff] %v6942_v59  ;;  %7565 = vst [vmem:[#allocation101_spill] sm:$0xff] %v6945_v34  ;;  %v3661_v1 = vmul.f32 1.442695, %v6942_v59  ;;  %v3665_v49 = vmul.f32 1.442695, %v6945_v34 }
 0x538   : > { %v3472_v15 = vpop.xlane.xlu0 %3471  ;;  %v3476_v62 = vpop.xlane.xlu1 %3475 }
 0x539   : > { %4832 = vpow2.f32 %v3661_v1  ;;  %v6950_v8 = vsub.f32 %v6572_v57, %v3472_v15  ;;  %v6953_v45 = vsub.f32 %v6577_v41, %v3476_v62 }
 0x53a   : > { %4834 = vpow2.f32 %v3665_v49 }
 0x53b   : > { %v3663_v43 = vmul.f32 1.442695, %v6950_v8  ;;  %v3667_v12 = vmul.f32 1.442695, %v6953_v45 }
 0x53c   : > { %v3478_v11 = vpop.xlane.xlu0 %3477  ;;  %v3480_v32 = vpop.xlane.xlu1 %3479 }
 0x53d   : > { %4836 = vpow2.f32 %v3663_v43  ;;  %v6958_v59 = vsub.f32 %v6584_v16, %v3478_v11  ;;  %v6961_v34 = vsub.f32 %v6589_v42, %v3480_v32 }
 0x53e   : > { %4838 = vpow2.f32 %v3667_v12 }
 0x53f   : > { %v3669_v57 = vmul.f32 1.442695, %v6958_v59  ;;  %v3671_v41 = vmul.f32 1.442695, %v6961_v34 }
 0x540   : > { %v3482_v15 = vpop.xlane.xlu0 %3481  ;;  %v3484_v49 = vpop.xlane.xlu1 %3483 }
 0x541   : > { %4840 = vpow2.f32 %v3669_v57  ;;  %v6966_v1 = vsub.f32 %v6596_v31, %v3482_v15  ;;  %v6969_v62 = vsub.f32 %v6601_v56, %v3484_v49 }
 0x542   : > { %4842 = vpow2.f32 %v3671_v41 }
 0x543   : > { %7566 = vst [vmem:[#allocation102_spill] sm:$0xff] %v6969_v62  ;;  %v3673_v16 = vmul.f32 1.442695, %v6966_v1  ;;  %v3675_v42 = vmul.f32 1.442695, %v6969_v62 }
 0x544   : > { %v3486_v43 = vpop.xlane.xlu0 %3485  ;;  %v3488_v12 = vpop.xlane.xlu1 %3487 }
 0x545   : > { %4844 = vpow2.f32 %v3673_v16  ;;  %v6974_v11 = vsub.f32 %v6608_v9, %v3486_v43  ;;  %v6977_v32 = vsub.f32 %v6613_v27, %v3488_v12 }
 0x546   : > { %v4833_v57 = vpop.eup %4832  ;;  %4846 = vpow2.f32 %v3675_v42 }
 0x547   : > { %v3677_v31 = vmul.f32 1.442695, %v6974_v11  ;;  %3789 = vadd.xlane.f32.xlu0 %v4833_v57  ;;  %v3679_v56 = vmul.f32 1.442695, %v6977_v32  ;;  %v4835_v41 = vpop.eup %4834 }
 0x548   : > { %v3490_v15 = vpop.xlane.xlu0 %3489  ;;  %v3492_v49 = vpop.xlane.xlu1 %3491 }
 0x549   : > { %4848 = vpow2.f32 %v3677_v31  ;;  %v6982_v62 = vsub.f32 %v6620_v40, %v3490_v15  ;;  %v6985_v9 = vsub.f32 %v6625_v58, %v3492_v49 }
 0x54a   : > { %v4837_v16 = vpop.eup %4836  ;;  %4850 = vpow2.f32 %v3679_v56 }
 0x54b   : > { %v3681_v27 = vmul.f32 1.442695, %v6982_v62  ;;  %3793 = vadd.xlane.f32.xlu0 %v4835_v41  ;;  %3791 = vadd.xlane.f32.xlu1 %v4837_v16  ;;  %v3683_v42 = vmul.f32 1.442695, %v6985_v9  ;;  %v4839_v43 = vpop.eup %4838 }
 0x54c   : > { %v3494_v12 = vpop.xlane.xlu0 %3493  ;;  %v3496_v57 = vpop.xlane.xlu1 %3495 }
 0x54d   : > { %4852 = vpow2.f32 %v3681_v27  ;;  %v6990_v31 = vsub.f32 %v6632_v14, %v3494_v12  ;;  %v6993_v40 = vsub.f32 %v6637_v33, %v3496_v57 }
 0x54e   : > { %v4841_v58 = vpop.eup %4840  ;;  %4854 = vpow2.f32 %v3683_v42 }
 0x54f   : > { %v3685_v56 = vmul.f32 1.442695, %v6990_v31  ;;  %3795 = vadd.xlane.f32.xlu1 %v4839_v43  ;;  %3797 = vadd.xlane.f32.xlu0 %v4841_v58  ;;  %v3687_v41 = vmul.f32 1.442695, %v6993_v40  ;;  %v4843_v15 = vpop.eup %4842 }
 0x550   : > { %v3498_v49 = vpop.xlane.xlu0 %3497  ;;  %v3500_v16 = vpop.xlane.xlu1 %3499 }
 0x551   : > { %4856 = vpow2.f32 %v3685_v56  ;;  %v6998_v27 = vsub.f32 %v6644_v50, %v3498_v49  ;;  %v7001_v14 = vsub.f32 %v6649_v7, %v3500_v16 }
 0x552   : > { %v4845_v33 = vpop.eup %4844  ;;  %4858 = vpow2.f32 %v3687_v41 }
 0x553   : > { %v3689_v42 = vmul.f32 1.442695, %v6998_v27  ;;  %3799 = vadd.xlane.f32.xlu1 %v4843_v15  ;;  %3801 = vadd.xlane.f32.xlu0 %v4845_v33  ;;  %v3691_v43 = vmul.f32 1.442695, %v7001_v14  ;;  %v4847_v12 = vpop.eup %4846 }
 0x554   : > { %v3502_v57 = vpop.xlane.xlu0 %3501  ;;  %v3504_v58 = vpop.xlane.xlu1 %3503 }
 0x555   : > { %4860 = vpow2.f32 %v3689_v42  ;;  %v7006_v56 = vsub.f32 %v6656_v17, %v3502_v57  ;;  %v7009_v50 = vsub.f32 %v6661_v48, %v3504_v58 }
 0x556   : > { %v4849_v7 = vpop.eup %4848  ;;  %4862 = vpow2.f32 %v3691_v43 }
 0x557   : > { %v3693_v41 = vmul.f32 1.442695, %v7006_v56  ;;  %3803 = vadd.xlane.f32.xlu1 %v4847_v12  ;;  %3805 = vadd.xlane.f32.xlu0 %v4849_v7  ;;  %v3695_v15 = vmul.f32 1.442695, %v7009_v50  ;;  %v4851_v49 = vpop.eup %4850 }
 0x558   : > { %v3506_v16 = vpop.xlane.xlu0 %3505  ;;  %v3508_v33 = vpop.xlane.xlu1 %3507 }
 0x559   : > { %4864 = vpow2.f32 %v3693_v41  ;;  %v7014_v42 = vsub.f32 %v6668_v63, %v3506_v16  ;;  %v7017_v17 = vsub.f32 %v6673_v19, %v3508_v33 }
 0x55a   : > { %v4853_v48 = vpop.eup %4852  ;;  %4866 = vpow2.f32 %v3695_v15 }
 0x55b   : > { %v3697_v43 = vmul.f32 1.442695, %v7014_v42  ;;  %3807 = vadd.xlane.f32.xlu1 %v4851_v49  ;;  %3809 = vadd.xlane.f32.xlu0 %v4853_v48  ;;  %v3699_v12 = vmul.f32 1.442695, %v7017_v17  ;;  %v4855_v57 = vpop.eup %4854 }
 0x55c   : > { %v3510_v58 = vpop.xlane.xlu0 %3509  ;;  %v3512_v7 = vpop.xlane.xlu1 %3511 }
 0x55d   : > { %4868 = vpow2.f32 %v3697_v43  ;;  %v7022_v41 = vsub.f32 %v6680_v29, %v3510_v58  ;;  %v7025_v63 = vsub.f32 %v6685_v44, %v3512_v7 }
 0x55e   : > { %v4857_v19 = vpop.eup %4856  ;;  %4870 = vpow2.f32 %v3699_v12 }
 0x55f   : > { %v3701_v15 = vmul.f32 1.442695, %v7022_v41  ;;  %3811 = vadd.xlane.f32.xlu1 %v4855_v57  ;;  %3813 = vadd.xlane.f32.xlu0 %v4857_v19  ;;  %v3703_v49 = vmul.f32 1.442695, %v7025_v63  ;;  %v4859_v16 = vpop.eup %4858 }
 0x560   : > { %v3514_v33 = vpop.xlane.xlu0 %3513  ;;  %v3516_v48 = vpop.xlane.xlu1 %3515 }
 0x561   : > { %4872 = vpow2.f32 %v3701_v15  ;;  %v7030_v43 = vsub.f32 %v6692_v60, %v3514_v33  ;;  %v7033_v29 = vsub.f32 %v6697_v21, %v3516_v48 }
 0x562   : > { %v4861_v44 = vpop.eup %4860  ;;  %4874 = vpow2.f32 %v3703_v49 }
 0x563   : > { %v3705_v12 = vmul.f32 1.442695, %v7030_v43  ;;  %3815 = vadd.xlane.f32.xlu1 %v4859_v16  ;;  %3817 = vadd.xlane.f32.xlu0 %v4861_v44  ;;  %v3707_v57 = vmul.f32 1.442695, %v7033_v29  ;;  %v4863_v58 = vpop.eup %4862 }
 0x564   : > { %v3518_v7 = vpop.xlane.xlu0 %3517  ;;  %v3520_v19 = vpop.xlane.xlu1 %3519 }
 0x565   : > { %4876 = vpow2.f32 %v3705_v12  ;;  %v7038_v15 = vsub.f32 %v6704_v10, %v3518_v7  ;;  %v7041_v60 = vsub.f32 %v6709_v54, %v3520_v19 }
 0x566   : > { %v4865_v21 = vpop.eup %4864  ;;  %4878 = vpow2.f32 %v3707_v57 }
 0x567   : > { %v3709_v49 = vmul.f32 1.442695, %v7038_v15  ;;  %3819 = vadd.xlane.f32.xlu1 %v4863_v58  ;;  %3821 = vadd.xlane.f32.xlu0 %v4865_v21  ;;  %v3711_v16 = vmul.f32 1.442695, %v7041_v60  ;;  %v4867_v33 = vpop.eup %4866 }
 0x568   : > { %v3522_v48 = vpop.xlane.xlu0 %3521  ;;  %v3524_v44 = vpop.xlane.xlu1 %3523 }
 0x569   : > { %4880 = vpow2.f32 %v3709_v49  ;;  %v7046_v12 = vsub.f32 %v6716_v23, %v3522_v48  ;;  %v7049_v10 = vsub.f32 %v6721_v46, %v3524_v44 }
 0x56a   : > { %v4869_v54 = vpop.eup %4868  ;;  %4882 = vpow2.f32 %v3711_v16 }
 0x56b   : > { %v3713_v57 = vmul.f32 1.442695, %v7046_v12  ;;  %3823 = vadd.xlane.f32.xlu1 %v4867_v33  ;;  %3825 = vadd.xlane.f32.xlu0 %v4869_v54  ;;  %v3715_v58 = vmul.f32 1.442695, %v7049_v10  ;;  %v4871_v7 = vpop.eup %4870 }
 0x56c   : > { %v3526_v19 = vpop.xlane.xlu0 %3525  ;;  %v3528_v21 = vpop.xlane.xlu1 %3527 }
 0x56d   : > { %4884 = vpow2.f32 %v3713_v57  ;;  %v7054_v49 = vsub.f32 %v6728_v6, %v3526_v19  ;;  %v7057_v23 = vsub.f32 %v6733_v39, %v3528_v21 }
 0x56e   : > { %v4873_v46 = vpop.eup %4872  ;;  %4886 = vpow2.f32 %v3715_v58 }
 0x56f   : > { %v3717_v16 = vmul.f32 1.442695, %v7054_v49  ;;  %3827 = vadd.xlane.f32.xlu1 %v4871_v7  ;;  %3829 = vadd.xlane.f32.xlu0 %v4873_v46  ;;  %v3719_v33 = vmul.f32 1.442695, %v7057_v23  ;;  %v4875_v48 = vpop.eup %4874 }
 0x570   : > { %v3530_v44 = vpop.xlane.xlu0 %3529  ;;  %v3532_v54 = vpop.xlane.xlu1 %3531 }
 0x571   : > { %4888 = vpow2.f32 %v3717_v16  ;;  %v7062_v57 = vsub.f32 %v6740_v5, %v3530_v44  ;;  %v7065_v6 = vsub.f32 %v6745_v38, %v3532_v54 }
 0x572   : > { %v4877_v39 = vpop.eup %4876  ;;  %4890 = vpow2.f32 %v3719_v33 }
 0x573   : > { %v3721_v58 = vmul.f32 1.442695, %v7062_v57  ;;  %3831 = vadd.xlane.f32.xlu1 %v4875_v48  ;;  %3833 = vadd.xlane.f32.xlu0 %v4877_v39  ;;  %v3723_v7 = vmul.f32 1.442695, %v7065_v6  ;;  %v4879_v19 = vpop.eup %4878 }
 0x574   : > { %v3534_v21 = vpop.xlane.xlu0 %3533  ;;  %v3536_v46 = vpop.xlane.xlu1 %3535 }
 0x575   : > { %4892 = vpow2.f32 %v3721_v58  ;;  %v7070_v16 = vsub.f32 %v6752_v4, %v3534_v21  ;;  %v7073_v5 = vsub.f32 %v6757_v36, %v3536_v46 }
 0x576   : > { %v4881_v38 = vpop.eup %4880  ;;  %4894 = vpow2.f32 %v3723_v7 }
 0x577   : > { %v3725_v33 = vmul.f32 1.442695, %v7070_v16  ;;  %3835 = vadd.xlane.f32.xlu1 %v4879_v19  ;;  %3837 = vadd.xlane.f32.xlu0 %v4881_v38  ;;  %v3727_v48 = vmul.f32 1.442695, %v7073_v5  ;;  %v4883_v44 = vpop.eup %4882 }
 0x578   : > { %v3538_v54 = vpop.xlane.xlu0 %3537  ;;  %v3540_v39 = vpop.xlane.xlu1 %3539 }
 0x579   : > { %4896 = vpow2.f32 %v3725_v33  ;;  %v7078_v58 = vsub.f32 %v6764_v2, %v3538_v54  ;;  %v7081_v4 = vsub.f32 %v6769_v25, %v3540_v39 }
 0x57a   : > { %v4885_v36 = vpop.eup %4884  ;;  %4898 = vpow2.f32 %v3727_v48 }
 0x57b   : > { %v3729_v7 = vmul.f32 1.442695, %v7078_v58  ;;  %3839 = vadd.xlane.f32.xlu1 %v4883_v44  ;;  %3841 = vadd.xlane.f32.xlu0 %v4885_v36  ;;  %v3731_v19 = vmul.f32 1.442695, %v7081_v4  ;;  %v4887_v21 = vpop.eup %4886 }
 0x57c   : > { %v3542_v46 = vpop.xlane.xlu0 %3541  ;;  %v3544_v38 = vpop.xlane.xlu1 %3543 }
 0x57d   : > { %4900 = vpow2.f32 %v3729_v7  ;;  %v7086_v33 = vsub.f32 %v6776_v52, %v3542_v46  ;;  %v7089_v2 = vsub.f32 %v6781_v26, %v3544_v38 }
 0x57e   : > { %v4889_v25 = vpop.eup %4888  ;;  %4902 = vpow2.f32 %v3731_v19 }
 0x57f   : > { %v3733_v48 = vmul.f32 1.442695, %v7086_v33  ;;  %3843 = vadd.xlane.f32.xlu1 %v4887_v21  ;;  %3845 = vadd.xlane.f32.xlu0 %v4889_v25  ;;  %v3735_v44 = vmul.f32 1.442695, %v7089_v2  ;;  %v4891_v54 = vpop.eup %4890 }
 0x580   : > { %v3546_v39 = vpop.xlane.xlu0 %3545  ;;  %v3548_v36 = vpop.xlane.xlu1 %3547 }
 0x581   : > { %4904 = vpow2.f32 %v3733_v48  ;;  %v7094_v7 = vsub.f32 %v6788_v3, %v3546_v39  ;;  %v7097_v52 = vsub.f32 %v6793_v35, %v3548_v36 }
 0x582   : > { %v4893_v26 = vpop.eup %4892  ;;  %4906 = vpow2.f32 %v3735_v44 }
 0x583   : > { %v3737_v19 = vmul.f32 1.442695, %v7094_v7  ;;  %3847 = vadd.xlane.f32.xlu1 %v4891_v54  ;;  %3849 = vadd.xlane.f32.xlu0 %v4893_v26  ;;  %v3739_v21 = vmul.f32 1.442695, %v7097_v52  ;;  %v4895_v46 = vpop.eup %4894 }
 0x584   : > { %v3550_v38 = vpop.xlane.xlu0 %3549  ;;  %v3552_v25 = vpop.xlane.xlu1 %3551 }
 0x585   : > { %4908 = vpow2.f32 %v3737_v19  ;;  %v7102_v48 = vsub.f32 %v6800_v47, %v3550_v38  ;;  %v7105_v3 = vsub.f32 %v6805_v13, %v3552_v25 }
 0x586   : > { %v4897_v35 = vpop.eup %4896  ;;  %4910 = vpow2.f32 %v3739_v21 }
 0x587   : > { %v3741_v44 = vmul.f32 1.442695, %v7102_v48  ;;  %3851 = vadd.xlane.f32.xlu1 %v4895_v46  ;;  %3853 = vadd.xlane.f32.xlu0 %v4897_v35  ;;  %v3743_v54 = vmul.f32 1.442695, %v7105_v3  ;;  %v4899_v39 = vpop.eup %4898 }
 0x588   : > { %v3554_v36 = vpop.xlane.xlu0 %3553  ;;  %v3556_v26 = vpop.xlane.xlu1 %3555 }
 0x589   : > { %4912 = vpow2.f32 %v3741_v44  ;;  %v7110_v19 = vsub.f32 %v6812_v53, %v3554_v36  ;;  %v7113_v47 = vsub.f32 %v6817_v24, %v3556_v26 }
 0x58a   : > { %v4901_v13 = vpop.eup %4900  ;;  %4914 = vpow2.f32 %v3743_v54 }
 0x58b   : > { %v3745_v21 = vmul.f32 1.442695, %v7110_v19  ;;  %3855 = vadd.xlane.f32.xlu1 %v4899_v39  ;;  %3857 = vadd.xlane.f32.xlu0 %v4901_v13  ;;  %v3747_v46 = vmul.f32 1.442695, %v7113_v47  ;;  %v4903_v38 = vpop.eup %4902 }
 0x58c   : > { %v3558_v25 = vpop.xlane.xlu0 %3557  ;;  %v3560_v35 = vpop.xlane.xlu1 %3559 }
 0x58d   : > { %4916 = vpow2.f32 %v3745_v21  ;;  %v7118_v44 = vsub.f32 %v6824_v55, %v3558_v25  ;;  %v7121_v53 = vsub.f32 %v6829_v37, %v3560_v35 }
 0x58e   : > { %v4905_v24 = vpop.eup %4904  ;;  %4918 = vpow2.f32 %v3747_v46 }
 0x58f   : > { %v3749_v54 = vmul.f32 1.442695, %v7118_v44  ;;  %3859 = vadd.xlane.f32.xlu1 %v4903_v38  ;;  %3861 = vadd.xlane.f32.xlu0 %v4905_v24  ;;  %v3751_v39 = vmul.f32 1.442695, %v7121_v53  ;;  %v4907_v36 = vpop.eup %4906 }
 0x590   : > { %v3562_v26 = vpop.xlane.xlu0 %3561  ;;  %v3564_v13 = vpop.xlane.xlu1 %3563 }
 0x591   : > { %4920 = vpow2.f32 %v3749_v54  ;;  %v7126_v21 = vsub.f32 %v6836_v61, %v3562_v26  ;;  %v7129_v55 = vsub.f32 %v6841_v28, %v3564_v13 }
 0x592   : > { %v4909_v37 = vpop.eup %4908  ;;  %4922 = vpow2.f32 %v3751_v39 }
 0x593   : > { %v3753_v46 = vmul.f32 1.442695, %v7126_v21  ;;  %3863 = vadd.xlane.f32.xlu1 %v4907_v36  ;;  %3865 = vadd.xlane.f32.xlu0 %v4909_v37  ;;  %v3755_v38 = vmul.f32 1.442695, %v7129_v55  ;;  %v4911_v25 = vpop.eup %4910 }
 0x594   : > { %v3566_v35 = vpop.xlane.xlu0 %3565  ;;  %v3568_v24 = vpop.xlane.xlu1 %3567 }
 0x595   : > { %4924 = vpow2.f32 %v3753_v46  ;;  %v7134_v54 = vsub.f32 %v6848_v30, %v3566_v35  ;;  %v7137_v61 = vsub.f32 %v6853_v20, %v3568_v24 }
 0x596   : > { %v4913_v28 = vpop.eup %4912  ;;  %4926 = vpow2.f32 %v3755_v38 }
 0x597   : > { %7567 = vst [vmem:[#allocation103_spill] sm:$0xff] %v7137_v61  ;;  %v3757_v39 = vmul.f32 1.442695, %v7134_v54  ;;  %3867 = vadd.xlane.f32.xlu1 %v4911_v25  ;;  %3869 = vadd.xlane.f32.xlu0 %v4913_v28  ;;  %v3759_v36 = vmul.f32 1.442695, %v7137_v61  ;;  %v4915_v26 = vpop.eup %4914  ;;  %v7570_v61 = vld [vmem:[#allocation90_spill] sm:$0xff] }
 0x598   : > { %v3570_v13 = vpop.xlane.xlu0 %3569  ;;  %v3572_v37 = vpop.xlane.xlu1 %3571 }
 0x599   : > { %4928 = vpow2.f32 %v3757_v39  ;;  %v7142_v46 = vsub.f32 %v6860_v51, %v3570_v13  ;;  %v7145_v30 = vsub.f32 %v6865_v0, %v3572_v37  ;;  %v7571_v51 = vld [vmem:[#allocation91_spill] sm:$0xff] }
 0x59a   : > { %v4917_v20 = vpop.eup %4916  ;;  %4930 = vpow2.f32 %v3759_v36 }
 0x59b   : > { %7568 = vst [vmem:[#allocation104_spill] sm:$0xff] %v7142_v46  ;;  %7569 = vst [vmem:[#allocation105_spill] sm:$0xff] %v7145_v30  ;;  %v3761_v38 = vmul.f32 1.442695, %v7142_v46  ;;  %3871 = vadd.xlane.f32.xlu1 %v4915_v26  ;;  %3873 = vadd.xlane.f32.xlu0 %v4917_v20  ;;  %v3763_v25 = vmul.f32 1.442695, %v7145_v30  ;;  %v4919_v35 = vpop.eup %4918 }
 0x59c   : > { %v3574_v24 = vpop.xlane.xlu0 %3573  ;;  %v3576_v28 = vpop.xlane.xlu1 %3575  ;;  %v7573_v46 = vld [vmem:[#allocation92_spill] sm:$0xff] }
 0x59d   : > { %4932 = vpow2.f32 %v3761_v38  ;;  %v7150_v39 = vsub.f32 %v7570_v61, %v3574_v24  ;;  %v7153_v13 = vsub.f32 %v7571_v51, %v3576_v28  ;;  %v7575_v61 = vld [vmem:[#allocation93_spill] sm:$0xff] }
 0x59e   : > { %v4921_v0 = vpop.eup %4920  ;;  %4934 = vpow2.f32 %v3763_v25 }
 0x59f   : > { %7572 = vst [vmem:[#allocation90_spill] sm:$0xff] %v7153_v13  ;;  %v3765_v36 = vmul.f32 1.442695, %v7150_v39  ;;  %3875 = vadd.xlane.f32.xlu1 %v4919_v35  ;;  %3877 = vadd.xlane.f32.xlu0 %v4921_v0  ;;  %v3767_v26 = vmul.f32 1.442695, %v7153_v13  ;;  %v4923_v37 = vpop.eup %4922 }
 0x5a0   : > { %v3578_v20 = vpop.xlane.xlu0 %3577  ;;  %v3580_v30 = vpop.xlane.xlu1 %3579 }
 0x5a1   : > { %4936 = vpow2.f32 %v3765_v36  ;;  %v7158_v38 = vsub.f32 %v7573_v46, %v3578_v20  ;;  %v7161_v24 = vsub.f32 %v7575_v61, %v3580_v30  ;;  %v7578_v46 = vld [vmem:[#allocation94_spill] sm:$0xff] }
 0x5a2   : > { %v4925_v28 = vpop.eup %4924  ;;  %4938 = vpow2.f32 %v3767_v26 }
 0x5a3   : > { %7574 = vst [vmem:[#allocation91_spill] sm:$0xff] %v7158_v38  ;;  %7576 = vst [vmem:[#allocation92_spill] sm:$0xff] %v7161_v24  ;;  %v3769_v25 = vmul.f32 1.442695, %v7158_v38  ;;  %3879 = vadd.xlane.f32.xlu1 %v4923_v37  ;;  %3881 = vadd.xlane.f32.xlu0 %v4925_v28  ;;  %v3771_v35 = vmul.f32 1.442695, %v7161_v24  ;;  %v4927_v51 = vpop.eup %4926 }
 0x5a4   : > { %v3582_v0 = vpop.xlane.xlu0 %3581  ;;  %v3584_v13 = vpop.xlane.xlu1 %3583  ;;  %v7580_v38 = vld [vmem:[#allocation95_spill] sm:$0xff] }
 0x5a5   : > { %4940 = vpow2.f32 %v3769_v25  ;;  %v7166_v36 = vsub.f32 %v6896_v22, %v3582_v0  ;;  %v7169_v20 = vsub.f32 %v7578_v46, %v3584_v13  ;;  %v7582_v22 = vld [vmem:[#allocation96_spill] sm:$0xff] }
 0x5a6   : > { %v4929_v30 = vpop.eup %4928  ;;  %4942 = vpow2.f32 %v3771_v35 }
 0x5a7   : > { %7577 = vst [vmem:[#allocation93_spill] sm:$0xff] %v7166_v36  ;;  %7579 = vst [vmem:[#allocation94_spill] sm:$0xff] %v7169_v20  ;;  %v3773_v26 = vmul.f32 1.442695, %v7166_v36  ;;  %3883 = vadd.xlane.f32.xlu1 %v4927_v51  ;;  %3885 = vadd.xlane.f32.xlu0 %v4929_v30  ;;  %v3775_v37 = vmul.f32 1.442695, %v7169_v20  ;;  %v4931_v61 = vpop.eup %4930 }
 0x5a8   : > { %v3586_v28 = vpop.xlane.xlu0 %3585  ;;  %v3588_v24 = vpop.xlane.xlu1 %3587  ;;  %v7584_v36 = vld [vmem:[#allocation97_spill] sm:$0xff] }
 0x5a9   : > { %4944 = vpow2.f32 %v3773_v26  ;;  %v7174_v25 = vsub.f32 %v7580_v38, %v3586_v28  ;;  %v7177_v0 = vsub.f32 %v7582_v22, %v3588_v24  ;;  %v7586_v38 = vld [vmem:[#allocation98_spill] sm:$0xff] }
 0x5aa   : > { %v4933_v13 = vpop.eup %4932  ;;  %4946 = vpow2.f32 %v3775_v37 }
 0x5ab   : > { %7581 = vst [vmem:[#allocation95_spill] sm:$0xff] %v7174_v25  ;;  %7583 = vst [vmem:[#allocation96_spill] sm:$0xff] %v7177_v0  ;;  %v3777_v35 = vmul.f32 1.442695, %v7174_v25  ;;  %3887 = vadd.xlane.f32.xlu1 %v4931_v61  ;;  %3889 = vadd.xlane.f32.xlu0 %v4933_v13  ;;  %v3779_v51 = vmul.f32 1.442695, %v7177_v0  ;;  %v4935_v46 = vpop.eup %4934 }
 0x5ac   : > { %v3590_v30 = vpop.xlane.xlu0 %3589  ;;  %v3592_v20 = vpop.xlane.xlu1 %3591 }
 0x5ad   : > { %4948 = vpow2.f32 %v3777_v35  ;;  %v7182_v26 = vsub.f32 %v7584_v36, %v3590_v30  ;;  %v7185_v28 = vsub.f32 %v7586_v38, %v3592_v20  ;;  %v7589_v36 = vld [vmem:[#allocation99_spill] sm:$0xff] }
 0x5ae   : > { %v4937_v24 = vpop.eup %4936  ;;  %4950 = vpow2.f32 %v3779_v51 }
 0x5af   : > { %7585 = vst [vmem:[#allocation97_spill] sm:$0xff] %v7182_v26  ;;  %7587 = vst [vmem:[#allocation98_spill] sm:$0xff] %v7185_v28  ;;  %v3781_v37 = vmul.f32 1.442695, %v7182_v26  ;;  %3891 = vadd.xlane.f32.xlu1 %v4935_v46  ;;  %3893 = vadd.xlane.f32.xlu0 %v4937_v24  ;;  %v3783_v61 = vmul.f32 1.442695, %v7185_v28  ;;  %v4939_v22 = vpop.eup %4938 }
 0x5b0   : > { %v3594_v13 = vpop.xlane.xlu0 %3593  ;;  %v3596_v0 = vpop.xlane.xlu1 %3595  ;;  %v7592_v26 = vld [vmem:[#allocation101_spill] sm:$0xff] }
 0x5b1   : > { %4952 = vpow2.f32 %v3781_v37  ;;  %v7190_v35 = vsub.f32 %v6932_v18, %v3594_v13  ;;  %v7193_v30 = vsub.f32 %v7589_v36, %v3596_v0 }
 0x5b2   : > { %v4941_v20 = vpop.eup %4940  ;;  %4954 = vpow2.f32 %v3783_v61 }
 0x5b3   : > { %7588 = vst [vmem:[#allocation106_spill] sm:$0xff] %v7190_v35  ;;  %7590 = vst [vmem:[#allocation99_spill] sm:$0xff] %v7193_v30  ;;  %v3785_v51 = vmul.f32 1.442695, %v7190_v35  ;;  %3895 = vadd.xlane.f32.xlu1 %v4939_v22  ;;  %3897 = vadd.xlane.f32.xlu0 %v4941_v20  ;;  %v3787_v46 = vmul.f32 1.442695, %v7193_v30  ;;  %v4943_v38 = vpop.eup %4942 }
 0x5b4   : > { %v7591_v30 = vld [vmem:[#allocation100_spill] sm:$0xff] }
 0x5b5   : > { %4956 = vpow2.f32 %v3785_v51 }
 0x5b6   : > { %v4945_v24 = vpop.eup %4944  ;;  %4958 = vpow2.f32 %v3787_v46 }
 0x5b7   : > { %3899 = vadd.xlane.f32.xlu1 %v4943_v38  ;;  %3901 = vadd.xlane.f32.xlu0 %v4945_v24  ;;  %v4947_v37 = vpop.eup %4946 }
 0x5ba   : > { %v4949_v18 = vpop.eup %4948 }
 0x5bb   : > { %3903 = vadd.xlane.f32.xlu1 %v4947_v37  ;;  %3905 = vadd.xlane.f32.xlu0 %v4949_v18  ;;  %v4951_v0 = vpop.eup %4950 }
 0x5be   : > { %v4953_v13 = vpop.eup %4952 }
 0x5bf   : > { %3907 = vadd.xlane.f32.xlu1 %v4951_v0  ;;  %3909 = vadd.xlane.f32.xlu0 %v4953_v13  ;;  %v4955_v61 = vpop.eup %4954 }
 0x5c2   : > { %v4957_v36 = vpop.eup %4956 }
 0x5c3   : > { %3911 = vadd.xlane.f32.xlu1 %v4955_v61  ;;  %3913 = vadd.xlane.f32.xlu0 %v4957_v36  ;;  %v4959_v22 = vpop.eup %4958 }
 0x5c7   : > { %3915 = vadd.xlane.f32.xlu1 %v4959_v22 }
 0x5d0   : > { %v3790_v20 = vpop.xlane.xlu0 %3789 }
 0x5d1   : > { %4960 = vlog2.f32 %v3790_v20 }
 0x5d4   : > { %v3792_v51 = vpop.xlane.xlu1 %3791  ;;  %v3794_v46 = vpop.xlane.xlu0 %3793 }
 0x5d5   : > { %4962 = vlog2.f32 %v3792_v51 }
 0x5d6   : > { %4964 = vlog2.f32 %v3794_v46 }
 0x5d8   : > { %v3796_v38 = vpop.xlane.xlu1 %3795  ;;  %v3798_v24 = vpop.xlane.xlu0 %3797 }
 0x5d9   : > { %4966 = vlog2.f32 %v3796_v38 }
 0x5da   : > { %4968 = vlog2.f32 %v3798_v24 }
 0x5dc   : > { %v3800_v37 = vpop.xlane.xlu1 %3799  ;;  %v3802_v18 = vpop.xlane.xlu0 %3801 }
 0x5dd   : > { %4970 = vlog2.f32 %v3800_v37 }
 0x5de   : > { %v4961_v0 = vpop.eup %4960  ;;  %4972 = vlog2.f32 %v3802_v18 }
 0x5df   : > { %v3918_v13 = vmul.f32 0.6931472, %v4961_v0 }
 0x5e0   : > { %v3804_v61 = vpop.xlane.xlu1 %3803  ;;  %v3806_v36 = vpop.xlane.xlu0 %3805 }
 0x5e1   : > { %v4045_v22 = vsub.f32 %v7591_v30, %v3918_v13  ;;  %4974 = vlog2.f32 %v3804_v61 }
 0x5e2   : > { %v4963_v20 = vpop.eup %4962  ;;  %4976 = vlog2.f32 %v3806_v36 }
 0x5e3   : > { %v4965_v35 = vpop.eup %4964  ;;  %4109 = vst [vmem:[#allocation9] sm:$0xff] %v4045_v22  ;;  %v3920_v51 = vmul.f32 0.6931472, %v4963_v20 }
 0x5e4   : > { %v3922_v46 = vmul.f32 0.6931472, %v4965_v35  ;;  %v3808_v28 = vpop.xlane.xlu1 %3807  ;;  %v3810_v38 = vpop.xlane.xlu0 %3809 }
 0x5e5   : > { %v4046_v24 = vsub.f32 %v6950_v8, %v3920_v51  ;;  %4978 = vlog2.f32 %v3808_v28 }
 0x5e6   : > { %v4967_v37 = vpop.eup %4966  ;;  %v4047_v18 = vsub.f32 %v7592_v26, %v3922_v46  ;;  %4980 = vlog2.f32 %v3810_v38 }
 0x5e7   : > { %v4969_v0 = vpop.eup %4968  ;;  %4110 = vst [vmem:[#allocation9 + $0x8] sm:$0xff] %v4046_v24  ;;  %v3924_v25 = vmul.f32 0.6931472, %v4967_v37 }
 0x5e8   : > { %4111 = vst [vmem:[#allocation9 + $0x10] sm:$0xff] %v4047_v18  ;;  %v3926_v30 = vmul.f32 0.6931472, %v4969_v0  ;;  %v3812_v13 = vpop.xlane.xlu1 %3811  ;;  %v3814_v61 = vpop.xlane.xlu0 %3813  ;;  %v7593_v0 = vld [vmem:[#allocation102_spill] sm:$0xff] }
 0x5e9   : > { %v4048_v36 = vsub.f32 %v6953_v45, %v3924_v25  ;;  %4982 = vlog2.f32 %v3812_v13 }
 0x5ea   : > { %v4971_v35 = vpop.eup %4970  ;;  %v4049_v22 = vsub.f32 %v6958_v59, %v3926_v30  ;;  %4984 = vlog2.f32 %v3814_v61 }
 0x5eb   : > { %v4973_v8 = vpop.eup %4972  ;;  %4112 = vst [vmem:[#allocation9 + $0x18] sm:$0xff] %v4048_v36  ;;  %v3928_v28 = vmul.f32 0.6931472, %v4971_v35 }
 0x5ec   : > { %4113 = vst [vmem:[#allocation9 + $0x20] sm:$0xff] %v4049_v22  ;;  %v3930_v26 = vmul.f32 0.6931472, %v4973_v8  ;;  %v3816_v20 = vpop.xlane.xlu1 %3815  ;;  %v3818_v51 = vpop.xlane.xlu0 %3817 }
 0x5ed   : > { %v4050_v46 = vsub.f32 %v6961_v34, %v3928_v28  ;;  %4986 = vlog2.f32 %v3816_v20 }
 0x5ee   : > { %v4975_v38 = vpop.eup %4974  ;;  %v4051_v24 = vsub.f32 %v6966_v1, %v3930_v26  ;;  %4988 = vlog2.f32 %v3818_v51 }
 0x5ef   : > { %v4977_v45 = vpop.eup %4976  ;;  %4114 = vst [vmem:[#allocation9 + $0x28] sm:$0xff] %v4050_v46  ;;  %v3932_v25 = vmul.f32 0.6931472, %v4975_v38 }
 0x5f0   : > { %4115 = vst [vmem:[#allocation9 + $0x30] sm:$0xff] %v4051_v24  ;;  %v3934_v59 = vmul.f32 0.6931472, %v4977_v45  ;;  %v3820_v37 = vpop.xlane.xlu1 %3819  ;;  %v3822_v18 = vpop.xlane.xlu0 %3821 }
 0x5f1   : > { %v4052_v30 = vsub.f32 %v7593_v0, %v3932_v25  ;;  %4990 = vlog2.f32 %v3820_v37 }
 0x5f2   : > { %v4979_v13 = vpop.eup %4978  ;;  %v4053_v61 = vsub.f32 %v6974_v11, %v3934_v59  ;;  %4992 = vlog2.f32 %v3822_v18 }
 0x5f3   : > { %v4981_v34 = vpop.eup %4980  ;;  %4116 = vst [vmem:[#allocation9 + $0x38] sm:$0xff] %v4052_v30  ;;  %v3936_v36 = vmul.f32 0.6931472, %v4979_v13 }
 0x5f4   : > { %4117 = vst [vmem:[#allocation9 + $0x40] sm:$0xff] %v4053_v61  ;;  %v3938_v1 = vmul.f32 0.6931472, %v4981_v34  ;;  %v3824_v35 = vpop.xlane.xlu1 %3823  ;;  %v3826_v22 = vpop.xlane.xlu0 %3825 }
 0x5f5   : > { %v4054_v8 = vsub.f32 %v6977_v32, %v3936_v36  ;;  %4994 = vlog2.f32 %v3824_v35 }
 0x5f6   : > { %v4983_v28 = vpop.eup %4982  ;;  %v4055_v26 = vsub.f32 %v6982_v62, %v3938_v1  ;;  %4996 = vlog2.f32 %v3826_v22 }
 0x5f7   : > { %v4985_v20 = vpop.eup %4984  ;;  %4118 = vst [vmem:[#allocation9 + $0x48] sm:$0xff] %v4054_v8  ;;  %v3940_v51 = vmul.f32 0.6931472, %v4983_v28 }
 0x5f8   : > { %4119 = vst [vmem:[#allocation9 + $0x50] sm:$0xff] %v4055_v26  ;;  %v3942_v11 = vmul.f32 0.6931472, %v4985_v20  ;;  %v3828_v46 = vpop.xlane.xlu1 %3827  ;;  %v3830_v38 = vpop.xlane.xlu0 %3829 }
 0x5f9   : > { %v4056_v24 = vsub.f32 %v6985_v9, %v3940_v51  ;;  %4998 = vlog2.f32 %v3828_v46 }
 0x5fa   : > { %v4987_v45 = vpop.eup %4986  ;;  %v4057_v25 = vsub.f32 %v6990_v31, %v3942_v11  ;;  %5000 = vlog2.f32 %v3830_v38 }
 0x5fb   : > { %v4989_v32 = vpop.eup %4988  ;;  %4120 = vst [vmem:[#allocation9 + $0x58] sm:$0xff] %v4056_v24  ;;  %v3944_v59 = vmul.f32 0.6931472, %v4987_v45 }
 0x5fc   : > { %4121 = vst [vmem:[#allocation9 + $0x60] sm:$0xff] %v4057_v25  ;;  %v3946_v62 = vmul.f32 0.6931472, %v4989_v32  ;;  %v3832_v37 = vpop.xlane.xlu1 %3831  ;;  %v3834_v18 = vpop.xlane.xlu0 %3833 }
 0x5fd   : > { %v4058_v0 = vsub.f32 %v6993_v40, %v3944_v59  ;;  %5002 = vlog2.f32 %v3832_v37 }
 0x5fe   : > { %v4991_v30 = vpop.eup %4990  ;;  %v4059_v13 = vsub.f32 %v6998_v27, %v3946_v62  ;;  %5004 = vlog2.f32 %v3834_v18 }
 0x5ff   : > { %v4993_v9 = vpop.eup %4992  ;;  %4122 = vst [vmem:[#allocation9 + $0x68] sm:$0xff] %v4058_v0  ;;  %v3948_v61 = vmul.f32 0.6931472, %v4991_v30 }
 0x600   : > { %4123 = vst [vmem:[#allocation9 + $0x70] sm:$0xff] %v4059_v13  ;;  %v3950_v31 = vmul.f32 0.6931472, %v4993_v9  ;;  %v3836_v34 = vpop.xlane.xlu1 %3835  ;;  %v3838_v36 = vpop.xlane.xlu0 %3837 }
 0x601   : > { %v4060_v1 = vsub.f32 %v7001_v14, %v3948_v61  ;;  %5006 = vlog2.f32 %v3836_v34 }
 0x602   : > { %v4995_v35 = vpop.eup %4994  ;;  %v4061_v22 = vsub.f32 %v7006_v56, %v3950_v31  ;;  %5008 = vlog2.f32 %v3838_v36 }
 0x603   : > { %v4997_v40 = vpop.eup %4996  ;;  %4124 = vst [vmem:[#allocation9 + $0x78] sm:$0xff] %v4060_v1  ;;  %v3952_v8 = vmul.f32 0.6931472, %v4995_v35 }
 0x604   : > { %4125 = vst [vmem:[#allocation9 + $0x80] sm:$0xff] %v4061_v22  ;;  %v3954_v27 = vmul.f32 0.6931472, %v4997_v40  ;;  %v3840_v28 = vpop.xlane.xlu1 %3839  ;;  %v3842_v26 = vpop.xlane.xlu0 %3841 }
 0x605   : > { %v4062_v20 = vsub.f32 %v7009_v50, %v3952_v8  ;;  %5010 = vlog2.f32 %v3840_v28 }
 0x606   : > { %v4999_v51 = vpop.eup %4998  ;;  %v4063_v11 = vsub.f32 %v7014_v42, %v3954_v27  ;;  %5012 = vlog2.f32 %v3842_v26 }
 0x607   : > { %v5001_v14 = vpop.eup %5000  ;;  %4126 = vst [vmem:[#allocation9 + $0x88] sm:$0xff] %v4062_v20  ;;  %v3956_v46 = vmul.f32 0.6931472, %v4999_v51 }
 0x608   : > { %4127 = vst [vmem:[#allocation9 + $0x90] sm:$0xff] %v4063_v11  ;;  %v3958_v56 = vmul.f32 0.6931472, %v5001_v14  ;;  %v3844_v38 = vpop.xlane.xlu1 %3843  ;;  %v3846_v24 = vpop.xlane.xlu0 %3845 }
 0x609   : > { %v4064_v45 = vsub.f32 %v7017_v17, %v3956_v46  ;;  %5014 = vlog2.f32 %v3844_v38 }
 0x60a   : > { %v5003_v25 = vpop.eup %5002  ;;  %v4065_v32 = vsub.f32 %v7022_v41, %v3958_v56  ;;  %5016 = vlog2.f32 %v3846_v24 }
 0x60b   : > { %v5005_v50 = vpop.eup %5004  ;;  %4128 = vst [vmem:[#allocation9 + $0x98] sm:$0xff] %v4064_v45  ;;  %v3960_v59 = vmul.f32 0.6931472, %v5003_v25 }
 0x60c   : > { %4129 = vst [vmem:[#allocation9 + $0xa0] sm:$0xff] %v4065_v32  ;;  %v3962_v42 = vmul.f32 0.6931472, %v5005_v50  ;;  %v3848_v62 = vpop.xlane.xlu1 %3847  ;;  %v3850_v37 = vpop.xlane.xlu0 %3849 }
 0x60d   : > { %v4066_v18 = vsub.f32 %v7025_v63, %v3960_v59  ;;  %5018 = vlog2.f32 %v3848_v62 }
 0x60e   : > { %v5007_v0 = vpop.eup %5006  ;;  %v4067_v30 = vsub.f32 %v7030_v43, %v3962_v42  ;;  %5020 = vlog2.f32 %v3850_v37 }
 0x60f   : > { %v5009_v17 = vpop.eup %5008  ;;  %4130 = vst [vmem:[#allocation9 + $0xa8] sm:$0xff] %v4066_v18  ;;  %v3964_v13 = vmul.f32 0.6931472, %v5007_v0 }
 0x610   : > { %4131 = vst [vmem:[#allocation9 + $0xb0] sm:$0xff] %v4067_v30  ;;  %v3966_v41 = vmul.f32 0.6931472, %v5009_v17  ;;  %v3852_v9 = vpop.xlane.xlu1 %3851  ;;  %v3854_v61 = vpop.xlane.xlu0 %3853 }
 0x611   : > { %v4068_v31 = vsub.f32 %v7033_v29, %v3964_v13  ;;  %5022 = vlog2.f32 %v3852_v9 }
 0x612   : > { %v5011_v34 = vpop.eup %5010  ;;  %v4069_v36 = vsub.f32 %v7038_v15, %v3966_v41  ;;  %5024 = vlog2.f32 %v3854_v61 }
 0x613   : > { %v5013_v63 = vpop.eup %5012  ;;  %4132 = vst [vmem:[#allocation9 + $0xb8] sm:$0xff] %v4068_v31  ;;  %v3968_v1 = vmul.f32 0.6931472, %v5011_v34 }
 0x614   : > { %4133 = vst [vmem:[#allocation9 + $0xc0] sm:$0xff] %v4069_v36  ;;  %v3970_v43 = vmul.f32 0.6931472, %v5013_v63  ;;  %v3856_v35 = vpop.xlane.xlu1 %3855  ;;  %v3858_v22 = vpop.xlane.xlu0 %3857 }
 0x615   : > { %v4070_v40 = vsub.f32 %v7041_v60, %v3968_v1  ;;  %5026 = vlog2.f32 %v3856_v35 }
 0x616   : > { %v5015_v8 = vpop.eup %5014  ;;  %v4071_v27 = vsub.f32 %v7046_v12, %v3970_v43  ;;  %5028 = vlog2.f32 %v3858_v22 }
 0x617   : > { %v5017_v29 = vpop.eup %5016  ;;  %4134 = vst [vmem:[#allocation9 + $0xc8] sm:$0xff] %v4070_v40  ;;  %v3972_v28 = vmul.f32 0.6931472, %v5015_v8 }
 0x618   : > { %4135 = vst [vmem:[#allocation9 + $0xd0] sm:$0xff] %v4071_v27  ;;  %v3974_v15 = vmul.f32 0.6931472, %v5017_v29  ;;  %v3860_v26 = vpop.xlane.xlu1 %3859  ;;  %v3862_v20 = vpop.xlane.xlu0 %3861 }
 0x619   : > { %v4072_v51 = vsub.f32 %v7049_v10, %v3972_v28  ;;  %5030 = vlog2.f32 %v3860_v26 }
 0x61a   : > { %v5019_v11 = vpop.eup %5018  ;;  %v4073_v14 = vsub.f32 %v7054_v49, %v3974_v15  ;;  %5032 = vlog2.f32 %v3862_v20 }
 0x61b   : > { %v5021_v60 = vpop.eup %5020  ;;  %4136 = vst [vmem:[#allocation9 + $0xd8] sm:$0xff] %v4072_v51  ;;  %v3976_v46 = vmul.f32 0.6931472, %v5019_v11 }
 0x61c   : > { %4137 = vst [vmem:[#allocation9 + $0xe0] sm:$0xff] %v4073_v14  ;;  %v3978_v12 = vmul.f32 0.6931472, %v5021_v60  ;;  %v3864_v56 = vpop.xlane.xlu1 %3863  ;;  %v3866_v38 = vpop.xlane.xlu0 %3865 }
 0x61d   : > { %v4074_v24 = vsub.f32 %v7057_v23, %v3976_v46  ;;  %5034 = vlog2.f32 %v3864_v56 }
 0x61e   : > { %v5023_v45 = vpop.eup %5022  ;;  %v4075_v25 = vsub.f32 %v7062_v57, %v3978_v12  ;;  %5036 = vlog2.f32 %v3866_v38 }
 0x61f   : > { %v5025_v10 = vpop.eup %5024  ;;  %4138 = vst [vmem:[#allocation9 + $0xe8] sm:$0xff] %v4074_v24  ;;  %v3980_v32 = vmul.f32 0.6931472, %v5023_v45 }
 0x620   : > { %4139 = vst [vmem:[#allocation9 + $0xf0] sm:$0xff] %v4075_v25  ;;  %v3982_v49 = vmul.f32 0.6931472, %v5025_v10  ;;  %v3868_v50 = vpop.xlane.xlu1 %3867  ;;  %v3870_v59 = vpop.xlane.xlu0 %3869 }
 0x621   : > { %v4076_v42 = vsub.f32 %v7065_v6, %v3980_v32  ;;  %5038 = vlog2.f32 %v3868_v50 }
 0x622   : > { %v5027_v62 = vpop.eup %5026  ;;  %v4077_v37 = vsub.f32 %v7070_v16, %v3982_v49  ;;  %5040 = vlog2.f32 %v3870_v59 }
 0x623   : > { %v5029_v23 = vpop.eup %5028  ;;  %4140 = vst [vmem:[#allocation9 + $0xf8] sm:$0xff] %v4076_v42  ;;  %v3984_v18 = vmul.f32 0.6931472, %v5027_v62 }
 0x624   : > { %4141 = vst [vmem:[#allocation9 + $0x100] sm:$0xff] %v4077_v37  ;;  %v3986_v57 = vmul.f32 0.6931472, %v5029_v23  ;;  %v3872_v0 = vpop.xlane.xlu1 %3871  ;;  %v3874_v30 = vpop.xlane.xlu0 %3873 }
 0x625   : > { %v4078_v17 = vsub.f32 %v7073_v5, %v3984_v18  ;;  %5042 = vlog2.f32 %v3872_v0 }
 0x626   : > { %v5031_v13 = vpop.eup %5030  ;;  %v4079_v41 = vsub.f32 %v7078_v58, %v3986_v57  ;;  %5044 = vlog2.f32 %v3874_v30 }
 0x627   : > { %v5033_v6 = vpop.eup %5032  ;;  %4142 = vst [vmem:[#allocation9 + $0x108] sm:$0xff] %v4078_v17  ;;  %v3988_v9 = vmul.f32 0.6931472, %v5031_v13 }
 0x628   : > { %4143 = vst [vmem:[#allocation9 + $0x110] sm:$0xff] %v4079_v41  ;;  %v3990_v16 = vmul.f32 0.6931472, %v5033_v6  ;;  %v3876_v61 = vpop.xlane.xlu1 %3875  ;;  %v3878_v31 = vpop.xlane.xlu0 %3877  ;;  %v7594_v6 = vld [vmem:[#allocation103_spill] sm:$0xff] }
 0x629   : > { %v4080_v34 = vsub.f32 %v7081_v4, %v3988_v9  ;;  %5046 = vlog2.f32 %v3876_v61  ;;  %v7595_v61 = vld [vmem:[#allocation104_spill] sm:$0xff] }
 0x62a   : > { %v5035_v36 = vpop.eup %5034  ;;  %v4081_v63 = vsub.f32 %v7086_v33, %v3990_v16  ;;  %5048 = vlog2.f32 %v3878_v31 }
 0x62b   : > { %v5037_v5 = vpop.eup %5036  ;;  %4144 = vst [vmem:[#allocation9 + $0x118] sm:$0xff] %v4080_v34  ;;  %v3992_v1 = vmul.f32 0.6931472, %v5035_v36 }
 0x62c   : > { %4145 = vst [vmem:[#allocation9 + $0x120] sm:$0xff] %v4081_v63  ;;  %v3994_v58 = vmul.f32 0.6931472, %v5037_v5  ;;  %v3880_v43 = vpop.xlane.xlu1 %3879  ;;  %v3882_v35 = vpop.xlane.xlu0 %3881  ;;  %v7596_v5 = vld [vmem:[#allocation105_spill] sm:$0xff] }
 0x62d   : > { %v4082_v22 = vsub.f32 %v7089_v2, %v3992_v1  ;;  %5050 = vlog2.f32 %v3880_v43 }
 0x62e   : > { %v5039_v40 = vpop.eup %5038  ;;  %v4083_v8 = vsub.f32 %v7094_v7, %v3994_v58  ;;  %5052 = vlog2.f32 %v3882_v35 }
 0x62f   : > { %v5041_v4 = vpop.eup %5040  ;;  %4146 = vst [vmem:[#allocation9 + $0x128] sm:$0xff] %v4082_v22  ;;  %v3996_v27 = vmul.f32 0.6931472, %v5039_v40 }
 0x630   : > { %4147 = vst [vmem:[#allocation9 + $0x130] sm:$0xff] %v4083_v8  ;;  %v3998_v33 = vmul.f32 0.6931472, %v5041_v4  ;;  %v3884_v29 = vpop.xlane.xlu1 %3883  ;;  %v3886_v28 = vpop.xlane.xlu0 %3885 }
 0x631   : > { %v4084_v15 = vsub.f32 %v7097_v52, %v3996_v27  ;;  %5054 = vlog2.f32 %v3884_v29  ;;  %v7597_v27 = vld [vmem:[#allocation90_spill] sm:$0xff] }
 0x632   : > { %v5043_v26 = vpop.eup %5042  ;;  %v4085_v20 = vsub.f32 %v7102_v48, %v3998_v33  ;;  %5056 = vlog2.f32 %v3886_v28  ;;  %v7598_v28 = vld [vmem:[#allocation91_spill] sm:$0xff] }
 0x633   : > { %v5045_v2 = vpop.eup %5044  ;;  %4148 = vst [vmem:[#allocation9 + $0x138] sm:$0xff] %v4084_v15  ;;  %v4000_v51 = vmul.f32 0.6931472, %v5043_v26 }
 0x634   : > { %4149 = vst [vmem:[#allocation9 + $0x140] sm:$0xff] %v4085_v20  ;;  %v4002_v7 = vmul.f32 0.6931472, %v5045_v2  ;;  %v3888_v11 = vpop.xlane.xlu1 %3887  ;;  %v3890_v14 = vpop.xlane.xlu0 %3889 }
 0x635   : > { %v4086_v60 = vsub.f32 %v7105_v3, %v4000_v51  ;;  %5058 = vlog2.f32 %v3888_v11  ;;  %v7599_v51 = vld [vmem:[#allocation92_spill] sm:$0xff] }
 0x636   : > { %v5047_v46 = vpop.eup %5046  ;;  %v4087_v12 = vsub.f32 %v7110_v19, %v4002_v7  ;;  %5060 = vlog2.f32 %v3890_v14  ;;  %v7600_v14 = vld [vmem:[#allocation93_spill] sm:$0xff] }
 0x637   : > { %v5049_v52 = vpop.eup %5048  ;;  %4150 = vst [vmem:[#allocation9 + $0x148] sm:$0xff] %v4086_v60  ;;  %v4004_v56 = vmul.f32 0.6931472, %v5047_v46 }
 0x638   : > { %4151 = vst [vmem:[#allocation9 + $0x150] sm:$0xff] %v4087_v12  ;;  %v4006_v48 = vmul.f32 0.6931472, %v5049_v52  ;;  %v3892_v38 = vpop.xlane.xlu1 %3891  ;;  %v3894_v24 = vpop.xlane.xlu0 %3893 }
 0x639   : > { %v4088_v45 = vsub.f32 %v7113_v47, %v4004_v56  ;;  %5062 = vlog2.f32 %v3892_v38  ;;  %v7601_v56 = vld [vmem:[#allocation94_spill] sm:$0xff] }
 0x63a   : > { %v5051_v25 = vpop.eup %5050  ;;  %v4089_v10 = vsub.f32 %v7118_v44, %v4006_v48  ;;  %5064 = vlog2.f32 %v3894_v24  ;;  %v7602_v24 = vld [vmem:[#allocation95_spill] sm:$0xff] }
 0x63b   : > { %v5053_v3 = vpop.eup %5052  ;;  %4152 = vst [vmem:[#allocation9 + $0x158] sm:$0xff] %v4088_v45  ;;  %v4008_v32 = vmul.f32 0.6931472, %v5051_v25 }
 0x63c   : > { %4153 = vst [vmem:[#allocation9 + $0x160] sm:$0xff] %v4089_v10  ;;  %v4010_v19 = vmul.f32 0.6931472, %v5053_v3  ;;  %v3896_v49 = vpop.xlane.xlu1 %3895  ;;  %v3898_v50 = vpop.xlane.xlu0 %3897 }
 0x63d   : > { %v4090_v59 = vsub.f32 %v7121_v53, %v4008_v32  ;;  %5066 = vlog2.f32 %v3896_v49  ;;  %v7603_v32 = vld [vmem:[#allocation96_spill] sm:$0xff] }
 0x63e   : > { %v5055_v42 = vpop.eup %5054  ;;  %v4091_v62 = vsub.f32 %v7126_v21, %v4010_v19  ;;  %5068 = vlog2.f32 %v3898_v50  ;;  %v7604_v50 = vld [vmem:[#allocation97_spill] sm:$0xff] }
 0x63f   : > { %v5057_v47 = vpop.eup %5056  ;;  %4154 = vst [vmem:[#allocation9 + $0x168] sm:$0xff] %v4090_v59  ;;  %v4012_v37 = vmul.f32 0.6931472, %v5055_v42 }
 0x640   : > { %4155 = vst [vmem:[#allocation9 + $0x170] sm:$0xff] %v4091_v62  ;;  %v4014_v44 = vmul.f32 0.6931472, %v5057_v47  ;;  %v3900_v23 = vpop.xlane.xlu1 %3899  ;;  %v3902_v18 = vpop.xlane.xlu0 %3901 }
 0x641   : > { %v4092_v57 = vsub.f32 %v7129_v55, %v4012_v37  ;;  %5070 = vlog2.f32 %v3900_v23  ;;  %v7605_v37 = vld [vmem:[#allocation98_spill] sm:$0xff] }
 0x642   : > { %v5059_v0 = vpop.eup %5058  ;;  %v4093_v30 = vsub.f32 %v7134_v54, %v4014_v44  ;;  %5072 = vlog2.f32 %v3902_v18  ;;  %v7606_v18 = vld [vmem:[#allocation106_spill] sm:$0xff] }
 0x643   : > { %v5061_v53 = vpop.eup %5060  ;;  %4156 = vst [vmem:[#allocation9 + $0x178] sm:$0xff] %v4092_v57  ;;  %v4016_v17 = vmul.f32 0.6931472, %v5059_v0 }
 0x644   : > { %4157 = vst [vmem:[#allocation9 + $0x180] sm:$0xff] %v4093_v30  ;;  %v4018_v21 = vmul.f32 0.6931472, %v5061_v53  ;;  %v3904_v13 = vpop.xlane.xlu1 %3903  ;;  %v3906_v41 = vpop.xlane.xlu0 %3905  ;;  %v7607_v30 = vld [vmem:[#allocation99_spill] sm:$0xff] }
 0x645   : > { %v4094_v9 = vsub.f32 %v7594_v6, %v4016_v17  ;;  %5074 = vlog2.f32 %v3904_v13 }
 0x646   : > { %v5063_v16 = vpop.eup %5062  ;;  %v4095_v31 = vsub.f32 %v7595_v61, %v4018_v21  ;;  %5076 = vlog2.f32 %v3906_v41 }
 0x647   : > { %v5065_v55 = vpop.eup %5064  ;;  %4158 = vst [vmem:[#allocation9 + $0x188] sm:$0xff] %v4094_v9  ;;  %v4020_v34 = vmul.f32 0.6931472, %v5063_v16 }
 0x648   : > { %4159 = vst [vmem:[#allocation9 + $0x190] sm:$0xff] %v4095_v31  ;;  %v4022_v54 = vmul.f32 0.6931472, %v5065_v55  ;;  %v3908_v36 = vpop.xlane.xlu1 %3907  ;;  %v3910_v63 = vpop.xlane.xlu0 %3909 }
 0x649   : > { %v4096_v1 = vsub.f32 %v7596_v5, %v4020_v34  ;;  %5078 = vlog2.f32 %v3908_v36 }
 0x64a   : > { %v5067_v58 = vpop.eup %5066  ;;  %v4097_v43 = vsub.f32 %v7150_v39, %v4022_v54  ;;  %5080 = vlog2.f32 %v3910_v63 }
 0x64b   : > { %v5069_v35 = vpop.eup %5068  ;;  %4160 = vst [vmem:[#allocation9 + $0x198] sm:$0xff] %v4096_v1  ;;  %v4024_v22 = vmul.f32 0.6931472, %v5067_v58 }
 0x64c   : > { %4161 = vst [vmem:[#allocation9 + $0x1a0] sm:$0xff] %v4097_v43  ;;  %v4026_v40 = vmul.f32 0.6931472, %v5069_v35  ;;  %v3912_v8 = vpop.xlane.xlu1 %3911  ;;  %v3914_v4 = vpop.xlane.xlu0 %3913 }
 0x64d   : > { %v4098_v33 = vsub.f32 %v7597_v27, %v4024_v22  ;;  %5082 = vlog2.f32 %v3912_v8 }
 0x64e   : > { %v5071_v29 = vpop.eup %5070  ;;  %v4099_v15 = vsub.f32 %v7598_v28, %v4026_v40  ;;  %5084 = vlog2.f32 %v3914_v4 }
 0x64f   : > { %v5073_v26 = vpop.eup %5072  ;;  %4162 = vst [vmem:[#allocation9 + $0x1a8] sm:$0xff] %v4098_v33  ;;  %v4028_v20 = vmul.f32 0.6931472, %v5071_v29 }
 0x650   : > { %4163 = vst [vmem:[#allocation9 + $0x1b0] sm:$0xff] %v4099_v15  ;;  %v4030_v39 = vmul.f32 0.6931472, %v5073_v26  ;;  %v3916_v2 = vpop.xlane.xlu1 %3915 }
 0x651   : > { %v4100_v7 = vsub.f32 %v7599_v51, %v4028_v20  ;;  %5086 = vlog2.f32 %v3916_v2 }
 0x652   : > { %v5075_v11 = vpop.eup %5074  ;;  %v4101_v60 = vsub.f32 %v7600_v14, %v4030_v39 }
 0x653   : > { %v5077_v46 = vpop.eup %5076  ;;  %4164 = vst [vmem:[#allocation9 + $0x1b8] sm:$0xff] %v4100_v7  ;;  %v4032_v12 = vmul.f32 0.6931472, %v5075_v11 }
 0x654   : > { %4165 = vst [vmem:[#allocation9 + $0x1c0] sm:$0xff] %v4101_v60  ;;  %v4034_v52 = vmul.f32 0.6931472, %v5077_v46 }
 0x655   : > { %v4102_v48 = vsub.f32 %v7601_v56, %v4032_v12 }
 0x656   : > { %v5079_v38 = vpop.eup %5078  ;;  %v4103_v45 = vsub.f32 %v7602_v24, %v4034_v52 }
 0x657   : > { %v5081_v25 = vpop.eup %5080  ;;  %4166 = vst [vmem:[#allocation9 + $0x1c8] sm:$0xff] %v4102_v48  ;;  %v4036_v10 = vmul.f32 0.6931472, %v5079_v38 }
 0x658   : > { %4167 = vst [vmem:[#allocation9 + $0x1d0] sm:$0xff] %v4103_v45  ;;  %v4038_v3 = vmul.f32 0.6931472, %v5081_v25 }
 0x659   : > { %v4104_v19 = vsub.f32 %v7603_v32, %v4036_v10 }
 0x65a   : > { %v5083_v49 = vpop.eup %5082  ;;  %v4105_v59 = vsub.f32 %v7604_v50, %v4038_v3 }
 0x65b   : > { %v5085_v42 = vpop.eup %5084  ;;  %4168 = vst [vmem:[#allocation9 + $0x1d8] sm:$0xff] %v4104_v19  ;;  %v4040_v62 = vmul.f32 0.6931472, %v5083_v49 }
 0x65c   : > { %4169 = vst [vmem:[#allocation9 + $0x1e0] sm:$0xff] %v4105_v59  ;;  %v4042_v47 = vmul.f32 0.6931472, %v5085_v42 }
 0x65d   : > { %v4106_v44 = vsub.f32 %v7605_v37, %v4040_v62 }
 0x65e   : > { %v5087_v23 = vpop.eup %5086  ;;  %v4107_v57 = vsub.f32 %v7606_v18, %v4042_v47 }
 0x65f   : > { %4170 = vst [vmem:[#allocation9 + $0x1e8] sm:$0xff] %v4106_v44  ;;  %v4044_v0 = vmul.f32 0.6931472, %v5087_v23 }
 0x660   : > { %4171 = vst [vmem:[#allocation9 + $0x1f0] sm:$0xff] %v4107_v57 }
 0x661   : > { %v4108_v53 = vsub.f32 %v7607_v30, %v4044_v0 }
 0x663   : > { %4172 = vst [vmem:[#allocation9 + $0x1f8] sm:$0xff] %v4108_v53 }
 0x664 PF: > { %p7263_p0 = scmp.eq.s32.totalorder %s4286_s8, 10  ;;  %s5189_s19 = smov [#allocation9]  }
 0x665   : > { %s4189_s20 = sshll.u32 %s5189_s19, 4  ;;  %s4190_s20 = int_to_ptr.vmem [resolvable:$true] %s4189_s20 }
 0x666   : > { %s5126_s21 = scalar_lea.vmem %s4190_s20, 8192  ;;  %s5132_s22 = scalar_lea.vmem %s4190_s20, 16384 }
 0x667   : > { %p5127_p1 = scmp.ne.s32.totalorder %s4190_s20, %s5126_s21  ;;  %p5133_p4 = scmp.lt.s32.totalorder %s4190_s20, %s4190_s20 }
 0x668   : > { %p5134_p5 = scmp.lt.s32.totalorder %s5132_s22, %s5126_s21 }
 0x669   : > { %p5128_p2 = pnand %p5127_p1, %p7263_p0 }
 0x66a   : > { %p5135_p6 = por %p5134_p5, %p5133_p4 }
 0x66b   : > { %p5129_p3 = pneg %p5128_p2 }
 0x66d   : > { %p5136_p7 = pnand %p5135_p6, %p5129_p3 }
 0x66f   : > { %5139 = shalt.err (!%p5136_p7)
}
 0x670   : > { %s5190_s23 = smov 128   ;;  %s5191_s8 = smov 8  }
 0x671   : > { %4784 = dma.vmem_to_hbm [thread:$0]  (%p7263_p0), %s4190_s20, 8192, %s7293_s7, [#allocation8], %s5190_s23, %s5190_s23, %s5191_s8  }
 0x672 PF: > { %p4798_p8 = scmp.ge.s32.totalorder %s5182_s0, 2  ;;  %p4799_p9 = scmp.eq.s32.totalorder %s4287_s9, 10 }
 0x674   : > { %p4792_p10 = pnand %p4799_p9, %p4798_p8 }
 0x676   : > { %p4793_p11 = pneg %p4792_p10 }
 0x678   : > { %5169 = dma.done.wait (%p4793_p11), [#allocation8], 8192  }
 0x679   : > { %5171 = vsyncadd (%p4793_p11), [#allocation8], 4294959104  ;;  %s27_s0 = sadd.s32 1, %s5182_s0   ;;  %s7609_s29 = smov %s5178_s30 }
 0x67a   : > { %p24_p12 = scmp.ge.s32.totalorder %s27_s0, 13   ;;  %s7610_s30 = smov %s7612_s10 }
 0x67c   :  { %26 = sbr.rel (!%p24_p12) target bundleno = 19 (0x13), region = 106 }
 0x681   :  { %4210 = vsyncpa [#allocation7], 1 }
 0x682   :  { %4212 = vsyncpa [#allocation7 + $0x1], 1 }
 0x683   :  { %4213 = vsyncpa [#allocation8], 1 }
 0x684   :  { %4215 = vsyncpa [#allocation8 + $0x1], 1 }

</bundles_post_ra>
